<compile_context>
chip_gen: v6e
topology: v6e:2x2x1
jax: 0.10.0
libtpu: 0.0.40
codegen_flags: <defaults>
</compile_context>

<pallas_src>
import functools

import numpy as np
import jax
import jax.numpy as jnp
from jax.experimental import pallas as pl
from jax.experimental.pallas import tpu as pltpu


# ----------------------------------------------------------------------------
# Wrapper-side 0/1 selection-matrix builders (compile-time numpy constants).
# ----------------------------------------------------------------------------
def _round_up(x, m):
    return (x + m - 1) // m * m


def _row_place(bt, h, sp, pad):
    """Block-diagonal placement: output row b*sp+pad+r <- input row b*h+r."""
    m = np.zeros((bt * sp, bt * h), np.float32)
    for b in range(bt):
        for r in range(h):
            m[b * sp + pad + r, b * h + r] = 1.0
    return m


def _row_pool_pair(bt, h_out, sp_out, pad_out, sp_in, m_in):
    """Block-diagonal row 2x2-pool pickers (even/odd), with zero-pad rows for
    the next conv already in place: out row b*sp_out+pad_out+r <- in row
    b*sp_in + 2r (+1 for the odd picker)."""
    pe = np.zeros((bt * sp_out, m_in), np.float32)
    po = np.zeros_like(pe)
    for b in range(bt):
        for r in range(h_out):
            pe[b * sp_out + pad_out + r, b * sp_in + 2 * r] = 1.0
            po[b * sp_out + pad_out + r, b * sp_in + 2 * r + 1] = 1.0
    return np.stack([pe, po])


def _col_pool_pair(w_in, c):
    """Lane-direction 2x2-pool pickers for lane-dense (rows, w_in*c) tensors:
    out lane wo*c+ci <- in lane (2*wo)*c+ci (even) / (2*wo+1)*c+ci (odd)."""
    w_out = w_in // 2
    se = np.zeros((w_in * c, w_out * c), np.float32)
    so = np.zeros_like(se)
    for k in range(w_out * c):
        wo, ci = divmod(k, c)
        se[(2 * wo) * c + ci, k] = 1.0
        so[(2 * wo + 1) * c + ci, k] = 1.0
    return np.stack([se, so])


def _toeplitz_weights(w_hwio, w_out):
    """(kh, kw, cin, cout) -> width-Toeplitz (kh, w_out*cin, w_out*cout).
    'same' zero padding along W is folded into the weights."""
    kh, kw, cin, cout = w_hwio.shape
    pad = kw // 2
    wi = jnp.arange(w_out)[:, None]
    wo = jnp.arange(w_out)[None, :]
    dw = wi - wo + pad                                       # (w_out, w_out)
    valid = (dw >= 0) & (dw < kw)
    g = w_hwio[:, jnp.clip(dw, 0, kw - 1), :, :]             # (kh, wi, w, cin, cout)
    g = jnp.where(valid[None, :, :, None, None], g, 0.0)
    t = jnp.transpose(g, (0, 1, 3, 2, 4))                    # (kh, wi, cin, w, cout)
    return t.reshape(kh, w_out * cin, w_out * cout)


def _pick_block_batch(b):
    """Largest Bt <= 8 dividing B, preferring an even number of grid steps
    (keeps both v7x TensorCores busy with dimension_semantics='parallel')."""
    for bt in (8, 4, 2, 1):
        if b % bt == 0 and (b // bt) % 2 == 0:
            return bt
    for bt in (8, 4, 2, 1):
        if b % bt == 0:
            return bt
    return 1


# ----------------------------------------------------------------------------
# Kernel building blocks.
# ----------------------------------------------------------------------------
def _conv_relu(p, t_ref, b_ref, m):
    """p: (>= m+kh-1, W*Cin) f32 row-padded stacked input; t_ref: bf16
    width-Toeplitz (kh, W*Cin, W*Cout).  bf16 operands, f32 accumulation."""
    kh, _, n = t_ref.shape
    acc = jnp.broadcast_to(b_ref[...], (m, n))               # bias-initialized acc
    for dh in range(kh):                                     # kh MXU matmuls
        acc = acc + jnp.dot(p[dh:dh + m].astype(jnp.bfloat16), t_ref[dh],
                            preferred_element_type=jnp.float32)
    return jnp.maximum(acc, 0.0)


def _pool_cols(y, s_ref):
    """Lane-direction half of the 2x2 max pool via bf16 0/1 selection matmuls."""
    yb = y.astype(jnp.bfloat16)
    return jnp.maximum(jnp.dot(yb, s_ref[0], preferred_element_type=jnp.float32),
                       jnp.dot(yb, s_ref[1], preferred_element_type=jnp.float32))


def _pool_rows(pr_ref, a):
    """Row-direction half of the 2x2 max pool + next-layer zero row padding."""
    return jnp.maximum(jnp.dot(pr_ref[0], a, preferred_element_type=jnp.float32),
                       jnp.dot(pr_ref[1], a, preferred_element_type=jnp.float32))


def _motion_enc_kernel(x_ref, t1_ref, t2_ref, t3_ref, b1_ref, b2_ref, b3_ref,
                       r1_ref, pr2_ref, pr3_ref, pr4_ref,
                       s1_ref, s2_ref, s3_ref,
                       c1_ref, c2_ref, c3_ref, out_ref):
    bt, h1, _ = c1_ref.shape
    h2, h3 = c2_ref.shape[1], c3_ref.shape[1]
    sp1 = r1_ref.shape[0] // bt                               # per-sample padded strides
    sp2 = pr2_ref.shape[1] // bt
    sp3 = pr3_ref.shape[1] // bt
    h4 = pr4_ref.shape[1] // bt
    m1 = bt * sp1 - (t1_ref.shape[0] - 1)                     # conv output row counts
    m2 = bt * sp2 - (t2_ref.shape[0] - 1)
    m3 = bt * sp3 - (t3_ref.shape[0] - 1)

    # conv1: per-sample zero row padding produced by the block-diagonal matmul.
    p1 = jnp.dot(r1_ref[...], x_ref[...], preferred_element_type=jnp.float32)
    y1 = _conv_relu(p1, t1_ref, b1_ref, m1)                   # (m1, W*gf)
    for b in range(bt):                                       # aligned slab stores
        c1_ref[b] = y1[b * sp1:b * sp1 + h1]

    # pool1 -> conv2
    p2 = _pool_rows(pr2_ref, _pool_cols(y1, s1_ref))          # (bt*sp2, (W/2)*gf)
    y2 = _conv_relu(p2, t2_ref, b2_ref, m2)                   # (m2, (W/2)*2gf)
    for b in range(bt):
        c2_ref[b] = y2[b * sp2:b * sp2 + h2]

    # pool2 -> conv3
    p3 = _pool_rows(pr3_ref, _pool_cols(y2, s2_ref))          # (bt*sp3, (W/4)*2gf)
    y3 = _conv_relu(p3, t3_ref, b3_ref, m3)                   # (m3, (W/4)*4gf)
    for b in range(bt):
        c3_ref[b] = y3[b * sp3:b * sp3 + h3]

    # final pool3
    pooled = _pool_rows(pr4_ref, _pool_cols(y3, s3_ref))      # (bt*h4, (W/8)*4gf)
    if out_ref.ndim == 2:                                     # lane-dense full-slab store
        out_ref[...] = pooled
    else:
        for b in range(bt):
            out_ref[b] = pooled[b * h4:(b + 1) * h4]


# ----------------------------------------------------------------------------
# Forward wrapper.
# ----------------------------------------------------------------------------
@functools.partial(jax.jit, static_argnames=("block_b",))
def motion_enc_forward(params, input_diff_nchw, block_b=None):
    """MotionEnc.forward.  input_diff_nchw: (B, 1, H, W).
    Returns (output, [conv1_out, conv2_out, conv3_out]) in NCHW (PyTorch order)."""
    B, cin, H, W = input_diff_nchw.shape
    assert cin == 1 and H % 8 == 0 and W % 8 == 0
    gf = params["b1"].shape[0]

    bt = block_b if block_b is not None else _pick_block_batch(B)
    assert B % bt == 0
    grid_b = B // bt

    kh1, kh2, kh3 = params["w1"].shape[0], params["w2"].shape[0], params["w3"].shape[0]
    pd1, pd2, pd3 = kh1 // 2, kh2 // 2, kh3 // 2
    h1, h2, h3, h4 = H, H // 2, H // 4, H // 8
    W2, W4, W8 = W // 2, W // 4, W // 8
    n1, n2, n3, n_out = W * gf, W2 * 2 * gf, W4 * 4 * gf, W8 * 4 * gf

    # Per-sample padded row strides (multiples of 8 so residual slices/stores align).
    sp1 = _round_up(h1 + 2 * pd1, 8)
    sp2 = _round_up(h2 + 2 * pd2, 8)
    sp3 = _round_up(h3 + 2 * pd3, 8)
    m1 = bt * sp1 - (kh1 - 1)
    m2 = bt * sp2 - (kh2 - 1)
    m3 = bt * sp3 - (kh3 - 1)

    # Inputs / weights (bf16 operands for all heavy matmuls).
    x2d = input_diff_nchw.reshape(B * H, W).astype(jnp.float32)
    t1 = _toeplitz_weights(params["w1"], W).astype(jnp.bfloat16)
    t2 = _toeplitz_weights(params["w2"], W2).astype(jnp.bfloat16)
    t3 = _toeplitz_weights(params["w3"], W4).astype(jnp.bfloat16)
    b1 = jnp.tile(params["b1"], W)[None, :].astype(jnp.float32)
    b2 = jnp.tile(params["b2"], W2)[None, :].astype(jnp.float32)
    b3 = jnp.tile(params["b3"], W4)[None, :].astype(jnp.float32)

    # Grid-invariant selection matrices, built once on the host.
    r1 = jnp.asarray(_row_place(bt, h1, sp1, pd1), jnp.float32)
    pr2 = jnp.asarray(_row_pool_pair(bt, h2, sp2, pd2, sp1, m1), jnp.float32)
    pr3 = jnp.asarray(_row_pool_pair(bt, h3, sp3, pd3, sp2, m2), jnp.float32)
    pr4 = jnp.asarray(_row_pool_pair(bt, h4, h4, 0, sp3, m3), jnp.float32)
    s1 = jnp.asarray(_col_pool_pair(W, gf), jnp.bfloat16)
    s2 = jnp.asarray(_col_pool_pair(W2, 2 * gf), jnp.bfloat16)
    s3 = jnp.asarray(_col_pool_pair(W4, 4 * gf), jnp.bfloat16)

    # Final output: lane-dense flat slab when it makes full 8-sublane stores.
    if (bt * h4) % 8 == 0:
        out_shape_last = jax.ShapeDtypeStruct((B * h4, n_out), jnp.float32)
        out_spec_last = pl.BlockSpec((bt * h4, n_out), lambda n: (n, 0))
    else:
        out_shape_last = jax.ShapeDtypeStruct((B, h4, n_out), jnp.float32)
        out_spec_last = pl.BlockSpec((bt, h4, n_out), lambda n: (n, 0, 0))

    c1, c2, c3, out_last = pl.pallas_call(
        _motion_enc_kernel,
        out_shape=(
            jax.ShapeDtypeStruct((B, h1, n1), jnp.float32),
            jax.ShapeDtypeStruct((B, h2, n2), jnp.float32),
            jax.ShapeDtypeStruct((B, h3, n3), jnp.float32),
            out_shape_last,
        ),
        grid=(grid_b,),
        in_specs=[
            pl.BlockSpec((bt * H, W), lambda n: (n, 0)),      # stacked samples
            pl.BlockSpec(t1.shape, lambda n: (0, 0, 0)),      # grid-invariant weights
            pl.BlockSpec(t2.shape, lambda n: (0, 0, 0)),
            pl.BlockSpec(t3.shape, lambda n: (0, 0, 0)),
            pl.BlockSpec(b1.shape, lambda n: (0, 0)),
            pl.BlockSpec(b2.shape, lambda n: (0, 0)),
            pl.BlockSpec(b3.shape, lambda n: (0, 0)),
            pl.BlockSpec(r1.shape, lambda n: (0, 0)),         # grid-invariant selectors
            pl.BlockSpec(pr2.shape, lambda n: (0, 0, 0)),
            pl.BlockSpec(pr3.shape, lambda n: (0, 0, 0)),
            pl.BlockSpec(pr4.shape, lambda n: (0, 0, 0)),
            pl.BlockSpec(s1.shape, lambda n: (0, 0, 0)),
            pl.BlockSpec(s2.shape, lambda n: (0, 0, 0)),
            pl.BlockSpec(s3.shape, lambda n: (0, 0, 0)),
        ],
        out_specs=(
            pl.BlockSpec((bt, h1, n1), lambda n: (n, 0, 0)),
            pl.BlockSpec((bt, h2, n2), lambda n: (n, 0, 0)),
            pl.BlockSpec((bt, h3, n3), lambda n: (n, 0, 0)),
            out_spec_last,
        ),
        compiler_params=pltpu.CompilerParams(
            dimension_semantics=("parallel",),                # batch blocks across TCs
            vmem_limit_bytes=32 * 1024 * 1024),
    )(x2d, t1, t2, t3, b1, b2, b3, r1, pr2, pr3, pr4, s1, s2, s3)

    # Back to PyTorch NCHW (skip if the consumer accepts the lane-dense layout).
    def to_nchw(t, c):
        bsz, hh, wc = t.shape
        return jnp.transpose(t.reshape(bsz, hh, wc // c, c), (0, 3, 1, 2))

    out = to_nchw(out_last.reshape(B, h4, n_out), 4 * gf)
    return out, [to_nchw(c1, gf), to_nchw(c2, 2 * gf), to_nchw(c3, 4 * gf)]


# ----------------------------------------------------------------------------
# Parameter init (deterministic, PyTorch-default-like uniform fan-in scaling).
# ----------------------------------------------------------------------------
def init_motion_enc_params(key, gf_dim):
    ks = jax.random.split(key, 6)

    def conv_p(kh, kw, cin, cout, k_w, k_b):
        scale = 1.0 / jnp.sqrt(cin * kh * kw)
        w = jax.random.uniform(k_w, (kh, kw, cin, cout), jnp.float32, -scale, scale)
        b = jax.random.uniform(k_b, (cout,), jnp.float32, -scale, scale)
        return w, b

    w1, b1 = conv_p(5, 5, 1, gf_dim, ks[0], ks[1])
    w2, b2 = conv_p(5, 5, gf_dim, gf_dim * 2, ks[2], ks[3])
    w3, b3 = conv_p(7, 7, gf_dim * 2, gf_dim * 4, ks[4], ks[5])
    return {"w1": w1, "b1": b1, "w2": w2, "b2": b2, "w3": w3, "b3": b3}


# ----------------------------------------------------------------------------
# Plain-JAX reference (verification only).
# ----------------------------------------------------------------------------
def _ref_conv_relu(x, w, b, pad):
    y = jax.lax.conv_general_dilated(
        x, w, (1, 1), ((pad, pad), (pad, pad)),
        dimension_numbers=("NHWC", "HWIO", "NHWC"),
        precision=jax.lax.Precision.HIGHEST)
    return jax.nn.relu(y + b)


def _ref_pool(x):
    return jax.lax.reduce_window(x, -jnp.inf, jax.lax.max,
                                 (1, 2, 2, 1), (1, 2, 2, 1), "VALID")


def motion_enc_reference(params, input_diff_nchw):
    x = jnp.transpose(input_diff_nchw, (0, 2, 3, 1)).astype(jnp.float32)
    c1 = _ref_conv_relu(x, params["w1"], params["b1"], 2)
    c2 = _ref_conv_relu(_ref_pool(c1), params["w2"], params["b2"], 2)
    c3 = _ref_conv_relu(_ref_pool(c2), params["w3"], params["b3"], 3)
    out = _ref_pool(c3)
    to_nchw = lambda t: jnp.transpose(t, (0, 3, 1, 2))
    return to_nchw(out), [to_nchw(c1), to_nchw(c2), to_nchw(c3)]


if __name__ == "__main__":
    key = jax.random.PRNGKey(0)
    k_params, k_x = jax.random.split(key)

    gf_dim = 8
    B, H, W = 4, 32, 32                      # H, W divisible by 8 (three 2x2 pools)
    params = init_motion_enc_params(k_params, gf_dim)
    input_diff = jax.random.normal(k_x, (B, 1, H, W), jnp.float32)

    out, res_in = jax.block_until_ready(motion_enc_forward(params, input_diff))

    assert out.shape == (B, gf_dim * 4, H // 8, W // 8), out.shape
    assert res_in[0].shape == (B, gf_dim, H, W)
    assert res_in[1].shape == (B, gf_dim * 2, H // 2, W // 2)
    assert res_in[2].shape == (B, gf_dim * 4, H // 4, W // 4)

    ref_out, ref_res = motion_enc_reference(params, input_diff)
    for got, want in zip([out] + list(res_in), [ref_out] + list(ref_res)):
        err = float(jnp.max(jnp.abs(got - want)))
        assert jnp.allclose(got, want, atol=1e-2, rtol=1e-2), err

    print("KERNEL_OK")
</pallas_src>

<mosaic_0001>
module attributes {stable_mosaic.version = 11 : i64} {
  func.func @_motion_enc_kernel(%arg0: i32, %arg1: memref<64x32xf32, #tpu.memory_space<vmem>>, %arg2: memref<5x32x256xbf16, #tpu.memory_space<vmem>>, %arg3: memref<5x128x256xbf16, #tpu.memory_space<vmem>>, %arg4: memref<7x128x256xbf16, #tpu.memory_space<vmem>>, %arg5: memref<1x256xf32, #tpu.memory_space<vmem>>, %arg6: memref<1x256xf32, #tpu.memory_space<vmem>>, %arg7: memref<1x256xf32, #tpu.memory_space<vmem>>, %arg8: memref<80x64xf32, #tpu.memory_space<vmem>>, %arg9: memref<2x48x76xf32, #tpu.memory_space<vmem>>, %arg10: memref<2x32x44xf32, #tpu.memory_space<vmem>>, %arg11: memref<2x8x26xf32, #tpu.memory_space<vmem>>, %arg12: memref<2x256x128xbf16, #tpu.memory_space<vmem>>, %arg13: memref<2x256x128xbf16, #tpu.memory_space<vmem>>, %arg14: memref<2x256x128xbf16, #tpu.memory_space<vmem>>, %arg15: memref<2x32x256xf32, #tpu.memory_space<vmem>>, %arg16: memref<2x16x256xf32, #tpu.memory_space<vmem>>, %arg17: memref<2x8x256xf32, #tpu.memory_space<vmem>>, %arg18: memref<8x128xf32, #tpu.memory_space<vmem>>) attributes {dimension_semantics = [#tpu.dimension_semantics<parallel>], iteration_bounds = array<i64: 2>, scalar_prefetch = 0 : i64, scratch_operands = 0 : i64, tpu.core_type = #tpu.core_type<tc>, window_params = [{transform_indices = @transform_0, window_bounds = array<i64: 64, 32>}, {pipeline_mode = #tpu.pipeline_mode<synchronous>, transform_indices = @transform_1, window_bounds = array<i64: 5, 32, 256>}, {pipeline_mode = #tpu.pipeline_mode<synchronous>, transform_indices = @transform_2, window_bounds = array<i64: 5, 128, 256>}, {pipeline_mode = #tpu.pipeline_mode<synchronous>, transform_indices = @transform_3, window_bounds = array<i64: 7, 128, 256>}, {pipeline_mode = #tpu.pipeline_mode<synchronous>, transform_indices = @transform_4, window_bounds = array<i64: 1, 256>}, {pipeline_mode = #tpu.pipeline_mode<synchronous>, transform_indices = @transform_5, window_bounds = array<i64: 1, 256>}, {pipeline_mode = #tpu.pipeline_mode<synchronous>, transform_indices = @transform_6, window_bounds = array<i64: 1, 256>}, {pipeline_mode = #tpu.pipeline_mode<synchronous>, transform_indices = @transform_7, window_bounds = array<i64: 80, 64>}, {pipeline_mode = #tpu.pipeline_mode<synchronous>, transform_indices = @transform_8, window_bounds = array<i64: 2, 48, 76>}, {pipeline_mode = #tpu.pipeline_mode<synchronous>, transform_indices = @transform_9, window_bounds = array<i64: 2, 32, 44>}, {pipeline_mode = #tpu.pipeline_mode<synchronous>, transform_indices = @transform_10, window_bounds = array<i64: 2, 8, 26>}, {pipeline_mode = #tpu.pipeline_mode<synchronous>, transform_indices = @transform_11, window_bounds = array<i64: 2, 256, 128>}, {pipeline_mode = #tpu.pipeline_mode<synchronous>, transform_indices = @transform_12, window_bounds = array<i64: 2, 256, 128>}, {pipeline_mode = #tpu.pipeline_mode<synchronous>, transform_indices = @transform_13, window_bounds = array<i64: 2, 256, 128>}, {transform_indices = @transform_14, window_bounds = array<i64: 2, 32, 256>}, {transform_indices = @transform_15, window_bounds = array<i64: 2, 16, 256>}, {transform_indices = @transform_16, window_bounds = array<i64: 2, 8, 256>}, {transform_indices = @transform_17, window_bounds = array<i64: 8, 128>}]} {
    %c0 = arith.constant 0 : index
    %c0_0 = arith.constant 0 : index
    %0 = vector.load %arg8[%c0, %c0_0] : memref<80x64xf32, #tpu.memory_space<vmem>>, vector<80x64xf32>
    %c0_1 = arith.constant 0 : index
    %c0_2 = arith.constant 0 : index
    %1 = vector.load %arg1[%c0_1, %c0_2] : memref<64x32xf32, #tpu.memory_space<vmem>>, vector<64x32xf32>
    %cst = arith.constant dense<0.000000e+00> : vector<80x32xf32>
    %2 = tpu.matmul %0, %1, %cst {dimension_numbers = #tpu.dot_dimension_numbers<[1], [0], [0], [1], [0, 0, 1, 1], [], []>} : vector<80x64xf32>, vector<64x32xf32>, vector<80x32xf32> -> vector<80x32xf32>
    %c0_3 = arith.constant 0 : index
    %c0_4 = arith.constant 0 : index
    %3 = vector.load %arg5[%c0_3, %c0_4] : memref<1x256xf32, #tpu.memory_space<vmem>>, vector<1x256xf32>
    %4 = vector.shape_cast %3 : vector<1x256xf32> to vector<1x256xf32>
    %5 = vector.broadcast %4 : vector<1x256xf32> to vector<76x256xf32>
    %6 = vector.extract_strided_slice %2 {offsets = [0, 0], sizes = [76, 32], strides = [1, 1]} : vector<80x32xf32> to vector<76x32xf32>
    %7 = arith.truncf %6 : vector<76x32xf32> to vector<76x32xbf16>
    %c0_5 = arith.constant 0 : index
    %c0_6 = arith.constant 0 : index
    %c0_7 = arith.constant 0 : index
    %8 = vector.load %arg2[%c0_5, %c0_6, %c0_7] : memref<5x32x256xbf16, #tpu.memory_space<vmem>>, vector<1x32x256xbf16>
    %9 = vector.shape_cast %8 : vector<1x32x256xbf16> to vector<32x256xbf16>
    %cst_8 = arith.constant dense<0.000000e+00> : vector<76x256xf32>
    %10 = tpu.matmul %7, %9, %cst_8 {dimension_numbers = #tpu.dot_dimension_numbers<[1], [0], [0], [1], [0, 0, 1, 1], [], []>} : vector<76x32xbf16>, vector<32x256xbf16>, vector<76x256xf32> -> vector<76x256xf32>
    %11 = arith.addf %5, %10 : vector<76x256xf32>
    %12 = vector.extract_strided_slice %2 {offsets = [1, 0], sizes = [76, 32], strides = [1, 1]} : vector<80x32xf32> to vector<76x32xf32>
    %13 = arith.truncf %12 : vector<76x32xf32> to vector<76x32xbf16>
    %c1 = arith.constant 1 : index
    %c0_9 = arith.constant 0 : index
    %c0_10 = arith.constant 0 : index
    %14 = vector.load %arg2[%c1, %c0_9, %c0_10] : memref<5x32x256xbf16, #tpu.memory_space<vmem>>, vector<1x32x256xbf16>
    %15 = vector.shape_cast %14 : vector<1x32x256xbf16> to vector<32x256xbf16>
    %cst_11 = arith.constant dense<0.000000e+00> : vector<76x256xf32>
    %16 = tpu.matmul %13, %15, %cst_11 {dimension_numbers = #tpu.dot_dimension_numbers<[1], [0], [0], [1], [0, 0, 1, 1], [], []>} : vector<76x32xbf16>, vector<32x256xbf16>, vector<76x256xf32> -> vector<76x256xf32>
    %17 = arith.addf %11, %16 : vector<76x256xf32>
    %18 = vector.extract_strided_slice %2 {offsets = [2, 0], sizes = [76, 32], strides = [1, 1]} : vector<80x32xf32> to vector<76x32xf32>
    %19 = arith.truncf %18 : vector<76x32xf32> to vector<76x32xbf16>
    %c2 = arith.constant 2 : index
    %c0_12 = arith.constant 0 : index
    %c0_13 = arith.constant 0 : index
    %20 = vector.load %arg2[%c2, %c0_12, %c0_13] : memref<5x32x256xbf16, #tpu.memory_space<vmem>>, vector<1x32x256xbf16>
    %21 = vector.shape_cast %20 : vector<1x32x256xbf16> to vector<32x256xbf16>
    %cst_14 = arith.constant dense<0.000000e+00> : vector<76x256xf32>
    %22 = tpu.matmul %19, %21, %cst_14 {dimension_numbers = #tpu.dot_dimension_numbers<[1], [0], [0], [1], [0, 0, 1, 1], [], []>} : vector<76x32xbf16>, vector<32x256xbf16>, vector<76x256xf32> -> vector<76x256xf32>
    %23 = arith.addf %17, %22 : vector<76x256xf32>
    %24 = vector.extract_strided_slice %2 {offsets = [3, 0], sizes = [76, 32], strides = [1, 1]} : vector<80x32xf32> to vector<76x32xf32>
    %25 = arith.truncf %24 : vector<76x32xf32> to vector<76x32xbf16>
    %c3 = arith.constant 3 : index
    %c0_15 = arith.constant 0 : index
    %c0_16 = arith.constant 0 : index
    %26 = vector.load %arg2[%c3, %c0_15, %c0_16] : memref<5x32x256xbf16, #tpu.memory_space<vmem>>, vector<1x32x256xbf16>
    %27 = vector.shape_cast %26 : vector<1x32x256xbf16> to vector<32x256xbf16>
    %cst_17 = arith.constant dense<0.000000e+00> : vector<76x256xf32>
    %28 = tpu.matmul %25, %27, %cst_17 {dimension_numbers = #tpu.dot_dimension_numbers<[1], [0], [0], [1], [0, 0, 1, 1], [], []>} : vector<76x32xbf16>, vector<32x256xbf16>, vector<76x256xf32> -> vector<76x256xf32>
    %29 = arith.addf %23, %28 : vector<76x256xf32>
    %30 = vector.extract_strided_slice %2 {offsets = [4, 0], sizes = [76, 32], strides = [1, 1]} : vector<80x32xf32> to vector<76x32xf32>
    %31 = arith.truncf %30 : vector<76x32xf32> to vector<76x32xbf16>
    %c4 = arith.constant 4 : index
    %c0_18 = arith.constant 0 : index
    %c0_19 = arith.constant 0 : index
    %32 = vector.load %arg2[%c4, %c0_18, %c0_19] : memref<5x32x256xbf16, #tpu.memory_space<vmem>>, vector<1x32x256xbf16>
    %33 = vector.shape_cast %32 : vector<1x32x256xbf16> to vector<32x256xbf16>
    %cst_20 = arith.constant dense<0.000000e+00> : vector<76x256xf32>
    %34 = tpu.matmul %31, %33, %cst_20 {dimension_numbers = #tpu.dot_dimension_numbers<[1], [0], [0], [1], [0, 0, 1, 1], [], []>} : vector<76x32xbf16>, vector<32x256xbf16>, vector<76x256xf32> -> vector<76x256xf32>
    %35 = arith.addf %29, %34 : vector<76x256xf32>
    %cst_21 = arith.constant 0.000000e+00 : f32
    %36 = vector.broadcast %cst_21 : f32 to vector<76x256xf32>
    %37 = arith.maximumf %35, %36 : vector<76x256xf32>
    %38 = vector.extract_strided_slice %37 {offsets = [0, 0], sizes = [32, 256], strides = [1, 1]} : vector<76x256xf32> to vector<32x256xf32>
    %c0_22 = arith.constant 0 : index
    %c0_23 = arith.constant 0 : index
    %c0_24 = arith.constant 0 : index
    %39 = vector.load %arg15[%c0_22, %c0_23, %c0_24] : memref<2x32x256xf32, #tpu.memory_space<vmem>>, vector<1x32x256xf32>
    %40 = vector.shape_cast %39 : vector<1x32x256xf32> to vector<32x256xf32>
    %41 = vector.shape_cast %38 : vector<32x256xf32> to vector<1x32x256xf32>
    tpu.vector_store %arg15[%c0_22, %c0_23, %c0_24], %41 {strides = array<i32>} : memref<2x32x256xf32, #tpu.memory_space<vmem>>, vector<1x32x256xf32>,
    %42 = vector.extract_strided_slice %37 {offsets = [40, 0], sizes = [32, 256], strides = [1, 1]} : vector<76x256xf32> to vector<32x256xf32>
    %c1_25 = arith.constant 1 : index
    %c0_26 = arith.constant 0 : index
    %c0_27 = arith.constant 0 : index
    %43 = vector.load %arg15[%c1_25, %c0_26, %c0_27] : memref<2x32x256xf32, #tpu.memory_space<vmem>>, vector<1x32x256xf32>
    %44 = vector.shape_cast %43 : vector<1x32x256xf32> to vector<32x256xf32>
    %45 = vector.shape_cast %42 : vector<32x256xf32> to vector<1x32x256xf32>
    tpu.vector_store %arg15[%c1_25, %c0_26, %c0_27], %45 {strides = array<i32>} : memref<2x32x256xf32, #tpu.memory_space<vmem>>, vector<1x32x256xf32>,
    %46 = arith.truncf %37 : vector<76x256xf32> to vector<76x256xbf16>
    %c0_28 = arith.constant 0 : index
    %c0_29 = arith.constant 0 : index
    %c0_30 = arith.constant 0 : index
    %47 = vector.load %arg12[%c0_28, %c0_29, %c0_30] : memref<2x256x128xbf16, #tpu.memory_space<vmem>>, vector<1x256x128xbf16>
    %48 = vector.shape_cast %47 : vector<1x256x128xbf16> to vector<256x128xbf16>
    %cst_31 = arith.constant dense<0.000000e+00> : vector<76x128xf32>
    %49 = tpu.matmul %46, %48, %cst_31 {dimension_numbers = #tpu.dot_dimension_numbers<[1], [0], [0], [1], [0, 0, 1, 1], [], []>} : vector<76x256xbf16>, vector<256x128xbf16>, vector<76x128xf32> -> vector<76x128xf32>
    %c1_32 = arith.constant 1 : index
    %c0_33 = arith.constant 0 : index
    %c0_34 = arith.constant 0 : index
    %50 = vector.load %arg12[%c1_32, %c0_33, %c0_34] : memref<2x256x128xbf16, #tpu.memory_space<vmem>>, vector<1x256x128xbf16>
    %51 = vector.shape_cast %50 : vector<1x256x128xbf16> to vector<256x128xbf16>
    %cst_35 = arith.constant dense<0.000000e+00> : vector<76x128xf32>
    %52 = tpu.matmul %46, %51, %cst_35 {dimension_numbers = #tpu.dot_dimension_numbers<[1], [0], [0], [1], [0, 0, 1, 1], [], []>} : vector<76x256xbf16>, vector<256x128xbf16>, vector<76x128xf32> -> vector<76x128xf32>
    %53 = arith.maximumf %49, %52 : vector<76x128xf32>
    %c0_36 = arith.constant 0 : index
    %c0_37 = arith.constant 0 : index
    %c0_38 = arith.constant 0 : index
    %54 = vector.load %arg9[%c0_36, %c0_37, %c0_38] : memref<2x48x76xf32, #tpu.memory_space<vmem>>, vector<1x48x76xf32>
    %55 = vector.shape_cast %54 : vector<1x48x76xf32> to vector<48x76xf32>
    %cst_39 = arith.constant dense<0.000000e+00> : vector<48x128xf32>
    %56 = tpu.matmul %55, %53, %cst_39 {dimension_numbers = #tpu.dot_dimension_numbers<[1], [0], [0], [1], [0, 0, 1, 1], [], []>} : vector<48x76xf32>, vector<76x128xf32>, vector<48x128xf32> -> vector<48x128xf32>
    %c1_40 = arith.constant 1 : index
    %c0_41 = arith.constant 0 : index
    %c0_42 = arith.constant 0 : index
    %57 = vector.load %arg9[%c1_40, %c0_41, %c0_42] : memref<2x48x76xf32, #tpu.memory_space<vmem>>, vector<1x48x76xf32>
    %58 = vector.shape_cast %57 : vector<1x48x76xf32> to vector<48x76xf32>
    %cst_43 = arith.constant dense<0.000000e+00> : vector<48x128xf32>
    %59 = tpu.matmul %58, %53, %cst_43 {dimension_numbers = #tpu.dot_dimension_numbers<[1], [0], [0], [1], [0, 0, 1, 1], [], []>} : vector<48x76xf32>, vector<76x128xf32>, vector<48x128xf32> -> vector<48x128xf32>
    %60 = arith.maximumf %56, %59 : vector<48x128xf32>
    %c0_44 = arith.constant 0 : index
    %c0_45 = arith.constant 0 : index
    %61 = vector.load %arg6[%c0_44, %c0_45] : memref<1x256xf32, #tpu.memory_space<vmem>>, vector<1x256xf32>
    %62 = vector.shape_cast %61 : vector<1x256xf32> to vector<1x256xf32>
    %63 = vector.broadcast %62 : vector<1x256xf32> to vector<44x256xf32>
    %64 = vector.extract_strided_slice %60 {offsets = [0, 0], sizes = [44, 128], strides = [1, 1]} : vector<48x128xf32> to vector<44x128xf32>
    %65 = arith.truncf %64 : vector<44x128xf32> to vector<44x128xbf16>
    %c0_46 = arith.constant 0 : index
    %c0_47 = arith.constant 0 : index
    %c0_48 = arith.constant 0 : index
    %66 = vector.load %arg3[%c0_46, %c0_47, %c0_48] : memref<5x128x256xbf16, #tpu.memory_space<vmem>>, vector<1x128x256xbf16>
    %67 = vector.shape_cast %66 : vector<1x128x256xbf16> to vector<128x256xbf16>
    %cst_49 = arith.constant dense<0.000000e+00> : vector<44x256xf32>
    %68 = tpu.matmul %65, %67, %cst_49 {dimension_numbers = #tpu.dot_dimension_numbers<[1], [0], [0], [1], [0, 0, 1, 1], [], []>} : vector<44x128xbf16>, vector<128x256xbf16>, vector<44x256xf32> -> vector<44x256xf32>
    %69 = arith.addf %63, %68 : vector<44x256xf32>
    %70 = vector.extract_strided_slice %60 {offsets = [1, 0], sizes = [44, 128], strides = [1, 1]} : vector<48x128xf32> to vector<44x128xf32>
    %71 = arith.truncf %70 : vector<44x128xf32> to vector<44x128xbf16>
    %c1_50 = arith.constant 1 : index
    %c0_51 = arith.constant 0 : index
    %c0_52 = arith.constant 0 : index
    %72 = vector.load %arg3[%c1_50, %c0_51, %c0_52] : memref<5x128x256xbf16, #tpu.memory_space<vmem>>, vector<1x128x256xbf16>
    %73 = vector.shape_cast %72 : vector<1x128x256xbf16> to vector<128x256xbf16>
    %cst_53 = arith.constant dense<0.000000e+00> : vector<44x256xf32>
    %74 = tpu.matmul %71, %73, %cst_53 {dimension_numbers = #tpu.dot_dimension_numbers<[1], [0], [0], [1], [0, 0, 1, 1], [], []>} : vector<44x128xbf16>, vector<128x256xbf16>, vector<44x256xf32> -> vector<44x256xf32>
    %75 = arith.addf %69, %74 : vector<44x256xf32>
    %76 = vector.extract_strided_slice %60 {offsets = [2, 0], sizes = [44, 128], strides = [1, 1]} : vector<48x128xf32> to vector<44x128xf32>
    %77 = arith.truncf %76 : vector<44x128xf32> to vector<44x128xbf16>
    %c2_54 = arith.constant 2 : index
    %c0_55 = arith.constant 0 : index
    %c0_56 = arith.constant 0 : index
    %78 = vector.load %arg3[%c2_54, %c0_55, %c0_56] : memref<5x128x256xbf16, #tpu.memory_space<vmem>>, vector<1x128x256xbf16>
    %79 = vector.shape_cast %78 : vector<1x128x256xbf16> to vector<128x256xbf16>
    %cst_57 = arith.constant dense<0.000000e+00> : vector<44x256xf32>
    %80 = tpu.matmul %77, %79, %cst_57 {dimension_numbers = #tpu.dot_dimension_numbers<[1], [0], [0], [1], [0, 0, 1, 1], [], []>} : vector<44x128xbf16>, vector<128x256xbf16>, vector<44x256xf32> -> vector<44x256xf32>
    %81 = arith.addf %75, %80 : vector<44x256xf32>
    %82 = vector.extract_strided_slice %60 {offsets = [3, 0], sizes = [44, 128], strides = [1, 1]} : vector<48x128xf32> to vector<44x128xf32>
    %83 = arith.truncf %82 : vector<44x128xf32> to vector<44x128xbf16>
    %c3_58 = arith.constant 3 : index
    %c0_59 = arith.constant 0 : index
    %c0_60 = arith.constant 0 : index
    %84 = vector.load %arg3[%c3_58, %c0_59, %c0_60] : memref<5x128x256xbf16, #tpu.memory_space<vmem>>, vector<1x128x256xbf16>
    %85 = vector.shape_cast %84 : vector<1x128x256xbf16> to vector<128x256xbf16>
    %cst_61 = arith.constant dense<0.000000e+00> : vector<44x256xf32>
    %86 = tpu.matmul %83, %85, %cst_61 {dimension_numbers = #tpu.dot_dimension_numbers<[1], [0], [0], [1], [0, 0, 1, 1], [], []>} : vector<44x128xbf16>, vector<128x256xbf16>, vector<44x256xf32> -> vector<44x256xf32>
    %87 = arith.addf %81, %86 : vector<44x256xf32>
    %88 = vector.extract_strided_slice %60 {offsets = [4, 0], sizes = [44, 128], strides = [1, 1]} : vector<48x128xf32> to vector<44x128xf32>
    %89 = arith.truncf %88 : vector<44x128xf32> to vector<44x128xbf16>
    %c4_62 = arith.constant 4 : index
    %c0_63 = arith.constant 0 : index
    %c0_64 = arith.constant 0 : index
    %90 = vector.load %arg3[%c4_62, %c0_63, %c0_64] : memref<5x128x256xbf16, #tpu.memory_space<vmem>>, vector<1x128x256xbf16>
    %91 = vector.shape_cast %90 : vector<1x128x256xbf16> to vector<128x256xbf16>
    %cst_65 = arith.constant dense<0.000000e+00> : vector<44x256xf32>
    %92 = tpu.matmul %89, %91, %cst_65 {dimension_numbers = #tpu.dot_dimension_numbers<[1], [0], [0], [1], [0, 0, 1, 1], [], []>} : vector<44x128xbf16>, vector<128x256xbf16>, vector<44x256xf32> -> vector<44x256xf32>
    %93 = arith.addf %87, %92 : vector<44x256xf32>
    %cst_66 = arith.constant 0.000000e+00 : f32
    %94 = vector.broadcast %cst_66 : f32 to vector<44x256xf32>
    %95 = arith.maximumf %93, %94 : vector<44x256xf32>
    %96 = vector.extract_strided_slice %95 {offsets = [0, 0], sizes = [16, 256], strides = [1, 1]} : vector<44x256xf32> to vector<16x256xf32>
    %c0_67 = arith.constant 0 : index
    %c0_68 = arith.constant 0 : index
    %c0_69 = arith.constant 0 : index
    %97 = vector.load %arg16[%c0_67, %c0_68, %c0_69] : memref<2x16x256xf32, #tpu.memory_space<vmem>>, vector<1x16x256xf32>
    %98 = vector.shape_cast %97 : vector<1x16x256xf32> to vector<16x256xf32>
    %99 = vector.shape_cast %96 : vector<16x256xf32> to vector<1x16x256xf32>
    tpu.vector_store %arg16[%c0_67, %c0_68, %c0_69], %99 {strides = array<i32>} : memref<2x16x256xf32, #tpu.memory_space<vmem>>, vector<1x16x256xf32>,
    %100 = vector.extract_strided_slice %95 {offsets = [24, 0], sizes = [16, 256], strides = [1, 1]} : vector<44x256xf32> to vector<16x256xf32>
    %c1_70 = arith.constant 1 : index
    %c0_71 = arith.constant 0 : index
    %c0_72 = arith.constant 0 : index
    %101 = vector.load %arg16[%c1_70, %c0_71, %c0_72] : memref<2x16x256xf32, #tpu.memory_space<vmem>>, vector<1x16x256xf32>
    %102 = vector.shape_cast %101 : vector<1x16x256xf32> to vector<16x256xf32>
    %103 = vector.shape_cast %100 : vector<16x256xf32> to vector<1x16x256xf32>
    tpu.vector_store %arg16[%c1_70, %c0_71, %c0_72], %103 {strides = array<i32>} : memref<2x16x256xf32, #tpu.memory_space<vmem>>, vector<1x16x256xf32>,
    %104 = arith.truncf %95 : vector<44x256xf32> to vector<44x256xbf16>
    %c0_73 = arith.constant 0 : index
    %c0_74 = arith.constant 0 : index
    %c0_75 = arith.constant 0 : index
    %105 = vector.load %arg13[%c0_73, %c0_74, %c0_75] : memref<2x256x128xbf16, #tpu.memory_space<vmem>>, vector<1x256x128xbf16>
    %106 = vector.shape_cast %105 : vector<1x256x128xbf16> to vector<256x128xbf16>
    %cst_76 = arith.constant dense<0.000000e+00> : vector<44x128xf32>
    %107 = tpu.matmul %104, %106, %cst_76 {dimension_numbers = #tpu.dot_dimension_numbers<[1], [0], [0], [1], [0, 0, 1, 1], [], []>} : vector<44x256xbf16>, vector<256x128xbf16>, vector<44x128xf32> -> vector<44x128xf32>
    %c1_77 = arith.constant 1 : index
    %c0_78 = arith.constant 0 : index
    %c0_79 = arith.constant 0 : index
    %108 = vector.load %arg13[%c1_77, %c0_78, %c0_79] : memref<2x256x128xbf16, #tpu.memory_space<vmem>>, vector<1x256x128xbf16>
    %109 = vector.shape_cast %108 : vector<1x256x128xbf16> to vector<256x128xbf16>
    %cst_80 = arith.constant dense<0.000000e+00> : vector<44x128xf32>
    %110 = tpu.matmul %104, %109, %cst_80 {dimension_numbers = #tpu.dot_dimension_numbers<[1], [0], [0], [1], [0, 0, 1, 1], [], []>} : vector<44x256xbf16>, vector<256x128xbf16>, vector<44x128xf32> -> vector<44x128xf32>
    %111 = arith.maximumf %107, %110 : vector<44x128xf32>
    %c0_81 = arith.constant 0 : index
    %c0_82 = arith.constant 0 : index
    %c0_83 = arith.constant 0 : index
    %112 = vector.load %arg10[%c0_81, %c0_82, %c0_83] : memref<2x32x44xf32, #tpu.memory_space<vmem>>, vector<1x32x44xf32>
    %113 = vector.shape_cast %112 : vector<1x32x44xf32> to vector<32x44xf32>
    %cst_84 = arith.constant dense<0.000000e+00> : vector<32x128xf32>
    %114 = tpu.matmul %113, %111, %cst_84 {dimension_numbers = #tpu.dot_dimension_numbers<[1], [0], [0], [1], [0, 0, 1, 1], [], []>} : vector<32x44xf32>, vector<44x128xf32>, vector<32x128xf32> -> vector<32x128xf32>
    %c1_85 = arith.constant 1 : index
    %c0_86 = arith.constant 0 : index
    %c0_87 = arith.constant 0 : index
    %115 = vector.load %arg10[%c1_85, %c0_86, %c0_87] : memref<2x32x44xf32, #tpu.memory_space<vmem>>, vector<1x32x44xf32>
    %116 = vector.shape_cast %115 : vector<1x32x44xf32> to vector<32x44xf32>
    %cst_88 = arith.constant dense<0.000000e+00> : vector<32x128xf32>
    %117 = tpu.matmul %116, %111, %cst_88 {dimension_numbers = #tpu.dot_dimension_numbers<[1], [0], [0], [1], [0, 0, 1, 1], [], []>} : vector<32x44xf32>, vector<44x128xf32>, vector<32x128xf32> -> vector<32x128xf32>
    %118 = arith.maximumf %114, %117 : vector<32x128xf32>
    %c0_89 = arith.constant 0 : index
    %c0_90 = arith.constant 0 : index
    %119 = vector.load %arg7[%c0_89, %c0_90] : memref<1x256xf32, #tpu.memory_space<vmem>>, vector<1x256xf32>
    %120 = vector.shape_cast %119 : vector<1x256xf32> to vector<1x256xf32>
    %121 = vector.broadcast %120 : vector<1x256xf32> to vector<26x256xf32>
    %122 = vector.extract_strided_slice %118 {offsets = [0, 0], sizes = [26, 128], strides = [1, 1]} : vector<32x128xf32> to vector<26x128xf32>
    %123 = arith.truncf %122 : vector<26x128xf32> to vector<26x128xbf16>
    %c0_91 = arith.constant 0 : index
    %c0_92 = arith.constant 0 : index
    %c0_93 = arith.constant 0 : index
    %124 = vector.load %arg4[%c0_91, %c0_92, %c0_93] : memref<7x128x256xbf16, #tpu.memory_space<vmem>>, vector<1x128x256xbf16>
    %125 = vector.shape_cast %124 : vector<1x128x256xbf16> to vector<128x256xbf16>
    %cst_94 = arith.constant dense<0.000000e+00> : vector<26x256xf32>
    %126 = tpu.matmul %123, %125, %cst_94 {dimension_numbers = #tpu.dot_dimension_numbers<[1], [0], [0], [1], [0, 0, 1, 1], [], []>} : vector<26x128xbf16>, vector<128x256xbf16>, vector<26x256xf32> -> vector<26x256xf32>
    %127 = arith.addf %121, %126 : vector<26x256xf32>
    %128 = vector.extract_strided_slice %118 {offsets = [1, 0], sizes = [26, 128], strides = [1, 1]} : vector<32x128xf32> to vector<26x128xf32>
    %129 = arith.truncf %128 : vector<26x128xf32> to vector<26x128xbf16>
    %c1_95 = arith.constant 1 : index
    %c0_96 = arith.constant 0 : index
    %c0_97 = arith.constant 0 : index
    %130 = vector.load %arg4[%c1_95, %c0_96, %c0_97] : memref<7x128x256xbf16, #tpu.memory_space<vmem>>, vector<1x128x256xbf16>
    %131 = vector.shape_cast %130 : vector<1x128x256xbf16> to vector<128x256xbf16>
    %cst_98 = arith.constant dense<0.000000e+00> : vector<26x256xf32>
    %132 = tpu.matmul %129, %131, %cst_98 {dimension_numbers = #tpu.dot_dimension_numbers<[1], [0], [0], [1], [0, 0, 1, 1], [], []>} : vector<26x128xbf16>, vector<128x256xbf16>, vector<26x256xf32> -> vector<26x256xf32>
    %133 = arith.addf %127, %132 : vector<26x256xf32>
    %134 = vector.extract_strided_slice %118 {offsets = [2, 0], sizes = [26, 128], strides = [1, 1]} : vector<32x128xf32> to vector<26x128xf32>
    %135 = arith.truncf %134 : vector<26x128xf32> to vector<26x128xbf16>
    %c2_99 = arith.constant 2 : index
    %c0_100 = arith.constant 0 : index
    %c0_101 = arith.constant 0 : index
    %136 = vector.load %arg4[%c2_99, %c0_100, %c0_101] : memref<7x128x256xbf16, #tpu.memory_space<vmem>>, vector<1x128x256xbf16>
    %137 = vector.shape_cast %136 : vector<1x128x256xbf16> to vector<128x256xbf16>
    %cst_102 = arith.constant dense<0.000000e+00> : vector<26x256xf32>
    %138 = tpu.matmul %135, %137, %cst_102 {dimension_numbers = #tpu.dot_dimension_numbers<[1], [0], [0], [1], [0, 0, 1, 1], [], []>} : vector<26x128xbf16>, vector<128x256xbf16>, vector<26x256xf32> -> vector<26x256xf32>
    %139 = arith.addf %133, %138 : vector<26x256xf32>
    %140 = vector.extract_strided_slice %118 {offsets = [3, 0], sizes = [26, 128], strides = [1, 1]} : vector<32x128xf32> to vector<26x128xf32>
    %141 = arith.truncf %140 : vector<26x128xf32> to vector<26x128xbf16>
    %c3_103 = arith.constant 3 : index
    %c0_104 = arith.constant 0 : index
    %c0_105 = arith.constant 0 : index
    %142 = vector.load %arg4[%c3_103, %c0_104, %c0_105] : memref<7x128x256xbf16, #tpu.memory_space<vmem>>, vector<1x128x256xbf16>
    %143 = vector.shape_cast %142 : vector<1x128x256xbf16> to vector<128x256xbf16>
    %cst_106 = arith.constant dense<0.000000e+00> : vector<26x256xf32>
    %144 = tpu.matmul %141, %143, %cst_106 {dimension_numbers = #tpu.dot_dimension_numbers<[1], [0], [0], [1], [0, 0, 1, 1], [], []>} : vector<26x128xbf16>, vector<128x256xbf16>, vector<26x256xf32> -> vector<26x256xf32>
    %145 = arith.addf %139, %144 : vector<26x256xf32>
    %146 = vector.extract_strided_slice %118 {offsets = [4, 0], sizes = [26, 128], strides = [1, 1]} : vector<32x128xf32> to vector<26x128xf32>
    %147 = arith.truncf %146 : vector<26x128xf32> to vector<26x128xbf16>
    %c4_107 = arith.constant 4 : index
    %c0_108 = arith.constant 0 : index
    %c0_109 = arith.constant 0 : index
    %148 = vector.load %arg4[%c4_107, %c0_108, %c0_109] : memref<7x128x256xbf16, #tpu.memory_space<vmem>>, vector<1x128x256xbf16>
    %149 = vector.shape_cast %148 : vector<1x128x256xbf16> to vector<128x256xbf16>
    %cst_110 = arith.constant dense<0.000000e+00> : vector<26x256xf32>
    %150 = tpu.matmul %147, %149, %cst_110 {dimension_numbers = #tpu.dot_dimension_numbers<[1], [0], [0], [1], [0, 0, 1, 1], [], []>} : vector<26x128xbf16>, vector<128x256xbf16>, vector<26x256xf32> -> vector<26x256xf32>
    %151 = arith.addf %145, %150 : vector<26x256xf32>
    %152 = vector.extract_strided_slice %118 {offsets = [5, 0], sizes = [26, 128], strides = [1, 1]} : vector<32x128xf32> to vector<26x128xf32>
    %153 = arith.truncf %152 : vector<26x128xf32> to vector<26x128xbf16>
    %c5 = arith.constant 5 : index
    %c0_111 = arith.constant 0 : index
    %c0_112 = arith.constant 0 : index
    %154 = vector.load %arg4[%c5, %c0_111, %c0_112] : memref<7x128x256xbf16, #tpu.memory_space<vmem>>, vector<1x128x256xbf16>
    %155 = vector.shape_cast %154 : vector<1x128x256xbf16> to vector<128x256xbf16>
    %cst_113 = arith.constant dense<0.000000e+00> : vector<26x256xf32>
    %156 = tpu.matmul %153, %155, %cst_113 {dimension_numbers = #tpu.dot_dimension_numbers<[1], [0], [0], [1], [0, 0, 1, 1], [], []>} : vector<26x128xbf16>, vector<128x256xbf16>, vector<26x256xf32> -> vector<26x256xf32>
    %157 = arith.addf %151, %156 : vector<26x256xf32>
    %158 = vector.extract_strided_slice %118 {offsets = [6, 0], sizes = [26, 128], strides = [1, 1]} : vector<32x128xf32> to vector<26x128xf32>
    %159 = arith.truncf %158 : vector<26x128xf32> to vector<26x128xbf16>
    %c6 = arith.constant 6 : index
    %c0_114 = arith.constant 0 : index
    %c0_115 = arith.constant 0 : index
    %160 = vector.load %arg4[%c6, %c0_114, %c0_115] : memref<7x128x256xbf16, #tpu.memory_space<vmem>>, vector<1x128x256xbf16>
    %161 = vector.shape_cast %160 : vector<1x128x256xbf16> to vector<128x256xbf16>
    %cst_116 = arith.constant dense<0.000000e+00> : vector<26x256xf32>
    %162 = tpu.matmul %159, %161, %cst_116 {dimension_numbers = #tpu.dot_dimension_numbers<[1], [0], [0], [1], [0, 0, 1, 1], [], []>} : vector<26x128xbf16>, vector<128x256xbf16>, vector<26x256xf32> -> vector<26x256xf32>
    %163 = arith.addf %157, %162 : vector<26x256xf32>
    %cst_117 = arith.constant 0.000000e+00 : f32
    %164 = vector.broadcast %cst_117 : f32 to vector<26x256xf32>
    %165 = arith.maximumf %163, %164 : vector<26x256xf32>
    %166 = vector.extract_strided_slice %165 {offsets = [0, 0], sizes = [8, 256], strides = [1, 1]} : vector<26x256xf32> to vector<8x256xf32>
    %c0_118 = arith.constant 0 : index
    %c0_119 = arith.constant 0 : index
    %c0_120 = arith.constant 0 : index
    %167 = vector.load %arg17[%c0_118, %c0_119, %c0_120] : memref<2x8x256xf32, #tpu.memory_space<vmem>>, vector<1x8x256xf32>
    %168 = vector.shape_cast %167 : vector<1x8x256xf32> to vector<8x256xf32>
    %169 = vector.shape_cast %166 : vector<8x256xf32> to vector<1x8x256xf32>
    tpu.vector_store %arg17[%c0_118, %c0_119, %c0_120], %169 {strides = array<i32>} : memref<2x8x256xf32, #tpu.memory_space<vmem>>, vector<1x8x256xf32>,
    %170 = vector.extract_strided_slice %165 {offsets = [16, 0], sizes = [8, 256], strides = [1, 1]} : vector<26x256xf32> to vector<8x256xf32>
    %c1_121 = arith.constant 1 : index
    %c0_122 = arith.constant 0 : index
    %c0_123 = arith.constant 0 : index
    %171 = vector.load %arg17[%c1_121, %c0_122, %c0_123] : memref<2x8x256xf32, #tpu.memory_space<vmem>>, vector<1x8x256xf32>
    %172 = vector.shape_cast %171 : vector<1x8x256xf32> to vector<8x256xf32>
    %173 = vector.shape_cast %170 : vector<8x256xf32> to vector<1x8x256xf32>
    tpu.vector_store %arg17[%c1_121, %c0_122, %c0_123], %173 {strides = array<i32>} : memref<2x8x256xf32, #tpu.memory_space<vmem>>, vector<1x8x256xf32>,
    %174 = arith.truncf %165 : vector<26x256xf32> to vector<26x256xbf16>
    %c0_124 = arith.constant 0 : index
    %c0_125 = arith.constant 0 : index
    %c0_126 = arith.constant 0 : index
    %175 = vector.load %arg14[%c0_124, %c0_125, %c0_126] : memref<2x256x128xbf16, #tpu.memory_space<vmem>>, vector<1x256x128xbf16>
    %176 = vector.shape_cast %175 : vector<1x256x128xbf16> to vector<256x128xbf16>
    %cst_127 = arith.constant dense<0.000000e+00> : vector<26x128xf32>
    %177 = tpu.matmul %174, %176, %cst_127 {dimension_numbers = #tpu.dot_dimension_numbers<[1], [0], [0], [1], [0, 0, 1, 1], [], []>} : vector<26x256xbf16>, vector<256x128xbf16>, vector<26x128xf32> -> vector<26x128xf32>
    %c1_128 = arith.constant 1 : index
    %c0_129 = arith.constant 0 : index
    %c0_130 = arith.constant 0 : index
    %178 = vector.load %arg14[%c1_128, %c0_129, %c0_130] : memref<2x256x128xbf16, #tpu.memory_space<vmem>>, vector<1x256x128xbf16>
    %179 = vector.shape_cast %178 : vector<1x256x128xbf16> to vector<256x128xbf16>
    %cst_131 = arith.constant dense<0.000000e+00> : vector<26x128xf32>
    %180 = tpu.matmul %174, %179, %cst_131 {dimension_numbers = #tpu.dot_dimension_numbers<[1], [0], [0], [1], [0, 0, 1, 1], [], []>} : vector<26x256xbf16>, vector<256x128xbf16>, vector<26x128xf32> -> vector<26x128xf32>
    %181 = arith.maximumf %177, %180 : vector<26x128xf32>
    %c0_132 = arith.constant 0 : index
    %c0_133 = arith.constant 0 : index
    %c0_134 = arith.constant 0 : index
    %182 = vector.load %arg11[%c0_132, %c0_133, %c0_134] : memref<2x8x26xf32, #tpu.memory_space<vmem>>, vector<1x8x26xf32>
    %183 = vector.shape_cast %182 : vector<1x8x26xf32> to vector<8x26xf32>
    %cst_135 = arith.constant dense<0.000000e+00> : vector<8x128xf32>
    %184 = tpu.matmul %183, %181, %cst_135 {dimension_numbers = #tpu.dot_dimension_numbers<[1], [0], [0], [1], [0, 0, 1, 1], [], []>} : vector<8x26xf32>, vector<26x128xf32>, vector<8x128xf32> -> vector<8x128xf32>
    %c1_136 = arith.constant 1 : index
    %c0_137 = arith.constant 0 : index
    %c0_138 = arith.constant 0 : index
    %185 = vector.load %arg11[%c1_136, %c0_137, %c0_138] : memref<2x8x26xf32, #tpu.memory_space<vmem>>, vector<1x8x26xf32>
    %186 = vector.shape_cast %185 : vector<1x8x26xf32> to vector<8x26xf32>
    %cst_139 = arith.constant dense<0.000000e+00> : vector<8x128xf32>
    %187 = tpu.matmul %186, %181, %cst_139 {dimension_numbers = #tpu.dot_dimension_numbers<[1], [0], [0], [1], [0, 0, 1, 1], [], []>} : vector<8x26xf32>, vector<26x128xf32>, vector<8x128xf32> -> vector<8x128xf32>
    %188 = arith.maximumf %184, %187 : vector<8x128xf32>
    %c0_140 = arith.constant 0 : index
    %c0_141 = arith.constant 0 : index
    %189 = vector.load %arg18[%c0_140, %c0_141] : memref<8x128xf32, #tpu.memory_space<vmem>>, vector<8x128xf32>
    tpu.vector_store %arg18[%c0_140, %c0_141], %188 {strides = array<i32>} : memref<8x128xf32, #tpu.memory_space<vmem>>, vector<8x128xf32>,
    return
  }
  func.func @transform_0(%arg0: i32) -> (i32, i32) {
    %c0_i32 = arith.constant 0 : i32
    %c0_i32_0 = arith.constant 0 : i32
    return %arg0, %c0_i32 : i32, i32
  }
  func.func @transform_1(%arg0: i32) -> (i32, i32, i32) {
    %c0_i32 = arith.constant 0 : i32
    %c0_i32_0 = arith.constant 0 : i32
    %c0_i32_1 = arith.constant 0 : i32
    %c0_i32_2 = arith.constant 0 : i32
    return %c0_i32, %c0_i32_0, %c0_i32_1 : i32, i32, i32
  }
  func.func @transform_2(%arg0: i32) -> (i32, i32, i32) {
    %c0_i32 = arith.constant 0 : i32
    %c0_i32_0 = arith.constant 0 : i32
    %c0_i32_1 = arith.constant 0 : i32
    %c0_i32_2 = arith.constant 0 : i32
    return %c0_i32, %c0_i32_0, %c0_i32_1 : i32, i32, i32
  }
  func.func @transform_3(%arg0: i32) -> (i32, i32, i32) {
    %c0_i32 = arith.constant 0 : i32
    %c0_i32_0 = arith.constant 0 : i32
    %c0_i32_1 = arith.constant 0 : i32
    %c0_i32_2 = arith.constant 0 : i32
    return %c0_i32, %c0_i32_0, %c0_i32_1 : i32, i32, i32
  }
  func.func @transform_4(%arg0: i32) -> (i32, i32) {
    %c0_i32 = arith.constant 0 : i32
    %c0_i32_0 = arith.constant 0 : i32
    %c0_i32_1 = arith.constant 0 : i32
    return %c0_i32, %c0_i32_0 : i32, i32
  }
  func.func @transform_5(%arg0: i32) -> (i32, i32) {
    %c0_i32 = arith.constant 0 : i32
    %c0_i32_0 = arith.constant 0 : i32
    %c0_i32_1 = arith.constant 0 : i32
    return %c0_i32, %c0_i32_0 : i32, i32
  }
  func.func @transform_6(%arg0: i32) -> (i32, i32) {
    %c0_i32 = arith.constant 0 : i32
    %c0_i32_0 = arith.constant 0 : i32
    %c0_i32_1 = arith.constant 0 : i32
    return %c0_i32, %c0_i32_0 : i32, i32
  }
  func.func @transform_7(%arg0: i32) -> (i32, i32) {
    %c0_i32 = arith.constant 0 : i32
    %c0_i32_0 = arith.constant 0 : i32
    %c0_i32_1 = arith.constant 0 : i32
    return %c0_i32, %c0_i32_0 : i32, i32
  }
  func.func @transform_8(%arg0: i32) -> (i32, i32, i32) {
    %c0_i32 = arith.constant 0 : i32
    %c0_i32_0 = arith.constant 0 : i32
    %c0_i32_1 = arith.constant 0 : i32
    %c0_i32_2 = arith.constant 0 : i32
    return %c0_i32, %c0_i32_0, %c0_i32_1 : i32, i32, i32
  }
  func.func @transform_9(%arg0: i32) -> (i32, i32, i32) {
    %c0_i32 = arith.constant 0 : i32
    %c0_i32_0 = arith.constant 0 : i32
    %c0_i32_1 = arith.constant 0 : i32
    %c0_i32_2 = arith.constant 0 : i32
    return %c0_i32, %c0_i32_0, %c0_i32_1 : i32, i32, i32
  }
  func.func @transform_10(%arg0: i32) -> (i32, i32, i32) {
    %c0_i32 = arith.constant 0 : i32
    %c0_i32_0 = arith.constant 0 : i32
    %c0_i32_1 = arith.constant 0 : i32
    %c0_i32_2 = arith.constant 0 : i32
    return %c0_i32, %c0_i32_0, %c0_i32_1 : i32, i32, i32
  }
  func.func @transform_11(%arg0: i32) -> (i32, i32, i32) {
    %c0_i32 = arith.constant 0 : i32
    %c0_i32_0 = arith.constant 0 : i32
    %c0_i32_1 = arith.constant 0 : i32
    %c0_i32_2 = arith.constant 0 : i32
    return %c0_i32, %c0_i32_0, %c0_i32_1 : i32, i32, i32
  }
  func.func @transform_12(%arg0: i32) -> (i32, i32, i32) {
    %c0_i32 = arith.constant 0 : i32
    %c0_i32_0 = arith.constant 0 : i32
    %c0_i32_1 = arith.constant 0 : i32
    %c0_i32_2 = arith.constant 0 : i32
    return %c0_i32, %c0_i32_0, %c0_i32_1 : i32, i32, i32
  }
  func.func @transform_13(%arg0: i32) -> (i32, i32, i32) {
    %c0_i32 = arith.constant 0 : i32
    %c0_i32_0 = arith.constant 0 : i32
    %c0_i32_1 = arith.constant 0 : i32
    %c0_i32_2 = arith.constant 0 : i32
    return %c0_i32, %c0_i32_0, %c0_i32_1 : i32, i32, i32
  }
  func.func @transform_14(%arg0: i32) -> (i32, i32, i32) {
    %c0_i32 = arith.constant 0 : i32
    %c0_i32_0 = arith.constant 0 : i32
    %c0_i32_1 = arith.constant 0 : i32
    return %arg0, %c0_i32, %c0_i32_0 : i32, i32, i32
  }
  func.func @transform_15(%arg0: i32) -> (i32, i32, i32) {
    %c0_i32 = arith.constant 0 : i32
    %c0_i32_0 = arith.constant 0 : i32
    %c0_i32_1 = arith.constant 0 : i32
    return %arg0, %c0_i32, %c0_i32_0 : i32, i32, i32
  }
  func.func @transform_16(%arg0: i32) -> (i32, i32, i32) {
    %c0_i32 = arith.constant 0 : i32
    %c0_i32_0 = arith.constant 0 : i32
    %c0_i32_1 = arith.constant 0 : i32
    return %arg0, %c0_i32, %c0_i32_0 : i32, i32, i32
  }
  func.func @transform_17(%arg0: i32) -> (i32, i32) {
    %c0_i32 = arith.constant 0 : i32
    %c0_i32_0 = arith.constant 0 : i32
    return %arg0, %c0_i32 : i32, i32
  }
}

</mosaic_0001>

<bundles_post_ra>
// kernel: tile.18
= control target key start
LH: loop header
LB: loop body
LE: loop exit
PB: predicated region body
PF: predicated region fallthrough
CT: control target
= control target key end

     0   :  { %s40_s0 = inlined_call_operand.vmem [shape: f32[8], index: 0, kind: input, shape index: {}]   ;;  %s41_s1 = inlined_call_operand.vmem [shape: f32[32,8], index: 1, kind: output, shape index: {}]  }
   0x1   :  { %v4_v0 = vld [vmem:[%s40_s0] ss:$0 sm:$0xff] }
   0x2   :  { %5 = vst [vmem:[%s41_s1] sm:$0xff] %v4_v0  ;;  %12 = vst [vmem:[%s41_s1 + $0x8] sm:$0xff] %v4_v0 }
   0x3   :  { %13 = vst [vmem:[%s41_s1 + $0x10] sm:$0xff] %v4_v0  ;;  %14 = vst [vmem:[%s41_s1 + $0x18] sm:$0xff] %v4_v0 }

// kernel: tile.19
= control target key start
LH: loop header
LB: loop body
LE: loop exit
PB: predicated region body
PF: predicated region fallthrough
CT: control target
= control target key end

     0   :  { %s7_s6 = smov 3  ;;  %s21_s9 = smov 3  ;;  %vm4_vm0 = vcmask 64512   ;;  %vm11_vm1 = vcmask 1048512   ;;  %vm18_vm2 = vcmask 982912   ;;  %vm25_vm3 = vcmask 917312   ;;  %s235_s0 = inlined_call_operand.vmem [shape: f32[32,8], index: 0, kind: input, shape index: {}]   ;;  %s236_s1 = inlined_call_operand.vmem [shape: f32[1,256], index: 1, kind: output, shape index: {}]  }
   0x1   :  { %v125_v0 = vld [vmem:[%s235_s0 + $0xf] ss:$16 sm:%s7_s6]   ;;  %s156_s10 = smov 120   ;;  %v127_v1 = vld [vmem:[%s235_s0 + $0xd] ss:$16 sm:%s21_s9]   ;;  %s14_s13 = smov 3 }
   0x2   :  { %9 = vrot.lane.b32.xlu0 %v125_v0, %s156_s10  ;;  %s157_s14 = smov 104   ;;  %v126_v2 = vld [vmem:[%s235_s0 + $0xe] ss:$16 sm:%s14_s13]   ;;  %s28_s17 = smov 3  ;;  %vm32_vm4 = vcmask 851712   ;;  %vm39_vm5 = vcmask 786112  }
   0x3   :  { %23 = vrot.lane.b32.xlu1 %v127_v1, %s157_s14  ;;  %v128_v3 = vld [vmem:[%s235_s0 + $0xc] ss:$16 sm:%s28_s17]   ;;  %s35_s20 = smov 3  ;;  %s42_s21 = smov 3  ;;  %vm46_vm6 = vcmask 720512   ;;  %vm53_vm7 = vcmask 654912  }
   0x4   :  { %s158_s22 = smov 112   ;;  %s159_s23 = smov 96   ;;  %v129_v4 = vld [vmem:[%s235_s0 + $0xb] ss:$16 sm:%s35_s20]   ;;  %v130_v5 = vld [vmem:[%s235_s0 + $0xa] ss:$16 sm:%s42_s21]  }
   0x5   :  { %s49_s28 = smov 3  ;;  %s56_s29 = smov 3  ;;  %vm60_vm8 = vcmask 589312   ;;  %vm67_vm9 = vcmask 523712   ;;  %vm74_vm10 = vcmask 458112   ;;  %vm81_vm11 = vcmask 392512  }
   0x6   :  { %16 = vrot.lane.b32.xlu0 %v126_v2, %s158_s22  ;;  %s160_s30 = smov 88   ;;  %s161_s2 = smov 80   ;;  %v131_v6 = vld [vmem:[%s235_s0 + $0x9] ss:$16 sm:%s49_s28]   ;;  %vm88_vm12 = vcmask 326912   ;;  %vm95_vm13 = vcmask 261312  }
   0x7   :  { %30 = vrot.lane.b32.xlu1 %v128_v3, %s159_s23  ;;  %v132_v7 = vld [vmem:[%s235_s0 + $0x8] ss:$16 sm:%s56_s29]   ;;  %s63_s7 = smov 3  ;;  %s70_s8 = smov 3  ;;  %vm102_vm14 = vcmask 195712   ;;  %vm109_vm15 = vcmask 130112  }
   0x8   :  { %s162_s9 = smov 72   ;;  %s163_s10 = smov 64   ;;  %v133_v8 = vld [vmem:[%s235_s0 + $0x7] ss:$16 sm:%s63_s7]   ;;  %v134_v9 = vld [vmem:[%s235_s0 + $0x6] ss:$16 sm:%s70_s8]  }
   0x9   :  { %s2_s13 = smov 3  ;;  %s77_s16 = smov 3 }
   0xa   :  { %37 = vrot.lane.b32.xlu0 %v129_v4, %s160_s30  ;;  %v3_v10 = vld [vmem:[%s235_s0] ss:$16 sm:%s2_s13]   ;;  %s84_s19 = smov 3  ;;  %s164_s20 = smov 56  }
   0xb   :  { %44 = vrot.lane.b32.xlu1 %v130_v5, %s161_s2  ;;  %5 = vst.msk [vmem:[#allocation0] ss:$8 sm:$0x3] %vm4_vm0, %v3_v10   ;;  %s165_s21 = smov 48   ;;  %v135_v11 = vld [vmem:[%s235_s0 + $0x5] ss:$16 sm:%s77_s16]  }
   0xc   :  { %v136_v12 = vld [vmem:[%s235_s0 + $0x4] ss:$16 sm:%s84_s19]   ;;  %s91_s26 = smov 3  ;;  %s98_s27 = smov 3 }
   0xd   :  { %s166_s28 = smov 40   ;;  %s167_s29 = smov 32   ;;  %v137_v13 = vld [vmem:[%s235_s0 + $0x3] ss:$16 sm:%s91_s26]   ;;  %v138_v14 = vld [vmem:[%s235_s0 + $0x2] ss:$16 sm:%s98_s27]  }
   0xe   :  { %51 = vrot.lane.b32.xlu0 %v131_v6, %s162_s9  ;;  %s105_s5 = smov 3  ;;  %s168_s6 = smov 24  }
   0xf   :  { %58 = vrot.lane.b32.xlu1 %v132_v7, %s163_s10  ;;  %s169_s7 = smov 16   ;;  %v139_v15 = vld [vmem:[%s235_s0 + $0x1] ss:$16 sm:%s105_s5]   ;;  %s170_s0 = smov 8  }
  0x12   :  { %65 = vrot.lane.b32.xlu0 %v133_v8, %s164_s20 }
  0x13   :  { %72 = vrot.lane.b32.xlu1 %v134_v9, %s165_s21 }
  0x16   :  { %79 = vrot.lane.b32.xlu0 %v135_v11, %s166_s28 }
  0x17   :  { %86 = vrot.lane.b32.xlu1 %v136_v12, %s167_s29 }
  0x1a   :  { %93 = vrot.lane.b32.xlu0 %v137_v13, %s168_s6 }
  0x1b   :  { %100 = vrot.lane.b32.xlu1 %v138_v14, %s169_s7 }
  0x1e   :  { %107 = vrot.lane.b32.xlu0 %v139_v15, %s170_s0 }
  0x74   :  { %v10_v16 = vpop.permute.xlu0 %9  }
  0x75   :  { %12 = vst.msk [vmem:[#allocation0] ss:$8 sm:$0x3] %vm11_vm1, %v10_v16   ;;  %v24_v17 = vpop.permute.xlu1 %23  }
  0x78   :  { %v17_v18 = vpop.permute.xlu0 %16  }
  0x79   :  { %19 = vst.msk [vmem:[#allocation0] ss:$8 sm:$0x3] %vm18_vm2, %v17_v18   ;;  %v31_v19 = vpop.permute.xlu1 %30  }
  0x7a   :  { %26 = vst.msk [vmem:[#allocation0] ss:$8 sm:$0x3] %vm25_vm3, %v24_v17  }
  0x7b   :  { %33 = vst.msk [vmem:[#allocation0] ss:$8 sm:$0x3] %vm32_vm4, %v31_v19  }
  0x7c   :  { %v38_v20 = vpop.permute.xlu0 %37  }
  0x7d   :  { %40 = vst.msk [vmem:[#allocation0] ss:$8 sm:$0x3] %vm39_vm5, %v38_v20   ;;  %v45_v21 = vpop.permute.xlu1 %44  }
  0x7e   :  { %47 = vst.msk [vmem:[#allocation0] ss:$8 sm:$0x3] %vm46_vm6, %v45_v21  }
  0x80   :  { %v52_v22 = vpop.permute.xlu0 %51  }
  0x81   :  { %54 = vst.msk [vmem:[#allocation0] ss:$8 sm:$0x3] %vm53_vm7, %v52_v22   ;;  %v59_v23 = vpop.permute.xlu1 %58  }
  0x82   :  { %61 = vst.msk [vmem:[#allocation0] ss:$8 sm:$0x3] %vm60_vm8, %v59_v23  }
  0x84   :  { %v66_v24 = vpop.permute.xlu0 %65  }
  0x85   :  { %68 = vst.msk [vmem:[#allocation0] ss:$8 sm:$0x3] %vm67_vm9, %v66_v24   ;;  %v73_v25 = vpop.permute.xlu1 %72  }
  0x86   :  { %75 = vst.msk [vmem:[#allocation0] ss:$8 sm:$0x3] %vm74_vm10, %v73_v25  }
  0x88   :  { %v80_v26 = vpop.permute.xlu0 %79  }
  0x89   :  { %82 = vst.msk [vmem:[#allocation0] ss:$8 sm:$0x3] %vm81_vm11, %v80_v26   ;;  %v87_v27 = vpop.permute.xlu1 %86  }
  0x8a   :  { %89 = vst.msk [vmem:[#allocation0] ss:$8 sm:$0x3] %vm88_vm12, %v87_v27  }
  0x8c   :  { %v94_v28 = vpop.permute.xlu0 %93  }
  0x8d   :  { %96 = vst.msk [vmem:[#allocation0] ss:$8 sm:$0x3] %vm95_vm13, %v94_v28   ;;  %v101_v29 = vpop.permute.xlu1 %100  }
  0x8e   :  { %103 = vst.msk [vmem:[#allocation0] ss:$8 sm:$0x3] %vm102_vm14, %v101_v29  }
  0x90   :  { %v108_v30 = vpop.permute.xlu0 %107  }
  0x91   :  { %110 = vst.msk [vmem:[#allocation0] ss:$8 sm:$0x3] %vm109_vm15, %v108_v30  }
  0x98   :  { %v115_v31 = vld [vmem:[#allocation0] sm:$0x1]  ;;  %v120_v32 = vld [vmem:[#allocation0 + $0x8] sm:$0x1] }
  0x99   :  { %118 = vst [vmem:[%s236_s1] sm:$0x1] %v115_v31  ;;  %140 = vst [vmem:[%s236_s1 + $0x1] sm:$0x1] %v120_v32 }

// kernel: tile.23
= control target key start
LH: loop header
LB: loop body
LE: loop exit
PB: predicated region body
PF: predicated region fallthrough
CT: control target
= control target key end

     0   :  { %s28_s0 = inlined_call_operand.vmem [shape: f32[16], index: 0, kind: input, shape index: {}]   ;;  %s29_s1 = inlined_call_operand.vmem [shape: f32[16,16], index: 1, kind: output, shape index: {}]  }
   0x1   :  { %v4_v0 = vld [vmem:[%s28_s0] ss:$0 sm:$0xff] }
   0x2   :  { %5 = vst [vmem:[%s29_s1] sm:$0xff] %v4_v0  ;;  %8 = vst [vmem:[%s29_s1 + $0x8] sm:$0xff] %v4_v0 }

// kernel: tile.24
= control target key start
LH: loop header
LB: loop body
LE: loop exit
PB: predicated region body
PF: predicated region fallthrough
CT: control target
= control target key end

     0   :  { %s7_s6 = smov 3  ;;  %s21_s9 = smov 3  ;;  %vm4_vm0 = vcmask 130048   ;;  %vm11_vm1 = vcmask 1048448   ;;  %vm18_vm2 = vcmask 917248   ;;  %vm25_vm3 = vcmask 786048   ;;  %s131_s0 = inlined_call_operand.vmem [shape: f32[16,16], index: 0, kind: input, shape index: {}]   ;;  %s132_s1 = inlined_call_operand.vmem [shape: f32[1,256], index: 1, kind: output, shape index: {}]  }
   0x1   :  { %v69_v0 = vld [vmem:[%s131_s0 + $0x7] ss:$8 sm:%s7_s6]   ;;  %s84_s10 = smov 112   ;;  %v71_v1 = vld [vmem:[%s131_s0 + $0x5] ss:$8 sm:%s21_s9]   ;;  %s14_s13 = smov 3 }
   0x2   :  { %9 = vrot.lane.b32.xlu0 %v69_v0, %s84_s10  ;;  %s85_s14 = smov 80   ;;  %v70_v2 = vld [vmem:[%s131_s0 + $0x6] ss:$8 sm:%s14_s13]   ;;  %s28_s17 = smov 3  ;;  %vm32_vm4 = vcmask 654848   ;;  %vm39_vm5 = vcmask 523648  }
   0x3   :  { %23 = vrot.lane.b32.xlu1 %v71_v1, %s85_s14  ;;  %v72_v3 = vld [vmem:[%s131_s0 + $0x4] ss:$8 sm:%s28_s17]   ;;  %s35_s20 = smov 3  ;;  %s42_s21 = smov 3  ;;  %vm46_vm6 = vcmask 392448   ;;  %vm53_vm7 = vcmask 261248  }
   0x4   :  { %s86_s22 = smov 96   ;;  %s87_s23 = smov 64   ;;  %v73_v4 = vld [vmem:[%s131_s0 + $0x3] ss:$8 sm:%s35_s20]   ;;  %v74_v5 = vld [vmem:[%s131_s0 + $0x2] ss:$8 sm:%s42_s21]  }
   0x5   :  { %s2_s26 = smov 3  ;;  %s49_s29 = smov 3 }
   0x6   :  { %16 = vrot.lane.b32.xlu0 %v70_v2, %s86_s22  ;;  %v3_v6 = vld [vmem:[%s131_s0] ss:$8 sm:%s2_s26]   ;;  %s88_s3 = smov 48   ;;  %s89_s4 = smov 32  }
   0x7   :  { %30 = vrot.lane.b32.xlu1 %v72_v3, %s87_s23  ;;  %5 = vst.msk [vmem:[#allocation0] ss:$8 sm:$0x3] %vm4_vm0, %v3_v6   ;;  %v75_v7 = vld [vmem:[%s131_s0 + $0x1] ss:$8 sm:%s49_s29]   ;;  %s90_s0 = smov 16  }
   0xa   :  { %37 = vrot.lane.b32.xlu0 %v73_v4, %s88_s3 }
   0xb   :  { %44 = vrot.lane.b32.xlu1 %v74_v5, %s89_s4 }
   0xe   :  { %51 = vrot.lane.b32.xlu0 %v75_v7, %s90_s0 }
  0x74   :  { %v10_v8 = vpop.permute.xlu0 %9  }
  0x75   :  { %12 = vst.msk [vmem:[#allocation0] ss:$8 sm:$0x3] %vm11_vm1, %v10_v8   ;;  %v24_v9 = vpop.permute.xlu1 %23  }
  0x78   :  { %v17_v10 = vpop.permute.xlu0 %16  }
  0x79   :  { %19 = vst.msk [vmem:[#allocation0] ss:$8 sm:$0x3] %vm18_vm2, %v17_v10   ;;  %v31_v11 = vpop.permute.xlu1 %30  }
  0x7a   :  { %26 = vst.msk [vmem:[#allocation0] ss:$8 sm:$0x3] %vm25_vm3, %v24_v9  }
  0x7b   :  { %33 = vst.msk [vmem:[#allocation0] ss:$8 sm:$0x3] %vm32_vm4, %v31_v11  }
  0x7c   :  { %v38_v12 = vpop.permute.xlu0 %37  }
  0x7d   :  { %40 = vst.msk [vmem:[#allocation0] ss:$8 sm:$0x3] %vm39_vm5, %v38_v12   ;;  %v45_v13 = vpop.permute.xlu1 %44  }
  0x7e   :  { %47 = vst.msk [vmem:[#allocation0] ss:$8 sm:$0x3] %vm46_vm6, %v45_v13  }
  0x80   :  { %v52_v14 = vpop.permute.xlu0 %51  }
  0x81   :  { %54 = vst.msk [vmem:[#allocation0] ss:$8 sm:$0x3] %vm53_vm7, %v52_v14  }
  0x88   :  { %v59_v15 = vld [vmem:[#allocation0] sm:$0x1]  ;;  %v64_v16 = vld [vmem:[#allocation0 + $0x8] sm:$0x1] }
  0x89   :  { %62 = vst [vmem:[%s132_s1] sm:$0x1] %v59_v15  ;;  %76 = vst [vmem:[%s132_s1 + $0x1] sm:$0x1] %v64_v16 }

// kernel: tile.28
= control target key start
LH: loop header
LB: loop body
LE: loop exit
PB: predicated region body
PF: predicated region fallthrough
CT: control target
= control target key end

     0   :  { %s22_s0 = inlined_call_operand.vmem [shape: f32[32], index: 0, kind: input, shape index: {}]   ;;  %s23_s1 = inlined_call_operand.vmem [shape: f32[8,32], index: 1, kind: output, shape index: {}]  }
   0x1   :  { %v4_v0 = vld [vmem:[%s22_s0] ss:$0 sm:$0xff] }
   0x2   :  { %5 = vst [vmem:[%s23_s1] sm:$0xff] %v4_v0 }

// kernel: tile.29
= control target key start
LH: loop header
LB: loop body
LE: loop exit
PB: predicated region body
PF: predicated region fallthrough
CT: control target
= control target key end

     0   :  { %s7_s6 = smov 3  ;;  %s14_s9 = smov 3  ;;  %vm4_vm0 = vcmask 261120   ;;  %vm11_vm1 = vcmask 1048320   ;;  %vm18_vm2 = vcmask 785920   ;;  %vm25_vm3 = vcmask 523520   ;;  %s79_s0 = inlined_call_operand.vmem [shape: f32[8,32], index: 0, kind: input, shape index: {}]   ;;  %s80_s1 = inlined_call_operand.vmem [shape: f32[1,256], index: 1, kind: output, shape index: {}]  }
   0x1   :  { %v41_v0 = vld [vmem:[%s79_s0 + $0x3] ss:$4 sm:%s7_s6]   ;;  %s48_s10 = smov 96   ;;  %s21_s11 = smov 3  ;;  %v42_v1 = vld [vmem:[%s79_s0 + $0x2] ss:$4 sm:%s14_s9]  }
   0x2   :  { %9 = vrot.lane.b32.xlu0 %v41_v0, %s48_s10  ;;  %v43_v2 = vld [vmem:[%s79_s0 + $0x1] ss:$4 sm:%s21_s11]   ;;  %s2_s16 = smov 3  ;;  %s49_s17 = smov 32  }
   0x3   :  { %23 = vrot.lane.b32.xlu1 %v43_v2, %s49_s17  ;;  %v3_v3 = vld [vmem:[%s79_s0] ss:$4 sm:%s2_s16]   ;;  %s50_s0 = smov 64  }
   0x4   :  { %5 = vst.msk [vmem:[#allocation0] ss:$8 sm:$0x3] %vm4_vm0, %v3_v3  }
   0x6   :  { %16 = vrot.lane.b32.xlu0 %v42_v1, %s50_s0 }
  0x74   :  { %v10_v4 = vpop.permute.xlu0 %9  }
  0x75   :  { %12 = vst.msk [vmem:[#allocation0] ss:$8 sm:$0x3] %vm11_vm1, %v10_v4   ;;  %v24_v5 = vpop.permute.xlu1 %23  }
  0x78   :  { %v17_v6 = vpop.permute.xlu0 %16  }
  0x79   :  { %19 = vst.msk [vmem:[#allocation0] ss:$8 sm:$0x3] %vm18_vm2, %v17_v6  }
  0x7a   :  { %26 = vst.msk [vmem:[#allocation0] ss:$8 sm:$0x3] %vm25_vm3, %v24_v5  }
  0x81   :  { %v31_v7 = vld [vmem:[#allocation0] sm:$0x1]  ;;  %v36_v8 = vld [vmem:[#allocation0 + $0x8] sm:$0x1] }
  0x82   :  { %34 = vst [vmem:[%s80_s1] sm:$0x1] %v31_v7  ;;  %44 = vst [vmem:[%s80_s1 + $0x1] sm:$0x1] %v36_v8 }

// kernel: motion_enc_forward.1
= control target key start
LH: loop header
LB: loop body
LE: loop exit
PB: predicated region body
PF: predicated region fallthrough
CT: control target
= control target key end

     0   :  { %s7355_s24 = smov 0   ;;  %s9124_s0 = inlined_call_operand.vmem [shape: f32[128,32], index: 0, kind: input, shape index: {}]   ;;  %s9125_s1 = inlined_call_operand.vmem [shape: bf16[5,32,256], index: 1, kind: input, shape index: {}]   ;;  %s9126_s2 = inlined_call_operand.vmem [shape: bf16[5,128,256], index: 2, kind: input, shape index: {}]   ;;  %s9127_s3 = inlined_call_operand.vmem [shape: bf16[7,128,256], index: 3, kind: input, shape index: {}]   ;;  %s9128_s4 = inlined_call_operand.vmem [shape: f32[1,256], index: 4, kind: input, shape index: {}]   ;;  %s9129_s5 = inlined_call_operand.vmem [shape: f32[1,256], index: 5, kind: input, shape index: {}]   ;;  %s9130_s6 = inlined_call_operand.vmem [shape: f32[1,256], index: 6, kind: input, shape index: {}]   ;;  %s9131_s7 = inlined_call_operand.vmem [shape: f32[80,64], index: 7, kind: input, shape index: {}]   ;;  %s9132_s8 = inlined_call_operand.vmem [shape: f32[2,48,76], index: 8, kind: input, shape index: {}]   ;;  %s9133_s9 = inlined_call_operand.vmem [shape: f32[2,32,44], index: 9, kind: input, shape index: {}]   ;;  %s9134_s10 = inlined_call_operand.vmem [shape: f32[2,8,26], index: 10, kind: input, shape index: {}]   ;;  %s9135_s11 = inlined_call_operand.vmem [shape: bf16[2,256,128], index: 11, kind: input, shape index: {}]   ;;  %s9136_s12 = inlined_call_operand.vmem [shape: bf16[2,256,128], index: 12, kind: input, shape index: {}]   ;;  %s9137_s13 = inlined_call_operand.vmem [shape: bf16[2,256,128], index: 13, kind: input, shape index: {}]   ;;  %s9138_s14 = inlined_call_operand.vmem [shape: f32[4,32,256], index: 14, kind: output, shape index: {0}]   ;;  %s9139_s15 = inlined_call_operand.vmem [shape: f32[4,16,256], index: 15, kind: output, shape index: {1}]   ;;  %s9140_s16 = inlined_call_operand.vmem [shape: f32[4,8,256], index: 16, kind: output, shape index: {2}]   ;;  %s9141_s17 = inlined_call_operand.vmem [shape: f32[16,128], index: 17, kind: output, shape index: {3}]  }
   0x1   :  { %9149 = sst [smem:[#allocation22_spill]] %s9124_s0 }
   0x2   :  { %9150 = sst [smem:[#allocation23_spill]] %s9125_s1 }
   0x3   :  { %9151 = sst [smem:[#allocation24_spill]] %s9126_s2 }
   0x4 LB: > { %s7361_s25 = sadd.s32 4294967295, %s7260_s24   ;;  %p5700_p0 = scmp.ge.s32.totalorder %s7260_s24, 1  ;;  %s7260_s24 = sphi %s7355_s24, %s28_s24  }
   0x5   : > { %p495_p1 = scmp.lt.s32.totalorder %s7260_s24, 3 }
   0x7   : > { %p496_p2 = pnand %p5700_p0, %p495_p1 }
   0x9   : > { %499 = sbr.rel (%p496_p2) target bundleno = 2412 (0x96c), region = 76 }
   0xe   : > { %s5701_s26 = sshll.u32 %s7361_s25, 3  ;;  %v596_v0 = vld [vmem:[%s9131_s7] sm:$0xff]  ;;  %vm614_vm0 = vcmask 523264   ;;  %s9152_s30 = sld [smem:[#allocation23_spill]]  ;;  %v597_v11 = vld [vmem:[%s9131_s7 + $0x8] sm:$0xff]  ;;  %v598_v12 = vld [vmem:[%s9131_s7 + $0x10] sm:$0xff] }
   0xf   : > { %p565_p3 = scmp.lt.s32.totalorder %s5701_s26, 15  ;;  %6698 = vmatprep.mubr.msk.f32.mxu0 %vm614_vm0, %v596_v0  ;;  %s9153_s22 = sld [smem:[#allocation22_spill]]  ;;  %v599_v13 = vld [vmem:[%s9131_s7 + $0x18] sm:$0xff]  ;;  %v600_v14 = vld [vmem:[%s9131_s7 + $0x20] sm:$0xff]  ;;  %v601_v15 = vld [vmem:[%s9131_s7 + $0x28] sm:$0xff]  ;;  %v9143_v22 = vmov 0  }
  0x10   : > { %v602_v16 = vld [vmem:[%s9131_s7 + $0x30] sm:$0xff]  ;;  %v603_v17 = vld [vmem:[%s9131_s7 + $0x38] sm:$0xff]  ;;  %v604_v18 = vld [vmem:[%s9131_s7 + $0x40] sm:$0xff]  ;;  %849 = vmatprep.mubr.bf16.mxu1 %v9143_v22  ;;  %vm801_vm1 = vcmask 261120   ;;  %vm1424_vm2 = vcmask 1045504   ;;  %vm1108_vm4 = vcmask 1046528  }
  0x11   : > { %s9197_s26 = smov (!%p565_p3, %s5701_s26), 15  ;;  %v605_v19 = vld [vmem:[%s9131_s7 + $0x48] sm:$0xff]  ;;  %vm925_vm3 = vsmask.f32 7424  ;;  %vm1261_vm5 = vsmask.f32 6400 }
  0x12   : > { %s5702_s1 = sshll.u32 %s9197_s26, 3  ;;  %s5703_s26 = sshll.u32 %s7361_s25, 1  ;;  %vm2038_vm6 = vcmask 621568   ;;  %vm2057_vm7 = vcmask 1043456   ;;  %vm3623_vm8 = vcmask 359424   ;;  %vm4856_vm9 = vcmask 1044480  }
  0x13   : > { %p571_p4 = scmp.lt.s32.totalorder %s5703_s26, 3  ;;  %s9192_s2 = sld [smem:[#allocation24_spill]]  ;;  %vm4688_vm10 = vsmask.f32 5376  ;;  %vm7264_vm11 = vmmov 0   ;;  %vm5384_vm12 = vcmask 1041408  }
  0x14   : > { %v6840_v1 = vld [vmem:[%s9152_s30 + $0x14] ss:$8 sps:$4 sm:$0xff]   ;;  %v6842_v2 = vld [vmem:[%s9152_s30 + $0x10] ss:$8 sps:$4 sm:$0xff]   ;;  %v6843_v20 = vld [vmem:[%s9152_s30 + $0x4] ss:$8 sps:$4 sm:$0xff]  }
  0x15   : > { %s568_s23 = scalar_lea.vmem %s9153_s22, %s5702_s1  ;;  %829 = vmatprep.subr.bf16.mxu1 %v6840_v1  ;;  %v6845_v21 = vld [vmem:[%s9152_s30] ss:$8 sps:$4 sm:$0xff]   ;;  %v6848_v23 = vld [vmem:[%s9152_s30 + $0x34] ss:$8 sps:$4 sm:$0xff]   ;;  %v6846_v24 = vld [vmem:[%s9152_s30 + $0x30] ss:$8 sps:$4 sm:$0xff]  }
  0x16   : > { %v613_v3 = vld [vmem:[%s568_s23 + $0x38] sm:$0xff]  ;;  %v612_v4 = vld [vmem:[%s568_s23 + $0x30] sm:$0xff]  ;;  %830 = vmatpush1.bf16.msra.mxu1 %v6842_v2  ;;  %v611_v5 = vld [vmem:[%s568_s23 + $0x28] sm:$0xff]  ;;  %s9199_s26 = smov (!%p571_p4, %s5703_s26), 3  ;;  %vm5380_vm13 = vcmask 211968   ;;  %p591_p5 = scmp.lt.s32.totalorder %s7361_s25, 1 }
  0x17   : > { %6682 = vmatprep.subr.mxu0 %v613_v3  ;;  %v610_v6 = vld [vmem:[%s568_s23 + $0x20] sm:$0xff]  ;;  %v609_v7 = vld [vmem:[%s568_s23 + $0x18] sm:$0xff]  ;;  %v608_v8 = vld [vmem:[%s568_s23 + $0x10] sm:$0xff]  ;;  %831 = vmatprep.subr.bf16.mxu1 %v6843_v20  ;;  %s6383_s27 = sshll.u32 %s9199_s26, 6  ;;  %s6384_s28 = sshll.u32 %s9199_s26, 5 }
  0x18   : > { %6683 = vmatpush3.msra.mxu0 %v613_v3  ;;  %v607_v9 = vld [vmem:[%s568_s23 + $0x8] sm:$0xff]  ;;  %v606_v10 = vld [vmem:[%s568_s23] sm:$0xff]  ;;  %v6854_v27 = vld [vmem:[%s9152_s30 + $0x54] ss:$8 sps:$4 sm:$0xff]   ;;  %s7863_s0 = scalar_lea.vmem %s9138_s14, %s6383_s27  ;;  %s8504_s18 = scalar_lea.vmem %s9139_s15, %s6384_s28 }
  0x19   : > { %6684 = vmatprep.subr.mxu0 %v612_v4  ;;  %v6851_v25 = vld [vmem:[%s9152_s30 + $0x24] ss:$8 sps:$4 sm:$0xff]   ;;  %v6849_v26 = vld [vmem:[%s9152_s30 + $0x20] ss:$8 sps:$4 sm:$0xff]   ;;  %v6860_v28 = vld [vmem:[%s9152_s30 + $0x74] ss:$8 sps:$4 sm:$0xff]  }
  0x1a   : > { %6685 = vmatpush3.msra.mxu0 %v612_v4  ;;  %832 = vmatpush1.bf16.msra.mxu1 %v6845_v21  ;;  %v6852_v31 = vld [vmem:[%s9152_s30 + $0x50] ss:$8 sps:$4 sm:$0xff]   ;;  %v6857_v33 = vld [vmem:[%s9152_s30 + $0x44] ss:$8 sps:$4 sm:$0xff]   ;;  %v6855_v37 = vld [vmem:[%s9152_s30 + $0x40] ss:$8 sps:$4 sm:$0xff]  }
  0x1b   : > { %6686 = vmatprep.subr.mxu0 %v611_v5  ;;  %1165 = vmatprep.subr.bf16.mxu1 %v6854_v27  ;;  %v6866_v40 = vld [vmem:[%s9152_s30 + $0x94] ss:$8 sps:$4 sm:$0xff]   ;;  %v6858_v50 = vld [vmem:[%s9152_s30 + $0x70] ss:$8 sps:$4 sm:$0xff]   ;;  %v6863_v52 = vld [vmem:[%s9152_s30 + $0x64] ss:$8 sps:$4 sm:$0xff]  }
  0x1c   : > { %6687 = vmatpush3.msra.mxu0 %v611_v5  ;;  %v6861_v59 = vld [vmem:[%s9152_s30 + $0x60] ss:$8 sps:$4 sm:$0xff]   ;;  %v6864_v21 = vld [vmem:[%s9152_s30 + $0x90] ss:$8 sps:$4 sm:$0xff]   ;;  %s9201_s25 = smov (!%p591_p5, %s7361_s25), 1 }
  0x1d   : > { %6688 = vmatprep.subr.mxu0 %v610_v6  ;;  %s5712_s1 = sshll.u32 %s9201_s25, 3 }
  0x1e   : > { %6689 = vmatpush3.msra.mxu0 %v610_v6  ;;  %s594_s22 = scalar_lea.vmem %s9141_s17, %s5712_s1 }
  0x1f   : > { %6690 = vmatprep.subr.mxu0 %v609_v7 }
  0x20   : > { %6691 = vmatpush3.msra.mxu0 %v609_v7 }
  0x21   : > { %6692 = vmatprep.subr.mxu0 %v608_v8 }
  0x22   : > { %6693 = vmatpush3.msra.mxu0 %v608_v8 }
  0x23   : > { %6694 = vmatprep.subr.mxu0 %v607_v9 }
  0x24   : > { %6695 = vmatpush3.msra.mxu0 %v607_v9 }
  0x25   : > { %6696 = vmatprep.subr.mxu0 %v606_v10 }
  0x26   : > { %6697 = vmatpush3.msra.mxu0 %v606_v10 }
  0x27   : > { %6699 = vmatmul.mubr.msk.f32.vlgmr.msra.gmra.mxu0 %vm614_vm0, %v597_v11  ;;  %1007 = vmatprep.subr.bf16.mxu0 %v6848_v23 }
  0x28   : > { %6701 = vmatprep.mubr.msk.f32.mxu0 %vm614_vm0, %v598_v12  ;;  %1008 = vmatpush1.bf16.msra.mxu0 %v6846_v24 }
  0x29   : > { %1009 = vmatprep.subr.bf16.mxu0 %v6851_v25  ;;  %v6869_v25 = vld [vmem:[%s9152_s30 + $0x84] ss:$8 sps:$4 sm:$0xff]  }
  0x2b   : > { %6702 = vmatmul.mubr.msk.f32.gmra.mxu0 %vm614_vm0, %v599_v13 }
  0x2c   : > { %6704 = vmatprep.mubr.msk.f32.mxu0 %vm614_vm0, %v600_v14  ;;  %1010 = vmatpush1.bf16.msra.mxu0 %v6849_v26 }
  0x2d   : > { %1328 = vmatprep.subr.bf16.mxu0 %v6860_v28 }
  0x2f   : > { %6705 = vmatmul.mubr.msk.f32.gmra.mxu0 %vm614_vm0, %v601_v15 }
  0x30   : > { %6707 = vmatprep.mubr.msk.f32.mxu0 %vm614_vm0, %v602_v16 }
  0x33   : > { %6708 = vmatmul.mubr.msk.f32.gmra.mxu0 %vm614_vm0, %v603_v17 }
  0x34   : > { %6710 = vmatprep.mubr.msk.f32.mxu0 %vm614_vm0, %v604_v18 }
  0x37   : > { %6711 = vmatmul.mubr.msk.f32.gmra.mxu0 %vm614_vm0, %v605_v19 }
  0x38   : > { %1027 = vmatprep.mubr.bf16.mxu0 %v9143_v22 }
  0xe7   : > { %v6700_v29 = vpop.f32.mrf.mxu0 }
  0xe9   : > { %v711_v30 = vpop.f32.mrf.mxu0 }
  0xea   : > { %v7444_v32 = vpack.c.bf16 %v6700_v29, %v711_v30  ;;  %v6867_v30 = vld [vmem:[%s9152_s30 + $0x80] ss:$8 sps:$4 sm:$0xff]  }
  0xeb   : > { %v6703_v34 = vpop.f32.mrf.mxu0 }
  0xec   : > { %v928_v35 = vshll.u32 %v7444_v32, 16  ;;  %5727 = vmatmul.mubr.msk.bf16.vlgmr.msra.gmra.mxu1 %vm801_vm1, %v7444_v32  ;;  %v926_v42 = vshrl.u32 %v7444_v32, 16  ;;  %v1425_v45 = vrot.slane %v7444_v32, 2  ;;  %v1109_v19 = vrot.slane %v7444_v32, 1 }
  0xed   : > { %v721_v36 = vpop.f32.mrf.mxu0  ;;  %859 = vmatprep.mubr.bf16.mxu1 %v9143_v22  ;;  %1166 = vmatpush1.bf16.msra.mxu1 %v6852_v31 }
  0xee   : > { %v7456_v38 = vpack.c.bf16 %v6703_v34, %v721_v36  ;;  %v930_v39 = vrot.slane %v928_v35, 1  ;;  %1167 = vmatprep.subr.bf16.mxu1 %v6857_v33  ;;  %v1262_v28 = vrot.slane %v926_v42, 1  ;;  %v1263_v29 = vrot.slane %v928_v35, 2 }
  0xef   : > { %v6706_v41 = vpop.f32.mrf.mxu0 }
  0xf0   : > { %v932_v43 = vshll.u32 %v7456_v38, 16  ;;  %v1426_v46 = vrot.slane %v7456_v38, 2  ;;  %v931_v48 = vor.u32 %v930_v39, %v926_v42  ;;  %v936_v62 = vshrl.u32 %v7456_v38, 16 }
  0xf1   : > { %v731_v44 = vpop.f32.mrf.mxu0  ;;  %1168 = vmatpush1.bf16.msra.mxu1 %v6855_v37  ;;  %v1110_v18 = vrot.slane %v7456_v38, 1  ;;  %v1264_v34 = vor.u32 %v1263_v29, %v1262_v28 }
  0xf2   : > { %v7467_v47 = vpack.c.bf16 %v6706_v41, %v731_v44  ;;  %v934_v49 = vrot.slane %v932_v43, 1  ;;  %1481 = vmatprep.subr.bf16.mxu1 %v6866_v40  ;;  %v7480_v53 = vsel %vm1424_vm2, %v1425_v45, %v1426_v46  ;;  %v1265_v26 = vrot.slane %v936_v62, 1 }
  0xf3   : > { %v6709_v51 = vpop.f32.mrf.mxu0  ;;  %v1111_v23 = vsel %vm1108_vm4, %v1109_v19, %v1110_v18  ;;  %v1266_v27 = vrot.slane %v932_v43, 2  ;;  %v6901_v19 = vld [vmem:[%s9135_s11 + $0x80] sm:$0xff]  }
  0xf4   : > { %5728 = vmatmul.mubr.msk.bf16.gmra.mxu1 %vm801_vm1, %v7456_v38  ;;  %v935_v54 = vsel %vm925_vm3, %v931_v48, %v934_v49  ;;  %v939_v55 = vshll.u32 %v7467_v47, 16  ;;  %v1428_v57 = vrot.slane %v7467_v47, 2  ;;  %v938_v2 = vor.u32 %v936_v62, %v934_v49  ;;  %v6880_v62 = vld [vmem:[%s9135_s11 + $0x28] sm:$0xff]  }
  0xf5   : > { %5740 = vmatmul.mubr.msk.bf16.vlgmr.msra.gmra.mxu0 %vm801_vm1, %v935_v54  ;;  %v741_v56 = vpop.f32.mrf.mxu0  ;;  %869 = vmatprep.mubr.bf16.mxu1 %v9143_v22  ;;  %v943_v8 = vshrl.u32 %v7467_v47, 16  ;;  %v1112_v31 = vrot.slane %v7467_v47, 1  ;;  %v1267_v33 = vor.u32 %v1266_v27, %v1265_v26  ;;  %v6872_v54 = vld [vmem:[%s9135_s11 + $0x38] sm:$0xff]  }
  0xf6   : > { %v7489_v58 = vpack.c.bf16 %v6709_v51, %v741_v56  ;;  %1037 = vmatprep.mubr.bf16.mxu0 %v9143_v22  ;;  %1329 = vmatpush1.bf16.msra.mxu0 %v6858_v50  ;;  %v7496_v61 = vsel %vm1424_vm2, %v1426_v46, %v1428_v57  ;;  %v941_v63 = vrot.slane %v939_v55, 1  ;;  %v1270_v35 = vrot.slane %v939_v55, 2  ;;  %v6873_v55 = vld [vmem:[%s9135_s11 + $0xb8] sm:$0xff]   ;;  %v6874_v56 = vld [vmem:[%s9135_s11 + $0x70] sm:$0xff]  }
  0xf7   : > { %v6712_v60 = vpop.f32.mrf.mxu0  ;;  %1330 = vmatprep.subr.bf16.mxu0 %v6863_v52  ;;  %v1113_v36 = vsel %vm1108_vm4, %v1110_v18, %v1112_v31  ;;  %v1268_v37 = vsel %vm1261_vm5, %v1264_v34, %v1267_v33  ;;  %v1269_v32 = vrot.slane %v943_v8, 1  ;;  %v6870_v52 = vld [vmem:[%s9135_s11 + $0x78] sm:$0xff]   ;;  %v6900_v18 = vld [vmem:[%s9135_s11] sm:$0xff]  }
  0xf8   : > { %v1430_v1 = vrot.slane %v7489_v58, 2  ;;  %v942_v5 = vsel %vm925_vm3, %v938_v2, %v941_v63  ;;  %v946_v6 = vshll.u32 %v7489_v58, 16  ;;  %v945_v10 = vor.u32 %v943_v8, %v941_v63  ;;  %v6881_v63 = vld [vmem:[%s9135_s11 + $0xa8] sm:$0xff]   ;;  %v6884_v2 = vld [vmem:[%s9135_s11 + $0x20] sm:$0xff]   ;;  %v6890_v8 = vld [vmem:[%s9135_s11 + $0x50] sm:$0xff]  }
  0xf9   : > { %v751_v0 = vpop.f32.mrf.mxu0  ;;  %v950_v14 = vshrl.u32 %v7489_v58, 16  ;;  %v1114_v38 = vrot.slane %v7489_v58, 1  ;;  %v1271_v39 = vor.u32 %v1270_v35, %v1269_v32 }
  0xfa   : > { %v7502_v3 = vpack.c.bf16 %v6712_v60, %v751_v0  ;;  %1331 = vmatpush1.bf16.msra.mxu0 %v6861_v59  ;;  %v7505_v4 = vsel %vm1424_vm2, %v1428_v57, %v1430_v1  ;;  %v948_v11 = vrot.slane %v946_v6, 1  ;;  %v1274_v43 = vrot.slane %v946_v6, 2  ;;  %v6875_v57 = vld [vmem:[%s9135_s11 + $0xf0] sm:$0xff]   ;;  %v6878_v60 = vld [vmem:[%s9135_s11 + $0x68] sm:$0xff]   ;;  %v6882_v0 = vld [vmem:[%s9135_s11 + $0x60] sm:$0xff]  }
  0xfb   : > { %v1115_v40 = vsel %vm1108_vm4, %v1112_v31, %v1114_v38  ;;  %v1272_v41 = vsel %vm1261_vm5, %v1267_v33, %v1271_v39  ;;  %v1273_v42 = vrot.slane %v950_v14, 1  ;;  %6404 = vmatprep.subr.bf16.mxu0 %v6870_v52  ;;  %v6877_v59 = vld [vmem:[%s9135_s11 + $0xb0] sm:$0xff]   ;;  %v6888_v6 = vld [vmem:[%s9135_s11 + $0x18] sm:$0xff]  }
  0xfc   : > { %5729 = vmatmul.mubr.msk.bf16.gmra.mxu1 %vm801_vm1, %v7467_v47  ;;  %v1432_v7 = vrot.slane %v7502_v3, 2  ;;  %v949_v12 = vsel %vm925_vm3, %v945_v10, %v948_v11  ;;  %v953_v13 = vshll.u32 %v7502_v3, 16  ;;  %v952_v15 = vor.u32 %v950_v14, %v948_v11  ;;  %v6892_v10 = vld [vmem:[%s9135_s11 + $0x10] sm:$0xff]   ;;  %v6896_v14 = vld [vmem:[%s9135_s11 + $0x8] sm:$0xff]  }
  0xfd   : > { %5741 = vmatmul.mubr.msk.bf16.gmra.mxu0 %vm801_vm1, %v942_v5  ;;  %879 = vmatprep.mubr.bf16.mxu1 %v9143_v22  ;;  %v957_v20 = vshrl.u32 %v7502_v3, 16  ;;  %v1116_v44 = vrot.slane %v7502_v3, 1  ;;  %v1275_v45 = vor.u32 %v1274_v43, %v1273_v42  ;;  %v6887_v5 = vld [vmem:[%s9135_s11 + $0xd8] sm:$0xff]   ;;  %v6893_v11 = vld [vmem:[%s9135_s11 + $0x90] sm:$0xff]  }
  0xfe   : > { %1047 = vmatprep.mubr.bf16.mxu0 %v9143_v22  ;;  %v7519_v9 = vsel %vm1424_vm2, %v1430_v1, %v1432_v7  ;;  %v955_v16 = vrot.slane %v953_v13, 1  ;;  %v1278_v49 = vrot.slane %v953_v13, 2  ;;  %v6883_v1 = vld [vmem:[%s9135_s11 + $0xe0] sm:$0xff]   ;;  %v6895_v13 = vld [vmem:[%s9135_s11 + $0xc8] sm:$0xff]  }
  0xff   : > { %v1117_v46 = vsel %vm1108_vm4, %v1114_v38, %v1116_v44  ;;  %v1276_v47 = vsel %vm1261_vm5, %v1271_v39, %v1275_v45  ;;  %v1277_v48 = vrot.slane %v957_v20, 1 }
 0x100   : > { %v956_v17 = vsel %vm925_vm3, %v952_v15, %v955_v16  ;;  %v959_v24 = vor.u32 %v957_v20, %v955_v16  ;;  %v6897_v15 = vld [vmem:[%s9135_s11 + $0x88] sm:$0xff]   ;;  %v6898_v16 = vld [vmem:[%s9135_s11 + $0x40] sm:$0xff]  }
 0x101   : > { %v1279_v50 = vor.u32 %v1278_v49, %v1277_v48 }
 0x103   : > { %v1280_v51 = vsel %vm1261_vm5, %v1275_v45, %v1279_v50 }
 0x104   : > { %5730 = vmatmul.mubr.msk.bf16.gmra.mxu1 %vm801_vm1, %v7489_v58  ;;  %v6876_v58 = vld [vmem:[%s9135_s11 + $0x30] sm:$0xff]  }
 0x105   : > { %5742 = vmatmul.mubr.msk.bf16.gmra.mxu0 %vm801_vm1, %v949_v12  ;;  %889 = vmatprep.mubr.bf16.mxu1 %v9143_v22  ;;  %v6894_v12 = vld [vmem:[%s9135_s11 + $0x48] sm:$0xff]  }
 0x106   : > { %1057 = vmatprep.mubr.bf16.mxu0 %v9143_v22 }
 0x10c   : > { %5731 = vmatmul.mubr.msk.bf16.gmra.mxu1 %vm801_vm1, %v7502_v3  ;;  %v6885_v3 = vld [vmem:[%s9135_s11 + $0xa0] sm:$0xff]  }
 0x10d   : > { %5743 = vmatmul.mubr.msk.bf16.gmra.mxu0 %vm801_vm1, %v956_v17  ;;  %1185 = vmatprep.mubr.bf16.mxu1 %v9143_v22  ;;  %v6899_v17 = vld [vmem:[%s9135_s11 + $0xc0] sm:$0xff]  }
 0x10e   : > { %1067 = vmatprep.mubr.bf16.mxu0 %v9143_v22 }
 0x114   : > { %5753 = vmatmul.mubr.msk.bf16.vlgmr.msra.gmra.mxu1 %vm801_vm1, %v1111_v23 }
 0x115   : > { %5744 = vmatmul.mubr.msk.bf16.gmra.mxu0 %vm801_vm1, %v959_v24  ;;  %1195 = vmatprep.mubr.bf16.mxu1 %v9143_v22 }
 0x116   : > { %1348 = vmatprep.mubr.bf16.mxu0 %v9143_v22  ;;  %1482 = vmatpush1.bf16.msra.mxu1 %v6864_v21 }
 0x117   : > { %1483 = vmatprep.subr.bf16.mxu1 %v6869_v25 }
 0x11a   : > { %1484 = vmatpush1.bf16.msra.mxu1 %v6867_v30 }
 0x11c   : > { %5754 = vmatmul.mubr.msk.bf16.gmra.mxu1 %vm801_vm1, %v1113_v36 }
 0x11d   : > { %5766 = vmatmul.mubr.msk.bf16.vlgmr.msra.gmra.mxu0 %vm801_vm1, %v1268_v37  ;;  %1205 = vmatprep.mubr.bf16.mxu1 %v9143_v22 }
 0x11e   : > { %1358 = vmatprep.mubr.bf16.mxu0 %v9143_v22  ;;  %6405 = vmatpush3.bf16.msra.mxu0 %v6872_v54 }
 0x11f   : > { %6406 = vmatprep.subr.bf16.mxu0 %v6874_v56 }
 0x122   : > { %6407 = vmatpush3.bf16.msra.mxu0 %v6876_v58 }
 0x123   : > { %6408 = vmatprep.subr.bf16.mxu0 %v6878_v60 }
 0x124   : > { %5755 = vmatmul.mubr.msk.bf16.gmra.mxu1 %vm801_vm1, %v1115_v40 }
 0x125   : > { %5767 = vmatmul.mubr.msk.bf16.gmra.mxu0 %vm801_vm1, %v1272_v41  ;;  %1215 = vmatprep.mubr.bf16.mxu1 %v9143_v22 }
 0x126   : > { %1368 = vmatprep.mubr.bf16.mxu0 %v9143_v22  ;;  %6409 = vmatpush3.bf16.msra.mxu0 %v6880_v62 }
 0x127   : > { %6410 = vmatprep.subr.bf16.mxu0 %v6882_v0 }
 0x12a   : > { %6411 = vmatpush3.bf16.msra.mxu0 %v6884_v2 }
 0x12c   : > { %5756 = vmatmul.mubr.msk.bf16.gmra.mxu1 %vm801_vm1, %v1117_v46 }
 0x12d   : > { %5768 = vmatmul.mubr.msk.bf16.gmra.mxu0 %vm801_vm1, %v1276_v47  ;;  %1225 = vmatprep.mubr.bf16.mxu1 %v9143_v22 }
 0x12e   : > { %1378 = vmatprep.mubr.bf16.mxu0 %v9143_v22 }
 0x134   : > { %5757 = vmatmul.mubr.msk.bf16.gmra.mxu1 %vm801_vm1, %v1116_v44 }
 0x135   : > { %5769 = vmatmul.mubr.msk.bf16.gmra.mxu0 %vm801_vm1, %v1280_v51  ;;  %1501 = vmatprep.mubr.bf16.mxu1 %v9143_v22 }
 0x136   : > { %1388 = vmatprep.mubr.bf16.mxu0 %v9143_v22 }
 0x13c   : > { %5779 = vmatmul.mubr.msk.bf16.vlgmr.msra.gmra.mxu1 %vm801_vm1, %v7480_v53  ;;  %v6871_v53 = vld [vmem:[%s9135_s11 + $0xf8] sm:$0xff]  }
 0x13d   : > { %5770 = vmatmul.mubr.msk.bf16.gmra.mxu0 %vm801_vm1, %v1279_v50  ;;  %1511 = vmatprep.mubr.bf16.mxu1 %v9143_v22 }
 0x13e   : > { %6450 = vmatprep.subr.bf16.mxu1 %v6871_v53 }
 0x13f   : > { %6451 = vmatpush3.bf16.msra.mxu1 %v6873_v55 }
 0x140   : > { %6452 = vmatprep.subr.bf16.mxu1 %v6875_v57 }
 0x143   : > { %6453 = vmatpush3.bf16.msra.mxu1 %v6877_v59 }
 0x144   : > { %5780 = vmatmul.mubr.msk.bf16.gmra.mxu1 %vm801_vm1, %v7496_v61  ;;  %v6879_v61 = vld [vmem:[%s9135_s11 + $0xe8] sm:$0xff]  }
 0x145   : > { %1521 = vmatprep.mubr.bf16.mxu1 %v9143_v22  ;;  %6454 = vmatprep.subr.bf16.mxu1 %v6879_v61 }
 0x147   : > { %6455 = vmatpush3.bf16.msra.mxu1 %v6881_v63 }
 0x148   : > { %6456 = vmatprep.subr.bf16.mxu1 %v6883_v1 }
 0x14b   : > { %6457 = vmatpush3.bf16.msra.mxu1 %v6885_v3 }
 0x14c   : > { %5781 = vmatmul.mubr.msk.bf16.gmra.mxu1 %vm801_vm1, %v7505_v4  ;;  %v6886_v4 = vld [vmem:[%s9135_s11 + $0x58] sm:$0xff]   ;;  %6458 = vmatprep.subr.bf16.mxu1 %v6887_v5 }
 0x14d   : > { %1531 = vmatprep.mubr.bf16.mxu1 %v9143_v22  ;;  %6412 = vmatprep.subr.bf16.mxu0 %v6886_v4 }
 0x14e   : > { %6413 = vmatpush3.bf16.msra.mxu0 %v6888_v6 }
 0x14f   : > { %6414 = vmatprep.subr.bf16.mxu0 %v6890_v8 }
 0x152   : > { %6415 = vmatpush3.bf16.msra.mxu0 %v6892_v10  ;;  %v762_v10 = vlaneseq }
 0x153   : > { %6416 = vmatprep.subr.bf16.mxu0 %v6894_v12 }
 0x154   : > { %5782 = vmatmul.mubr.msk.bf16.gmra.mxu1 %vm801_vm1, %v7519_v9  ;;  %v6891_v9 = vld [vmem:[%s9135_s11 + $0xd0] sm:$0xff]  }
 0x155   : > { %1541 = vmatprep.mubr.bf16.mxu1 %v9143_v22  ;;  %v760_v22 = vld [vmem:[%s9128_s4] sm:$0x3] }
 0x156   : > { %6417 = vmatpush3.bf16.msra.mxu0 %v6896_v14 }
 0x157   : > { %6418 = vmatprep.subr.bf16.mxu0 %v6898_v16 }
 0x15a   : > { %6419 = vmatpush3.bf16.msra.mxu0 %v6900_v18 }
 0x15c   : > { %5783 = vmatmul.mubr.msk.bf16.gmra.mxu1 %vm801_vm1, %v1432_v7  ;;  %v6889_v7 = vld [vmem:[%s9135_s11 + $0x98] sm:$0xff]  }
 0x15d   : > { %6459 = vmatpush3.bf16.msra.mxu1 %v6889_v7 }
 0x15e   : > { %6460 = vmatprep.subr.bf16.mxu1 %v6891_v9 }
 0x161   : > { %6461 = vmatpush3.bf16.msra.mxu1 %v6893_v11 }
 0x162   : > { %6462 = vmatprep.subr.bf16.mxu1 %v6895_v13 }
 0x165   : > { %6463 = vmatpush3.bf16.msra.mxu1 %v6897_v15  ;;  %v763_v15 = vshrl.u32 %v762_v10, 7 }
 0x166   : > { %6464 = vmatprep.subr.bf16.mxu1 %v6899_v17 }
 0x169   : > { %6465 = vmatpush3.bf16.msra.mxu1 %v6901_v19  ;;  %v7802_v19 = vsub.s32 0, %v763_v15 }
 0x16b   : > { %9165 = vst [vmem:[#allocation13_spill] sm:$0xff] %v7802_v19  ;;  %v7817_v10 = vrot.slane %v760_v22, %v7802_v19 }
 0x1ac   : > { %v7698_v20 = vpop.f32.mrf.mxu1 }
 0x1ae   : > { %v7700_v21 = vpop.f32.mrf.mxu1 }
 0x1b0   : > { %v7702_v23 = vpop.f32.mrf.mxu1 }
 0x1b2   : > { %v7704_v24 = vpop.f32.mrf.mxu1 }
 0x1b4   : > { %v7706_v25 = vpop.f32.mrf.mxu1 }
 0x1b5   : > { %v7708_v26 = vpop.f32.mrf.mxu0 }
 0x1b6   : > { %v7710_v27 = vpop.f32.mrf.mxu1 }
 0x1b7   : > { %v7712_v28 = vpop.f32.mrf.mxu0 }
 0x1b8   : > { %v7714_v29 = vpop.f32.mrf.mxu1 }
 0x1b9   : > { %v7716_v30 = vpop.f32.mrf.mxu0 }
 0x1ba   : > { %v7718_v31 = vpop.f32.mrf.mxu1 }
 0x1bb   : > { %v7720_v33 = vpop.f32.mrf.mxu0 }
 0x1bc   : > { %v7722_v34 = vpop.f32.mrf.mxu1 }
 0x1bd   : > { %v7724_v36 = vpop.f32.mrf.mxu0 }
 0x1be   : > { %v7726_v37 = vpop.f32.mrf.mxu1 }
 0x1bf   : > { %v7728_v32 = vpop.f32.mrf.mxu0 }
 0x1c0   : > { %v7730_v35 = vpop.f32.mrf.mxu1 }
 0x1c1   : > { %v7732_v38 = vpop.f32.mrf.mxu0 }
 0x1c2   : > { %v7734_v39 = vpop.f32.mrf.mxu1 }
 0x1c3   : > { %v7736_v40 = vpop.f32.mrf.mxu0 }
 0x1c4   : > { %v7738_v41 = vpop.f32.mrf.mxu1 }
 0x1c5   : > { %v7740_v42 = vpop.f32.mrf.mxu0 }
 0x1c6   : > { %v7742_v43 = vpop.f32.mrf.mxu1 }
 0x1c7   : > { %v7744_v44 = vpop.f32.mrf.mxu0 }
 0x1c8   : > { %v7746_v45 = vpop.f32.mrf.mxu1 }
 0x1c9   : > { %v7748_v46 = vpop.f32.mrf.mxu0 }
 0x1ca   : > { %v7750_v47 = vpop.f32.mrf.mxu1 }
 0x1cb   : > { %9154 = vst [vmem:[#allocation2_spill] sm:$0xff] %v7750_v47  ;;  %v7752_v48 = vpop.f32.mrf.mxu0 }
 0x1cc   : > { %v7754_v49 = vpop.f32.mrf.mxu1 }
 0x1cd   : > { %9155 = vst [vmem:[#allocation3_spill] sm:$0xff] %v7754_v49  ;;  %v7756_v50 = vpop.f32.mrf.mxu0 }
 0x1ce   : > { %v7758_v51 = vpop.f32.mrf.mxu1 }
 0x1cf   : > { %9156 = vst [vmem:[#allocation4_spill] sm:$0xff] %v7758_v51  ;;  %v7760_v52 = vpop.f32.mrf.mxu0 }
 0x1d0   : > { %v7762_v53 = vpop.f32.mrf.mxu1 }
 0x1d1   : > { %9157 = vst [vmem:[#allocation5_spill] sm:$0xff] %v7762_v53  ;;  %v7764_v54 = vpop.f32.mrf.mxu0 }
 0x1d2   : > { %9158 = vst [vmem:[#allocation6_spill] sm:$0xff] %v7764_v54  ;;  %v7766_v55 = vpop.f32.mrf.mxu1 }
 0x1d3   : > { %9159 = vst [vmem:[#allocation7_spill] sm:$0xff] %v7766_v55  ;;  %v7768_v56 = vpop.f32.mrf.mxu0  ;;  %v7811_v55 = vsub.s32 1, %v763_v15  ;;  %v900_v15 = vadd.f32 %v7698_v20, %v7817_v10 }
 0x1d4   : > { %9160 = vst [vmem:[#allocation8_spill] sm:$0xff] %v7768_v56  ;;  %v1187_v57 = vpop.f32.mrf.mxu1 }
 0x1d5   : > { %v7770_v58 = vpop.f32.mrf.mxu0  ;;  %9167 = vst [vmem:[#allocation15_spill] sm:$0xff] %v7811_v55  ;;  %v7824_v51 = vrot.slane %v760_v22, %v7811_v55  ;;  %v902_v55 = vadd.f32 %v7702_v23, %v7817_v10 }
 0x1d6   : > { %9161 = vst [vmem:[#allocation9_spill] sm:$0xff] %v7770_v58  ;;  %v1189_v59 = vpop.f32.mrf.mxu1 }
 0x1d7   : > { %v7772_v60 = vpop.f32.mrf.mxu0  ;;  %v901_v19 = vadd.f32 %v7700_v21, %v7824_v51  ;;  %v903_v21 = vadd.f32 %v7704_v24, %v7824_v51 }
 0x1d8   : > { %9162 = vst [vmem:[#allocation10_spill] sm:$0xff] %v7772_v60  ;;  %v1191_v61 = vpop.f32.mrf.mxu1 }
 0x1d9   : > { %v7774_v62 = vpop.f32.mrf.mxu0  ;;  %v1081_v23 = vadd.f32 %v7720_v33, %v903_v21 }
 0x1da   : > { %9163 = vst [vmem:[#allocation11_spill] sm:$0xff] %v7774_v62  ;;  %v1193_v63 = vpop.f32.mrf.mxu1 }
 0x1db   : > { %v7776_v0 = vpop.f32.mrf.mxu0 }
 0x1dc   : > { %9164 = vst [vmem:[#allocation12_spill] sm:$0xff] %v7776_v0  ;;  %v7778_v1 = vpop.f32.mrf.mxu1 }
 0x1dd   : > { %v1350_v2 = vpop.f32.mrf.mxu0 }
 0x1de   : > { %v7780_v3 = vpop.f32.mrf.mxu1 }
 0x1df   : > { %v1352_v4 = vpop.f32.mrf.mxu0 }
 0x1e0   : > { %v7782_v5 = vpop.f32.mrf.mxu1 }
 0x1e1   : > { %v1354_v6 = vpop.f32.mrf.mxu0 }
 0x1e2   : > { %v7784_v7 = vpop.f32.mrf.mxu1 }
 0x1e3   : > { %v1356_v8 = vpop.f32.mrf.mxu0 }
 0x1e4   : > { %v7786_v9 = vpop.f32.mrf.mxu1 }
 0x1e5   : > { %v7788_v11 = vpop.f32.mrf.mxu0 }
 0x1e6   : > { %v7790_v12 = vpop.f32.mrf.mxu1 }
 0x1e7   : > { %v7792_v13 = vpop.f32.mrf.mxu0 }
 0x1e8   : > { %v7794_v14 = vpop.f32.mrf.mxu1 }
 0x1e9   : > { %v7796_v16 = vpop.f32.mrf.mxu0 }
 0x1ea   : > { %v7798_v17 = vpop.f32.mrf.mxu1 }
 0x1eb   : > { %v7807_v0 = vpop.f32.mrf.mxu0 }
 0x1ec   : > { %v7800_v18 = vpop.f32.mrf.mxu1 }
 0x1ed   : > { %v7819_v53 = vpop.f32.mrf.mxu0 }
 0x1ee   : > { %v7809_v62 = vpop.f32.mrf.mxu1 }
 0x1ef   : > { %9166 = vst [vmem:[#allocation14_spill] sm:$0xff] %v7809_v62  ;;  %v7830_v49 = vpop.f32.mrf.mxu0  ;;  %v1078_v62 = vadd.f32 %v7708_v26, %v900_v15  ;;  %v1080_v26 = vadd.f32 %v7716_v30, %v902_v55  ;;  %v1239_v30 = vadd.f32 %v1193_v63, %v1081_v23  ;;  %v907_v63 = vadd.f32 %v7718_v31, %v7824_v51 }
 0x1f0   : > { %v7813_v60 = vpop.f32.mrf.mxu1 }
 0x1f1   : > { %9168 = vst [vmem:[#allocation16_spill] sm:$0xff] %v7813_v60  ;;  %v1236_v20 = vadd.f32 %v1187_v57, %v1078_v62 }
 0x1f2   : > { %v7821_v58 = vpop.f32.mrf.mxu1 }
 0x1f3   : > { %9169 = vst [vmem:[#allocation17_spill] sm:$0xff] %v7821_v58  ;;  %v7844_v58 = vpop.f32.mrf.mxu0 }
 0x1f4   : > { %v7826_v56 = vpop.f32.mrf.mxu1 }
 0x1f5   : > { %9170 = vst [vmem:[#allocation18_spill] sm:$0xff] %v7826_v56  ;;  %v1079_v56 = vadd.f32 %v7712_v28, %v901_v19  ;;  %v1238_v28 = vadd.f32 %v1191_v61, %v1080_v26  ;;  %v905_v19 = vadd.f32 %v7710_v27, %v7824_v51  ;;  %v7858_v24 = vpop.f32.mrf.mxu0 }
 0x1f6   : > { %v7832_v60 = vpop.f32.mrf.mxu1 }
 0x1f7   : > { %9171 = vst [vmem:[#allocation19_spill] sm:$0xff] %v7832_v60  ;;  %v1237_v15 = vadd.f32 %v1189_v59, %v1079_v56  ;;  %v1399_v60 = vadd.f32 %v1350_v2, %v1236_v20  ;;  %v1401_v55 = vadd.f32 %v1354_v6, %v1238_v28  ;;  %v1083_v27 = vadd.f32 %v7728_v32, %v905_v19  ;;  %v7873_v6 = vpop.f32.mrf.mxu0 }
 0x1f8   : > { %v7839_v22 = vpop.f32.mrf.mxu1  ;;  %v910_v19 = vadd.f32 %v7730_v35, %v7817_v10 }
 0x1f9   : > { %9172 = vst [vmem:[#allocation20_spill] sm:$0xff] %v7839_v22  ;;  %v904_v22 = vadd.f32 %v7706_v25, %v7817_v10  ;;  %v1400_v57 = vadd.f32 %v1352_v4, %v1237_v15  ;;  %v7885_v23 = vpop.f32.mrf.mxu0 }
 0x1fa   : > { %v7846_v54 = vpop.f32.mrf.mxu1 }
 0x1fb   : > { %9173 = vst [vmem:[#allocation21_spill] sm:$0xff] %v7846_v54  ;;  %v1082_v54 = vadd.f32 %v7724_v36, %v904_v22 }
 0x1fc   : > { %v1503_v47 = vpop.f32.mrf.mxu1 }
 0x1fd   : > { %v1552_v62 = vadd.f32 %v1503_v47, %v1399_v60  ;;  %v906_v47 = vadd.f32 %v7714_v29, %v7817_v10  ;;  %v1240_v59 = vadd.f32 %v7778_v1, %v1082_v54  ;;  %v1402_v60 = vadd.f32 %v1356_v8, %v1239_v30 }
 0x1fe   : > { %v1505_v25 = vpop.f32.mrf.mxu1  ;;  %v1241_v29 = vadd.f32 %v7780_v3, %v1083_v27  ;;  %v1085_v8 = vadd.f32 %v7736_v40, %v907_v63  ;;  %v908_v3 = vadd.f32 %v7722_v34, %v7817_v10  ;;  %v912_v27 = vadd.f32 %v7738_v41, %v7817_v10 }
 0x1ff   : > { %v1572_v33 = vmax.f32 %v1552_v62, 0.0  ;;  %v1553_v56 = vadd.f32 %v1505_v25, %v1400_v57  ;;  %v1084_v4 = vadd.f32 %v7732_v38, %v906_v47  ;;  %v1403_v32 = vadd.f32 %v7788_v11, %v1240_v59 }
 0x200   : > { %v1507_v36 = vpop.f32.mrf.mxu1  ;;  %v1404_v31 = vadd.f32 %v7792_v13, %v1241_v29  ;;  %v1243_v11 = vadd.f32 %v7784_v7, %v1085_v8  ;;  %v909_v13 = vadd.f32 %v7726_v37, %v7824_v51  ;;  %v1086_v34 = vadd.f32 %v7740_v42, %v908_v3  ;;  %v7899_v37 = vpop.f32.mrf.mxu0  ;;  %v9178_v3 = vld [vmem:[#allocation8_spill] sm:$0xff] }
 0x201   : > { %1592 = vst [vmem:[%s7863_s0] sm:$0xff] %v1572_v33  ;;  %v1573_v61 = vmax.f32 %v1553_v56, 0.0  ;;  %v1554_v2 = vadd.f32 %v1507_v36, %v1401_v55  ;;  %v1242_v20 = vadd.f32 %v7782_v5, %v1084_v4  ;;  %v1088_v42 = vadd.f32 %v7748_v46, %v910_v19 }
 0x202   : > { %v1509_v22 = vpop.f32.mrf.mxu1  ;;  %v1406_v7 = vadd.f32 %v7807_v0, %v1243_v11  ;;  %v1244_v0 = vadd.f32 %v7786_v9, %v1086_v34  ;;  %v913_v9 = vadd.f32 %v7742_v43, %v7824_v51  ;;  %v1386_v63 = vpop.f32.mrf.mxu0 }
 0x203   : > { %1593 = vst [vmem:[%s7863_s0 + $0x8] sm:$0xff] %v1573_v61  ;;  %v1574_v54 = vmax.f32 %v1554_v2, 0.0  ;;  %v1555_v1 = vadd.f32 %v1509_v22, %v1402_v60  ;;  %v1405_v40 = vadd.f32 %v7796_v16, %v1242_v20  ;;  %v911_v16 = vadd.f32 %v7734_v39, %v7824_v51  ;;  %v9176_v20 = vld [vmem:[#allocation14_spill] sm:$0xff] }
 0x204   : > { %v1513_v21 = vpop.f32.mrf.mxu1  ;;  %v1246_v59 = vadd.f32 %v7794_v14, %v1088_v42  ;;  %v1407_v60 = vadd.f32 %v7819_v53, %v1244_v0  ;;  %v1090_v2 = vadd.f32 %v7756_v50, %v912_v27  ;;  %v914_v53 = vadd.f32 %v7746_v45, %v7817_v10  ;;  %v1390_v45 = vpop.f32.mrf.mxu0 }
 0x205   : > { %1594 = vst [vmem:[%s7863_s0 + $0x10] sm:$0xff] %v1574_v54  ;;  %v1609_v38 = vpack.c.bf16 %v1574_v54, %v1572_v33  ;;  %v1575_v26 = vmax.f32 %v1555_v1, 0.0  ;;  %v1556_v15 = vadd.f32 %v1513_v21, %v1403_v32  ;;  %v1087_v33 = vadd.f32 %v7744_v44, %v909_v13  ;;  %v9175_v1 = vld [vmem:[#allocation6_spill] sm:$0xff] }
 0x206   : > { %v1515_v28 = vpop.f32.mrf.mxu1  ;;  %v1089_v39 = vadd.f32 %v7752_v48, %v911_v16  ;;  %v1091_v29 = vadd.f32 %v7760_v52, %v913_v9  ;;  %v1248_v43 = vadd.f32 %v7800_v18, %v1090_v2  ;;  %v1092_v8 = vadd.f32 %v9175_v1, %v914_v53  ;;  %v9191_v1 = vld [vmem:[#allocation21_spill] sm:$0xff] }
 0x207   : > { %1595 = vst [vmem:[%s7863_s0 + $0x18] sm:$0xff] %v1575_v26  ;;  %v1610_v5 = vpack.c.bf16 %v1575_v26, %v1573_v61  ;;  %v1576_v57 = vmax.f32 %v1556_v15, 0.0  ;;  %v1557_v62 = vadd.f32 %v1515_v28, %v1404_v31  ;;  %v1245_v44 = vadd.f32 %v7790_v12, %v1087_v33  ;;  %v9177_v26 = vld [vmem:[#allocation3_spill] sm:$0xff]  ;;  %v9179_v28 = vld [vmem:[#allocation16_spill] sm:$0xff]  ;;  %v1392_v33 = vpop.f32.mrf.mxu0 }
 0x208   : > { %v1517_v25 = vpop.f32.mrf.mxu1  ;;  %v1247_v41 = vadd.f32 %v7798_v17, %v1089_v39  ;;  %v1409_v12 = vadd.f32 %v7844_v58, %v1246_v59  ;;  %v1249_v21 = vadd.f32 %v9176_v20, %v1091_v29  ;;  %v1411_v52 = vadd.f32 %v7873_v6, %v1248_v43  ;;  %v9180_v6 = vld [vmem:[#allocation4_spill] sm:$0xff]  ;;  %v9184_v39 = vld [vmem:[#allocation10_spill] sm:$0xff] }
 0x209   : > { %1596 = vst [vmem:[%s7863_s0 + $0x20] sm:$0xff] %v1576_v57  ;;  %v1577_v30 = vmax.f32 %v1557_v62, 0.0  ;;  %v1558_v55 = vadd.f32 %v1517_v25, %v1405_v40  ;;  %1779 = vmatprep.mubr.bf16.mxu0 %v1610_v5  ;;  %1981 = vmatprep.mubr.bf16.mxu1 %v1610_v5  ;;  %v1408_v48 = vadd.f32 %v7830_v49, %v1245_v44  ;;  %v9174_v49 = vld [vmem:[#allocation2_spill] sm:$0xff]  ;;  %v9189_v29 = vld [vmem:[#allocation12_spill] sm:$0xff] }
 0x20a   : > { %v1519_v35 = vpop.f32.mrf.mxu1  ;;  %1780 = vmatmul.mubr.bf16.vlgmr.msra.gmra.mxu0 %v1609_v38  ;;  %1982 = vmatmul.mubr.bf16.vlgmr.msra.gmra.mxu1 %v1609_v38  ;;  %v1410_v50 = vadd.f32 %v7858_v24, %v1247_v41  ;;  %v915_v58 = vadd.f32 %v9174_v49, %v7824_v51  ;;  %v916_v15 = vadd.f32 %v9177_v26, %v7817_v10  ;;  %v9185_v59 = vld [vmem:[#allocation18_spill] sm:$0xff]  ;;  %v9187_v41 = vld [vmem:[#allocation11_spill] sm:$0xff] }
 0x20b   : > { %1597 = vst [vmem:[%s7863_s0 + $0x28] sm:$0xff] %v1577_v30  ;;  %v1578_v56 = vmax.f32 %v1558_v55, 0.0  ;;  %v1559_v47 = vadd.f32 %v1519_v35, %v1406_v7  ;;  %v1250_v40 = vadd.f32 %v9179_v28, %v1092_v8  ;;  %v1412_v5 = vadd.f32 %v7885_v23, %v1249_v21  ;;  %v9181_v7 = vld [vmem:[#allocation9_spill] sm:$0xff] }
 0x20c   : > { %v1523_v36 = vpop.f32.mrf.mxu1  ;;  %v1093_v11 = vadd.f32 %v9178_v3, %v915_v58  ;;  %v917_v34 = vadd.f32 %v9180_v6, %v7824_v51  ;;  %v9182_v55 = vld [vmem:[#allocation17_spill] sm:$0xff] }
 0x20d   : > { %1598 = vst [vmem:[%s7863_s0 + $0x30] sm:$0xff] %v1578_v56  ;;  %v1611_v46 = vpack.c.bf16 %v1578_v56, %v1576_v57  ;;  %v1579_v61 = vmax.f32 %v1559_v47, 0.0  ;;  %v1560_v22 = vadd.f32 %v1523_v36, %v1407_v60  ;;  %v1413_v42 = vadd.f32 %v7899_v37, %v1250_v40  ;;  %v9183_v47 = vld [vmem:[#allocation5_spill] sm:$0xff]  ;;  %v9186_v37 = vld [vmem:[#allocation7_spill] sm:$0xff] }
 0x20e   : > { %v1525_v4 = vpop.f32.mrf.mxu1  ;;  %v1251_v16 = vadd.f32 %v9182_v55, %v1093_v11  ;;  %v918_v27 = vadd.f32 %v9183_v47, %v7817_v10  ;;  %v1095_v44 = vadd.f32 %v9184_v39, %v917_v34  ;;  %v919_v2 = vadd.f32 %v9186_v37, %v7824_v51 }
 0x20f   : > { %1599 = vst [vmem:[%s7863_s0 + $0x38] sm:$0xff] %v1579_v61  ;;  %v1612_v14 = vpack.c.bf16 %v1579_v61, %v1577_v30  ;;  %v1561_v17 = vadd.f32 %v1525_v4, %v1408_v48  ;;  %v1580_v18 = vmax.f32 %v1560_v22, 0.0  ;;  %v1094_v30 = vadd.f32 %v9181_v7, %v916_v15  ;;  %v1394_v48 = vpop.f32.mrf.mxu0 }
 0x210   : > { %v1527_v32 = vpop.f32.mrf.mxu1  ;;  %v1096_v4 = vadd.f32 %v9187_v41, %v918_v27  ;;  %v1097_v43 = vadd.f32 %v9189_v29, %v919_v2 }
 0x211   : > { %v1562_v54 = vadd.f32 %v1527_v32, %v1409_v12  ;;  %1787 = vmatprep.mubr.bf16.mxu0 %v1612_v14  ;;  %1989 = vmatprep.mubr.bf16.mxu1 %v1612_v14  ;;  %v1581_v62 = vmax.f32 %v1561_v17, 0.0  ;;  %v1252_v60 = vadd.f32 %v9185_v59, %v1094_v30  ;;  %v9188_v12 = vld [vmem:[#allocation19_spill] sm:$0xff]  ;;  %v9190_v32 = vld [vmem:[#allocation20_spill] sm:$0xff]  ;;  %v1396_v20 = vpop.f32.mrf.mxu0 }
 0x212   : > { %v1529_v31 = vpop.f32.mrf.mxu1  ;;  %1788 = vmatmul.mubr.bf16.gmra.mxu0 %v1611_v46  ;;  %1990 = vmatmul.mubr.bf16.gmra.mxu1 %v1611_v46  ;;  %v1414_v46 = vadd.f32 %v1386_v63, %v1251_v16  ;;  %v1253_v14 = vadd.f32 %v9188_v12, %v1095_v44  ;;  %v1255_v8 = vadd.f32 %v9191_v1, %v1097_v43 }
 0x213   : > { %v1582_v24 = vmax.f32 %v1562_v54, 0.0  ;;  %v1563_v38 = vadd.f32 %v1529_v31, %v1410_v50  ;;  %v1415_v22 = vadd.f32 %v1390_v45, %v1252_v60  ;;  %v1254_v50 = vadd.f32 %v9190_v32, %v1096_v4 }
 0x214   : > { %v1533_v57 = vpop.f32.mrf.mxu1  ;;  %v1416_v51 = vadd.f32 %v1392_v33, %v1253_v14 }
 0x215   : > { %5784 = vst [vmem:[%s7863_s0 + $0x40] sm:$0xff] %v1582_v24  ;;  %v1613_v13 = vpack.c.bf16 %v1582_v24, %v1580_v18  ;;  %v1583_v19 = vmax.f32 %v1563_v38, 0.0  ;;  %v1564_v25 = vadd.f32 %v1533_v57, %v1411_v52  ;;  %v1417_v45 = vadd.f32 %v1394_v48, %v1254_v50 }
 0x216   : > { %v1535_v35 = vpop.f32.mrf.mxu1  ;;  %v1418_v38 = vadd.f32 %v1396_v20, %v1255_v8 }
 0x217   : > { %5785 = vst [vmem:[%s7863_s0 + $0x48] sm:$0xff] %v1583_v19  ;;  %v1584_v23 = vmax.f32 %v1564_v25, 0.0  ;;  %v1565_v0 = vadd.f32 %v1535_v35, %v1412_v5  ;;  %v1614_v56 = vpack.c.bf16 %v1583_v19, %v1581_v62  ;;  %v2032_v62 = vld [vmem:[%s9132_s8] sm:$0xff] }
 0x218   : > { %v1537_v36 = vpop.f32.mrf.mxu1 }
 0x219   : > { %5786 = vst [vmem:[%s7863_s0 + $0x50] sm:$0xff] %v1584_v23  ;;  %v1585_v61 = vmax.f32 %v1565_v0, 0.0  ;;  %v1566_v9 = vadd.f32 %v1537_v36, %v1413_v42  ;;  %1795 = vmatprep.mubr.bf16.mxu0 %v1614_v56  ;;  %1997 = vmatprep.mubr.bf16.mxu1 %v1614_v56 }
 0x21a   : > { %v1539_v10 = vpop.f32.mrf.mxu1  ;;  %1796 = vmatmul.mubr.bf16.gmra.mxu0 %v1613_v13  ;;  %1998 = vmatmul.mubr.bf16.gmra.mxu1 %v1613_v13  ;;  %v5863_v13 = vld [vmem:[%s9132_s8 + $0x30] sm:$0xff] }
 0x21b   : > { %5787 = vst [vmem:[%s7863_s0 + $0x58] sm:$0xff] %v1585_v61  ;;  %v1586_v63 = vmax.f32 %v1566_v9, 0.0  ;;  %v1567_v53 = vadd.f32 %v1539_v10, %v1414_v46 }
 0x21c   : > { %v1543_v17 = vpop.f32.mrf.mxu1 }
 0x21d   : > { %5788 = vst [vmem:[%s7863_s0 + $0x60] sm:$0xff] %v1586_v63  ;;  %v1615_v54 = vpack.c.bf16 %v1586_v63, %v1584_v23  ;;  %v1587_v49 = vmax.f32 %v1567_v53, 0.0  ;;  %v1568_v58 = vadd.f32 %v1543_v17, %v1415_v22 }
 0x21e   : > { %v1545_v21 = vpop.f32.mrf.mxu1 }
 0x21f   : > { %5789 = vst [vmem:[%s7863_s0 + $0x68] sm:$0xff] %v1587_v49  ;;  %v1616_v31 = vpack.c.bf16 %v1587_v49, %v1585_v61  ;;  %v1588_v52 = vmax.f32 %v1568_v58, 0.0  ;;  %v1569_v18 = vadd.f32 %v1545_v21, %v1416_v51 }
 0x220   : > { %v1547_v24 = vpop.f32.mrf.mxu1 }
 0x221   : > { %5790 = vst [vmem:[%s7863_s0 + $0x70] sm:$0xff] %v1588_v52  ;;  %v1589_v26 = vmax.f32 %v1569_v18, 0.0  ;;  %v1570_v15 = vadd.f32 %v1547_v24, %v1417_v45  ;;  %1803 = vmatprep.mubr.bf16.mxu0 %v1616_v31  ;;  %2005 = vmatprep.mubr.bf16.mxu1 %v1616_v31 }
 0x222   : > { %v1549_v3 = vpop.f32.mrf.mxu1  ;;  %1804 = vmatmul.mubr.bf16.gmra.mxu0 %v1615_v54  ;;  %2006 = vmatmul.mubr.bf16.gmra.mxu1 %v1615_v54 }
 0x223   : > { %5791 = vst [vmem:[%s7863_s0 + $0x78] sm:$0xff] %v1589_v26  ;;  %v1590_v11 = vmax.f32 %v1570_v15, 0.0  ;;  %v1571_v28 = vadd.f32 %v1549_v3, %v1418_v38 }
 0x225   : > { %v1617_v40 = vpack.c.bf16 %v1590_v11, %v1588_v52  ;;  %v1591_v5 = vmax.f32 %v1571_v28, 0.0 }
 0x227   : > { %v1618_v57 = vpack.c.bf16 %v1591_v5, %v1589_v26 }
 0x229   : > { %1811 = vmatprep.mubr.bf16.mxu0 %v1618_v57  ;;  %2013 = vmatprep.mubr.bf16.mxu1 %v1618_v57 }
 0x22a   : > { %1812 = vmatmul.mubr.bf16.gmra.mxu0 %v1617_v40  ;;  %2014 = vmatmul.mubr.bf16.gmra.mxu1 %v1617_v40 }
 0x22b   : > { %6733 = vmatprep.mubr.msk.f32.mxu0 %vm2038_vm6, %v2032_v62  ;;  %6762 = vmatprep.mubr.msk.f32.mxu1 %vm2038_vm6, %v5863_v13 }
 0x2ca   : > { %v7965_v19 = vpop.f32.mrf.mxu0  ;;  %v7967_v25 = vpop.f32.mrf.mxu1 }
 0x2cc   : > { %v7969_v6 = vpop.f32.mrf.mxu0  ;;  %v7971_v34 = vpop.f32.mrf.mxu1 }
 0x2ce   : > { %v7973_v7 = vpop.f32.mrf.mxu0  ;;  %v7975_v30 = vpop.f32.mrf.mxu1 }
 0x2d0   : > { %v7977_v55 = vpop.f32.mrf.mxu0  ;;  %v7979_v16 = vpop.f32.mrf.mxu1 }
 0x2d1   : > { %v6425_v62 = vadd.f32 %v7977_v55, %v7973_v7  ;;  %v6471_v13 = vadd.f32 %v7979_v16, %v7975_v30  ;;  %v6904_v55 = vld [vmem:[%s9192_s2 + $0x74] ss:$8 sps:$4 sm:$0xff]  }
 0x2d2   : > { %v7981_v33 = vpop.f32.mrf.mxu0  ;;  %v7983_v35 = vpop.f32.mrf.mxu1  ;;  %v6913_v16 = vld [vmem:[%s9192_s2 + $0xf4] ss:$8 sps:$4 sm:$0xff]  }
 0x2d3   : > { %v2023_v7 = vmax.f32 %v6425_v62, %v6471_v13  ;;  %v6952_v62 = vld [vmem:[%s9192_s2 + $0x164] ss:$8 sps:$4 sm:$0xff]  }
 0x2d4   : > { %v7985_v42 = vpop.f32.mrf.mxu0  ;;  %v7987_v23 = vpop.f32.mrf.mxu1 }
 0x2d5   : > { %v6428_v40 = vadd.f32 %v7985_v42, %v7981_v33  ;;  %v6474_v5 = vadd.f32 %v7987_v23, %v7983_v35  ;;  %v6422_v33 = vadd.f32 %v7969_v6, %v7965_v19  ;;  %v6468_v35 = vadd.f32 %v7971_v34, %v7967_v25  ;;  %v2033_v19 = vld [vmem:[%s9132_s8 + $0x8] sm:$0xff]  ;;  %v5864_v25 = vld [vmem:[%s9132_s8 + $0x38] sm:$0xff]  ;;  %v2034_v6 = vld [vmem:[%s9132_s8 + $0x10] sm:$0xff] }
 0x2d6   : > { %v6429_v0 = vpop.f32.mrf.mxu0  ;;  %v6475_v56 = vpop.f32.mrf.mxu1  ;;  %v5865_v34 = vld [vmem:[%s9132_s8 + $0x40] sm:$0xff]  ;;  %v6902_v23 = vld [vmem:[%s9192_s2 + $0x70] ss:$8 sps:$4 sm:$0xff]  }
 0x2d7   : > { %v2024_v42 = vmax.f32 %v6428_v40, %v6474_v5  ;;  %v2022_v30 = vmax.f32 %v6422_v33, %v6468_v35  ;;  %v6944_v40 = vld [vmem:[%s9192_s2 + $0x170] ss:$8 sps:$4 sm:$0xff]  }
 0x2d8   : > { %v6430_v47 = vpop.f32.mrf.mxu0  ;;  %v6476_v27 = vpop.f32.mrf.mxu1 }
 0x2d9   : > { %v6431_v3 = vadd.f32 %v6430_v47, %v6429_v0  ;;  %v6477_v11 = vadd.f32 %v6476_v27, %v6475_v56  ;;  %v6911_v56 = vld [vmem:[%s9192_s2 + $0xf0] ss:$8 sps:$4 sm:$0xff]   ;;  %v5866_v27 = vld [vmem:[%s9132_s8 + $0x48] sm:$0xff] }
 0x2da   : > { %v6432_v39 = vpop.f32.mrf.mxu0  ;;  %v6478_v44 = vpop.f32.mrf.mxu1  ;;  %v2035_v47 = vld [vmem:[%s9132_s8 + $0x18] sm:$0xff] }
 0x2db   : > { %v2025_v0 = vmax.f32 %v6431_v3, %v6477_v11 }
 0x2dc   : > { %v6433_v36 = vpop.f32.mrf.mxu0  ;;  %v6479_v59 = vpop.f32.mrf.mxu1 }
 0x2dd   : > { %v6434_v38 = vadd.f32 %v6433_v36, %v6432_v39  ;;  %v6480_v26 = vadd.f32 %v6479_v59, %v6478_v44  ;;  %v2036_v39 = vld [vmem:[%s9132_s8 + $0x20] sm:$0xff]  ;;  %v5867_v44 = vld [vmem:[%s9132_s8 + $0x50] sm:$0xff] }
 0x2de   : > { %v6435_v60 = vpop.f32.mrf.mxu0  ;;  %v6481_v46 = vpop.f32.mrf.mxu1  ;;  %v6907_v36 = vld [vmem:[%s9192_s2 + $0x64] ss:$8 sps:$4 sm:$0xff]  }
 0x2df   : > { %v2026_v57 = vmax.f32 %v6434_v38, %v6480_v26  ;;  %v6919_v59 = vld [vmem:[%s9192_s2 + $0xe4] ss:$8 sps:$4 sm:$0xff]  }
 0x2e0   : > { %v6436_v61 = vpop.f32.mrf.mxu0  ;;  %v6482_v9 = vpop.f32.mrf.mxu1 }
 0x2e1   : > { %v6437_v52 = vadd.f32 %v6436_v61, %v6435_v60  ;;  %v6483_v18 = vadd.f32 %v6482_v9, %v6481_v46  ;;  %v6905_v60 = vld [vmem:[%s9192_s2 + $0x60] ss:$8 sps:$4 sm:$0xff]   ;;  %v5868_v9 = vld [vmem:[%s9132_s8 + $0x58] sm:$0xff] }
 0x2e2   : > { %v6438_v37 = vpop.f32.mrf.mxu0  ;;  %v6484_v2 = vpop.f32.mrf.mxu1  ;;  %v6917_v46 = vld [vmem:[%s9192_s2 + $0xe0] ss:$8 sps:$4 sm:$0xff]  }
 0x2e3   : > { %v2027_v28 = vmax.f32 %v6437_v52, %v6483_v18  ;;  %v2037_v61 = vld [vmem:[%s9132_s8 + $0x28] sm:$0xff]  ;;  %v6961_v52 = vld [vmem:[%s9192_s2 + $0x1f4] ss:$8 sps:$4 sm:$0xff]  }
 0x2e4   : > { %v6439_v41 = vpop.f32.mrf.mxu0  ;;  %v6485_v4 = vpop.f32.mrf.mxu1 }
 0x2e5   : > { %v6440_v21 = vadd.f32 %v6439_v41, %v6438_v37  ;;  %v6486_v45 = vadd.f32 %v6485_v4, %v6484_v2  ;;  %v6910_v37 = vld [vmem:[%s9192_s2 + $0x54] ss:$8 sps:$4 sm:$0xff]   ;;  %v6908_v41 = vld [vmem:[%s9192_s2 + $0x50] ss:$8 sps:$4 sm:$0xff]  }
 0x2e6   : > { %v6441_v48 = vpop.f32.mrf.mxu0  ;;  %v6487_v10 = vpop.f32.mrf.mxu1  ;;  %v6925_v2 = vld [vmem:[%s9192_s2 + $0xd4] ss:$8 sps:$4 sm:$0xff]   ;;  %v6923_v4 = vld [vmem:[%s9192_s2 + $0xd0] ss:$8 sps:$4 sm:$0xff]  }
 0x2e7   : > { %v2028_v15 = vmax.f32 %v6440_v21, %v6486_v45  ;;  %v6947_v21 = vld [vmem:[%s9192_s2 + $0x90] ss:$8 sps:$4 sm:$0xff]   ;;  %v6953_v45 = vld [vmem:[%s9192_s2 + $0x80] ss:$8 sps:$4 sm:$0xff]  }
 0x2e8   : > { %v6442_v12 = vpop.f32.mrf.mxu0  ;;  %v6488_v14 = vpop.f32.mrf.mxu1 }
 0x2e9   : > { %v6443_v1 = vadd.f32 %v6442_v12, %v6441_v48  ;;  %v6489_v8 = vadd.f32 %v6488_v14, %v6487_v10  ;;  %v6916_v48 = vld [vmem:[%s9192_s2 + $0x44] ss:$8 sps:$4 sm:$0xff]   ;;  %v9193_v12 = vmov 0   ;;  %v6914_v14 = vld [vmem:[%s9192_s2 + $0x40] ss:$8 sps:$4 sm:$0xff]  }
 0x2ea   : > { %v6444_v22 = vpop.f32.mrf.mxu0  ;;  %v6490_v63 = vpop.f32.mrf.mxu1  ;;  %v6931_v10 = vld [vmem:[%s9192_s2 + $0xc4] ss:$8 sps:$4 sm:$0xff]  }
 0x2eb   : > { %v2029_v24 = vmax.f32 %v6443_v1, %v6489_v8  ;;  %v6941_v1 = vld [vmem:[%s9192_s2 + $0xa0] ss:$8 sps:$4 sm:$0xff]   ;;  %v6946_v8 = vld [vmem:[%s9192_s2 + $0x174] ss:$8 sps:$4 sm:$0xff]  }
 0x2ec   : > { %v6445_v53 = vpop.f32.mrf.mxu0  ;;  %v6491_v29 = vpop.f32.mrf.mxu1 }
 0x2ed   : > { %v6446_v51 = vadd.f32 %v6445_v53, %v6444_v22  ;;  %v6492_v54 = vadd.f32 %v6491_v29, %v6490_v63  ;;  %v6929_v22 = vld [vmem:[%s9192_s2 + $0xc0] ss:$8 sps:$4 sm:$0xff]   ;;  %v6922_v63 = vld [vmem:[%s9192_s2 + $0x34] ss:$8 sps:$4 sm:$0xff]   ;;  %v6920_v29 = vld [vmem:[%s9192_s2 + $0x30] ss:$8 sps:$4 sm:$0xff]  }
 0x2ee   : > { %v6447_v43 = vpop.f32.mrf.mxu0  ;;  %v6493_v32 = vpop.f32.mrf.mxu1  ;;  %v6937_v53 = vld [vmem:[%s9192_s2 + $0xb4] ss:$8 sps:$4 sm:$0xff]  }
 0x2ef   : > { %v2030_v31 = vmax.f32 %v6446_v51, %v6492_v54  ;;  %v6932_v51 = vld [vmem:[%s9192_s2 + $0x10] ss:$8 sps:$4 sm:$0xff]   ;;  %v6940_v54 = vld [vmem:[%s9192_s2 + $0x4] ss:$8 sps:$4 sm:$0xff]  }
 0x2f0   : > { %v6448_v50 = vpop.f32.mrf.mxu0  ;;  %v6494_v17 = vpop.f32.mrf.mxu1 }
 0x2f1   : > { %v6449_v49 = vadd.f32 %v6448_v50, %v6447_v43  ;;  %v6495_v58 = vadd.f32 %v6494_v17, %v6493_v32  ;;  %v6935_v43 = vld [vmem:[%s9192_s2 + $0xb0] ss:$8 sps:$4 sm:$0xff]   ;;  %v6928_v32 = vld [vmem:[%s9192_s2 + $0x24] ss:$8 sps:$4 sm:$0xff]   ;;  %v6926_v50 = vld [vmem:[%s9192_s2 + $0x20] ss:$8 sps:$4 sm:$0xff]  }
 0x2f2   : > { %v6934_v17 = vld [vmem:[%s9192_s2 + $0x14] ss:$8 sps:$4 sm:$0xff]  }
 0x2f3   : > { %v2031_v20 = vmax.f32 %v6449_v49, %v6495_v58  ;;  %v6938_v49 = vld [vmem:[%s9192_s2] ss:$8 sps:$4 sm:$0xff]   ;;  %v6943_v58 = vld [vmem:[%s9192_s2 + $0xa4] ss:$8 sps:$4 sm:$0xff]  }
 0x2f5   : > { %6713 = vmatprep.subr.msk.mxu0 %vm2057_vm7, %v2031_v20  ;;  %6742 = vmatprep.subr.msk.mxu1 %vm2057_vm7, %v2031_v20 }
 0x2f6   : > { %6714 = vmatpush3.msk.msra.mxu0 %vm2057_vm7, %v2031_v20  ;;  %6743 = vmatpush3.msk.msra.mxu1 %vm2057_vm7, %v2031_v20  ;;  %v6949_v20 = vld [vmem:[%s9192_s2 + $0x94] ss:$8 sps:$4 sm:$0xff]  }
 0x2f7   : > { %6715 = vmatprep.subr.mxu0 %v2030_v31  ;;  %6744 = vmatprep.subr.mxu1 %v2030_v31 }
 0x2f8   : > { %6716 = vmatpush3.msra.mxu0 %v2030_v31  ;;  %6745 = vmatpush3.msra.mxu1 %v2030_v31  ;;  %v6955_v31 = vld [vmem:[%s9192_s2 + $0x84] ss:$8 sps:$4 sm:$0xff]  }
 0x2f9   : > { %6717 = vmatprep.subr.mxu0 %v2029_v24  ;;  %6746 = vmatprep.subr.mxu1 %v2029_v24 }
 0x2fa   : > { %6718 = vmatpush3.msra.mxu0 %v2029_v24  ;;  %6747 = vmatpush3.msra.mxu1 %v2029_v24 }
 0x2fb   : > { %6719 = vmatprep.subr.mxu0 %v2028_v15  ;;  %6748 = vmatprep.subr.mxu1 %v2028_v15 }
 0x2fc   : > { %6720 = vmatpush3.msra.mxu0 %v2028_v15  ;;  %6749 = vmatpush3.msra.mxu1 %v2028_v15 }
 0x2fd   : > { %6721 = vmatprep.subr.mxu0 %v2027_v28  ;;  %6750 = vmatprep.subr.mxu1 %v2027_v28 }
 0x2fe   : > { %6722 = vmatpush3.msra.mxu0 %v2027_v28  ;;  %6751 = vmatpush3.msra.mxu1 %v2027_v28 }
 0x2ff   : > { %6723 = vmatprep.subr.mxu0 %v2026_v57  ;;  %6752 = vmatprep.subr.mxu1 %v2026_v57 }
 0x300   : > { %6724 = vmatpush3.msra.mxu0 %v2026_v57  ;;  %6753 = vmatpush3.msra.mxu1 %v2026_v57 }
 0x301   : > { %6725 = vmatprep.subr.mxu0 %v2025_v0  ;;  %6754 = vmatprep.subr.mxu1 %v2025_v0 }
 0x302   : > { %6726 = vmatpush3.msra.mxu0 %v2025_v0  ;;  %6755 = vmatpush3.msra.mxu1 %v2025_v0 }
 0x303   : > { %6727 = vmatprep.subr.mxu0 %v2024_v42  ;;  %6756 = vmatprep.subr.mxu1 %v2024_v42 }
 0x304   : > { %6728 = vmatpush3.msra.mxu0 %v2024_v42  ;;  %6757 = vmatpush3.msra.mxu1 %v2024_v42  ;;  %v6950_v42 = vld [vmem:[%s9192_s2 + $0x160] ss:$8 sps:$4 sm:$0xff]  }
 0x305   : > { %6729 = vmatprep.subr.mxu0 %v2023_v7  ;;  %6758 = vmatprep.subr.mxu1 %v2023_v7 }
 0x306   : > { %6730 = vmatpush3.msra.mxu0 %v2023_v7  ;;  %6759 = vmatpush3.msra.mxu1 %v2023_v7 }
 0x307   : > { %6731 = vmatprep.subr.mxu0 %v2022_v30  ;;  %6760 = vmatprep.subr.mxu1 %v2022_v30 }
 0x308   : > { %6732 = vmatpush3.msra.mxu0 %v2022_v30  ;;  %6761 = vmatpush3.msra.mxu1 %v2022_v30 }
 0x309   : > { %6734 = vmatmul.mubr.msk.f32.vlgmr.msra.gmra.mxu0 %vm2038_vm6, %v2033_v19  ;;  %6763 = vmatmul.mubr.msk.f32.vlgmr.msra.gmra.mxu1 %vm2038_vm6, %v5864_v25 }
 0x30a   : > { %6736 = vmatprep.mubr.msk.f32.mxu0 %vm2038_vm6, %v2034_v6  ;;  %6765 = vmatprep.mubr.msk.f32.mxu1 %vm2038_vm6, %v5865_v34  ;;  %v6958_v6 = vld [vmem:[%s9192_s2 + $0x154] ss:$8 sps:$4 sm:$0xff]  }
 0x30b   : > { %2393 = vmatprep.subr.bf16.mxu0 %v6904_v55  ;;  %2591 = vmatprep.subr.bf16.mxu1 %v6913_v16 }
 0x30c   : > { %2394 = vmatpush1.bf16.msra.mxu0 %v6902_v23  ;;  %2592 = vmatpush1.bf16.msra.mxu1 %v6911_v56 }
 0x30d   : > { %6737 = vmatmul.mubr.msk.f32.gmra.mxu0 %vm2038_vm6, %v2035_v47  ;;  %6766 = vmatmul.mubr.msk.f32.gmra.mxu1 %vm2038_vm6, %v5866_v27  ;;  %v6956_v27 = vld [vmem:[%s9192_s2 + $0x150] ss:$8 sps:$4 sm:$0xff]  }
 0x30e   : > { %6739 = vmatprep.mubr.msk.f32.mxu0 %vm2038_vm6, %v2036_v39  ;;  %6768 = vmatprep.mubr.msk.f32.mxu1 %vm2038_vm6, %v5867_v44  ;;  %v6959_v39 = vld [vmem:[%s9192_s2 + $0x1f0] ss:$8 sps:$4 sm:$0xff]  }
 0x30f   : > { %2395 = vmatprep.subr.bf16.mxu0 %v6907_v36  ;;  %2593 = vmatprep.subr.bf16.mxu1 %v6919_v59 }
 0x310   : > { %2396 = vmatpush1.bf16.msra.mxu0 %v6905_v60  ;;  %2594 = vmatpush1.bf16.msra.mxu1 %v6917_v46  ;;  %v6964_v60 = vld [vmem:[%s9192_s2 + $0x144] ss:$8 sps:$4 sm:$0xff]  }
 0x311   : > { %6740 = vmatmul.mubr.msk.f32.gmra.mxu0 %vm2038_vm6, %v2037_v61  ;;  %6769 = vmatmul.mubr.msk.f32.gmra.mxu1 %vm2038_vm6, %v5868_v9  ;;  %v6967_v46 = vld [vmem:[%s9192_s2 + $0x1e4] ss:$8 sps:$4 sm:$0xff]  }
 0x312   : > { %2397 = vmatprep.subr.bf16.mxu0 %v6910_v37  ;;  %2595 = vmatprep.subr.bf16.mxu1 %v6925_v2  ;;  %v6962_v2 = vld [vmem:[%s9192_s2 + $0x140] ss:$8 sps:$4 sm:$0xff]  }
 0x313   : > { %2425 = vmatprep.mubr.bf16.mxu0 %v9193_v12  ;;  %2623 = vmatprep.mubr.bf16.mxu1 %v9193_v12 }
 0x314   : > { %2398 = vmatpush1.bf16.msra.mxu0 %v6908_v41  ;;  %2596 = vmatpush1.bf16.msra.mxu1 %v6923_v4  ;;  %v6965_v41 = vld [vmem:[%s9192_s2 + $0x1e0] ss:$8 sps:$4 sm:$0xff]   ;;  %v6970_v4 = vld [vmem:[%s9192_s2 + $0x134] ss:$8 sps:$4 sm:$0xff]  }
 0x315   : > { %2399 = vmatprep.subr.bf16.mxu0 %v6916_v48  ;;  %2597 = vmatprep.subr.bf16.mxu1 %v6931_v10 }
 0x318   : > { %2400 = vmatpush1.bf16.msra.mxu0 %v6914_v14  ;;  %2598 = vmatpush1.bf16.msra.mxu1 %v6929_v22  ;;  %v6973_v14 = vld [vmem:[%s9192_s2 + $0x1d4] ss:$8 sps:$4 sm:$0xff]   ;;  %v6968_v22 = vld [vmem:[%s9192_s2 + $0x130] ss:$8 sps:$4 sm:$0xff]  }
 0x319   : > { %2401 = vmatprep.subr.bf16.mxu0 %v6922_v63  ;;  %2599 = vmatprep.subr.bf16.mxu1 %v6937_v53  ;;  %v6971_v63 = vld [vmem:[%s9192_s2 + $0x1d0] ss:$8 sps:$4 sm:$0xff]  }
 0x31c   : > { %2402 = vmatpush1.bf16.msra.mxu0 %v6920_v29  ;;  %2600 = vmatpush1.bf16.msra.mxu1 %v6935_v43  ;;  %v6976_v29 = vld [vmem:[%s9192_s2 + $0x124] ss:$8 sps:$4 sm:$0xff]  }
 0x31d   : > { %2403 = vmatprep.subr.bf16.mxu0 %v6928_v32  ;;  %2601 = vmatprep.subr.bf16.mxu1 %v6943_v58  ;;  %v6979_v43 = vld [vmem:[%s9192_s2 + $0x1c4] ss:$8 sps:$4 sm:$0xff]   ;;  %v6974_v32 = vld [vmem:[%s9192_s2 + $0x120] ss:$8 sps:$4 sm:$0xff]  }
 0x320   : > { %2404 = vmatpush1.bf16.msra.mxu0 %v6926_v50  ;;  %2602 = vmatpush1.bf16.msra.mxu1 %v6941_v1  ;;  %v6977_v50 = vld [vmem:[%s9192_s2 + $0x1c0] ss:$8 sps:$4 sm:$0xff]   ;;  %v6983_v1 = vld [vmem:[%s9192_s2 + $0x1b0] ss:$8 sps:$4 sm:$0xff]  }
 0x321   : > { %2405 = vmatprep.subr.bf16.mxu0 %v6934_v17  ;;  %2603 = vmatprep.subr.bf16.mxu1 %v6949_v20  ;;  %v6982_v17 = vld [vmem:[%s9192_s2 + $0x114] ss:$8 sps:$4 sm:$0xff]   ;;  %v6991_v20 = vld [vmem:[%s9192_s2 + $0x1a4] ss:$8 sps:$4 sm:$0xff]  }
 0x324   : > { %2406 = vmatpush1.bf16.msra.mxu0 %v6932_v51  ;;  %2604 = vmatpush1.bf16.msra.mxu1 %v6947_v21  ;;  %v6985_v51 = vld [vmem:[%s9192_s2 + $0x1b4] ss:$8 sps:$4 sm:$0xff]   ;;  %v6986_v21 = vld [vmem:[%s9192_s2 + $0x100] ss:$8 sps:$4 sm:$0xff]  }
 0x325   : > { %2407 = vmatprep.subr.bf16.mxu0 %v6940_v54  ;;  %2605 = vmatprep.subr.bf16.mxu1 %v6955_v31  ;;  %v6994_v31 = vld [vmem:[%s9192_s2 + $0x274] ss:$8 sps:$4 sm:$0xff]  }
 0x328   : > { %2408 = vmatpush1.bf16.msra.mxu0 %v6938_v49  ;;  %2606 = vmatpush1.bf16.msra.mxu1 %v6953_v45  ;;  %v6980_v49 = vld [vmem:[%s9192_s2 + $0x110] ss:$8 sps:$4 sm:$0xff]   ;;  %v6989_v45 = vld [vmem:[%s9192_s2 + $0x1a0] ss:$8 sps:$4 sm:$0xff]  }
 0x329   : > { %2774 = vmatprep.subr.bf16.mxu0 %v6946_v8  ;;  %2960 = vmatprep.subr.bf16.mxu1 %v6961_v52  ;;  %v6988_v8 = vld [vmem:[%s9192_s2 + $0x104] ss:$8 sps:$4 sm:$0xff]  }
 0x3c9   : > { %v6735_v18 = vpop.f32.mrf.mxu0  ;;  %v6764_v24 = vpop.f32.mrf.mxu1 }
 0x3ca   : > { %v2277_v15 = vmax.f32 %v6735_v18, %v6764_v24  ;;  %v6997_v18 = vld [vmem:[%s9192_s2 + $0x194] ss:$8 sps:$4 sm:$0xff]  }
 0x3cb   : > { %v2127_v38 = vpop.f32.mrf.mxu0  ;;  %v2247_v26 = vpop.f32.mrf.mxu1 }
 0x3cc   : > { %v2276_v3 = vmax.f32 %v2127_v38, %v2247_v26  ;;  %v6992_v38 = vld [vmem:[%s9192_s2 + $0x270] ss:$8 sps:$4 sm:$0xff]  }
 0x3cd   : > { %v6738_v11 = vpop.f32.mrf.mxu0  ;;  %v6767_v28 = vpop.f32.mrf.mxu1  ;;  %v6995_v26 = vld [vmem:[%s9192_s2 + $0x190] ss:$8 sps:$4 sm:$0xff]  }
 0x3ce   : > { %v8152_v5 = vpack.c.bf16 %v2277_v15, %v2276_v3  ;;  %v2279_v57 = vmax.f32 %v6738_v11, %v6767_v28  ;;  %v7000_v15 = vld [vmem:[%s9192_s2 + $0x264] ss:$8 sps:$4 sm:$0xff]  }
 0x3cf   : > { %v2137_v13 = vpop.f32.mrf.mxu0  ;;  %v2257_v0 = vpop.f32.mrf.mxu1  ;;  %v7003_v11 = vld [vmem:[%s9192_s2 + $0x184] ss:$8 sps:$4 sm:$0xff]  }
 0x3d0   : > { %v2278_v33 = vmax.f32 %v2137_v13, %v2257_v0  ;;  %2426 = vmatmul.mubr.bf16.vlgmr.msra.gmra.mxu0 %v8152_v5  ;;  %v2488_v35 = vshll.u32 %v8152_v5, 16  ;;  %v2486_v56 = vshrl.u32 %v8152_v5, 16  ;;  %v2686_v24 = vrot.slane %v8152_v5, 1  ;;  %v7006_v13 = vld [vmem:[%s9192_s2 + $0x254] ss:$8 sps:$4 sm:$0xff]  }
 0x3d1   : > { %2775 = vmatpush1.bf16.msra.mxu0 %v6944_v40  ;;  %v6741_v7 = vpop.f32.mrf.mxu0  ;;  %v6770_v30 = vpop.f32.mrf.mxu1  ;;  %2435 = vmatprep.mubr.bf16.mxu0 %v9193_v12 }
 0x3d2   : > { %v8163_v19 = vpack.c.bf16 %v2279_v57, %v2278_v33  ;;  %2776 = vmatprep.subr.bf16.mxu0 %v6952_v62  ;;  %v2281_v25 = vmax.f32 %v6741_v7, %v6770_v30  ;;  %v2490_v34 = vrot.slane %v2488_v35, 1  ;;  %v6998_v57 = vld [vmem:[%s9192_s2 + $0x260] ss:$8 sps:$4 sm:$0xff]   ;;  %v2866_v0 = vrot.slane %v2486_v56, 1  ;;  %v7004_v30 = vld [vmem:[%s9192_s2 + $0x250] ss:$8 sps:$4 sm:$0xff]  }
 0x3d3   : > { %v2147_v55 = vpop.f32.mrf.mxu0  ;;  %v2267_v16 = vpop.f32.mrf.mxu1  ;;  %v7001_v62 = vld [vmem:[%s9192_s2 + $0x180] ss:$8 sps:$4 sm:$0xff]   ;;  %v2867_v33 = vrot.slane %v2488_v35, 2 }
 0x3d4   : > { %v2280_v23 = vmax.f32 %v2147_v55, %v2267_v16  ;;  %v2493_v47 = vshll.u32 %v8163_v19, 16  ;;  %v2491_v36 = vor.u32 %v2490_v34, %v2486_v56  ;;  %v2497_v9 = vshrl.u32 %v8163_v19, 16  ;;  %v7012_v56 = vld [vmem:[%s9192_s2 + $0x234] ss:$8 sps:$4 sm:$0xff]  }
 0x3d5   : > { %2777 = vmatpush1.bf16.msra.mxu0 %v6950_v42  ;;  %v2687_v52 = vrot.slane %v8163_v19, 1 }
 0x3d6   : > { %2778 = vmatprep.subr.bf16.mxu0 %v6958_v6  ;;  %v8178_v44 = vpack.c.bf16 %v2281_v25, %v2280_v23  ;;  %v2495_v59 = vrot.slane %v2493_v47, 1  ;;  %v2869_v28 = vrot.slane %v2497_v9, 1  ;;  %v2870_v40 = vrot.slane %v2493_v47, 2  ;;  %v7009_v6 = vld [vmem:[%s9192_s2 + $0x244] ss:$8 sps:$4 sm:$0xff]  }
 0x3d7   : > { %v2688_v3 = vsel %vm1108_vm4, %v2686_v24, %v2687_v52  ;;  %v2868_v25 = vor.u32 %v2867_v33, %v2866_v0  ;;  %v7007_v23 = vld [vmem:[%s9192_s2 + $0x240] ss:$8 sps:$4 sm:$0xff]  }
 0x3d8   : > { %v2496_v61 = vsel %vm925_vm3, %v2491_v36, %v2495_v59  ;;  %2436 = vmatmul.mubr.bf16.gmra.mxu0 %v8163_v19  ;;  %v2501_v37 = vshll.u32 %v8178_v44, 16  ;;  %v2499_v48 = vor.u32 %v2497_v9, %v2495_v59  ;;  %v2505_v54 = vshrl.u32 %v8178_v44, 16  ;;  %v7013_v59 = vld [vmem:[%s9192_s2 + $0x220] ss:$8 sps:$4 sm:$0xff]  }
 0x3d9   : > { %2779 = vmatpush1.bf16.msra.mxu0 %v6956_v27  ;;  %2624 = vmatmul.mubr.bf16.vlgmr.msra.gmra.mxu1 %v2496_v61  ;;  %v2689_v42 = vrot.slane %v8178_v44, 1  ;;  %v2871_v7 = vor.u32 %v2870_v40, %v2869_v28  ;;  %v7010_v27 = vld [vmem:[%s9192_s2 + $0x230] ss:$8 sps:$4 sm:$0xff]   ;;  %v7021_v61 = vld [vmem:[%s9192_s2 + $0x204] ss:$8 sps:$4 sm:$0xff]  }
 0x3da   : > { %2961 = vmatpush1.bf16.msra.mxu1 %v6959_v39  ;;  %2780 = vmatprep.subr.bf16.mxu0 %v6964_v60  ;;  %v2503_v10 = vrot.slane %v2501_v37, 1  ;;  %v2873_v55 = vrot.slane %v2505_v54, 1  ;;  %v2874_v16 = vrot.slane %v2501_v37, 2  ;;  %v7015_v39 = vld [vmem:[%s9192_s2 + $0x224] ss:$8 sps:$4 sm:$0xff]   ;;  %v3053_v37 = vrot.slane %v8163_v19, 2 }
 0x3db   : > { %2962 = vmatprep.subr.bf16.mxu1 %v6967_v46  ;;  %2633 = vmatprep.mubr.bf16.mxu1 %v9193_v12  ;;  %v2690_v34 = vsel %vm1108_vm4, %v2687_v52, %v2689_v42  ;;  %v2872_v35 = vsel %vm1261_vm5, %v2868_v25, %v2871_v7  ;;  %v7018_v60 = vld [vmem:[%s9192_s2 + $0x214] ss:$8 sps:$4 sm:$0xff]   ;;  %v7016_v46 = vld [vmem:[%s9192_s2 + $0x210] ss:$8 sps:$4 sm:$0xff]   ;;  %v7019_v9 = vld [vmem:[%s9192_s2 + $0x200] ss:$8 sps:$4 sm:$0xff]  }
 0x3dc   : > { %2445 = vmatprep.mubr.bf16.mxu0 %v9193_v12  ;;  %v2504_v53 = vsel %vm925_vm3, %v2499_v48, %v2503_v10  ;;  %v2507_v58 = vor.u32 %v2505_v54, %v2503_v10  ;;  %v2875_v47 = vor.u32 %v2874_v16, %v2873_v55  ;;  %v7022_v19 = vld [vmem:[%s9136_s12 + $0x78] sm:$0xff]   ;;  %v7036_v54 = vld [vmem:[%s9136_s12 + $0x20] sm:$0xff]   ;;  %v7045_v52 = vld [vmem:[%s9136_s12 + $0x90] sm:$0xff]   ;;  %s6385_s2 = sshll.u32 %s9199_s26, 4 }
 0x3dd   : > { %2781 = vmatpush1.bf16.msra.mxu0 %v6962_v2  ;;  %v3052_v2 = vrot.slane %v8152_v5, 2  ;;  %v7023_v5 = vld [vmem:[%s9136_s12 + $0xf8] sm:$0xff]   ;;  %v7047_v24 = vld [vmem:[%s9136_s12 + $0xc8] sm:$0xff]   ;;  %v7053_v28 = vld [vmem:[%s9136_s12 + $0x80] sm:$0xff]   ;;  %s9095_s29 = scalar_lea.vmem %s9140_s16, %s6385_s2 }
 0x3de   : > { %2963 = vmatpush1.bf16.msra.mxu1 %v6965_v41  ;;  %2782 = vmatprep.subr.bf16.mxu0 %v6970_v4  ;;  %v2876_v36 = vsel %vm1261_vm5, %v2871_v7, %v2875_v47  ;;  %v3055_v4 = vrot.slane %v8178_v44, 2  ;;  %v7024_v10 = vld [vmem:[%s9136_s12 + $0x38] sm:$0xff]  }
 0x3df   : > { %2964 = vmatprep.subr.bf16.mxu1 %v6973_v14  ;;  %v3054_v41 = vsel %vm1424_vm2, %v3052_v2, %v3053_v37  ;;  %v7026_v14 = vld [vmem:[%s9136_s12 + $0x70] sm:$0xff]  }
 0x3e0   : > { %2446 = vmatmul.mubr.bf16.gmra.mxu0 %v8178_v44  ;;  %v3056_v48 = vsel %vm1424_vm2, %v3053_v37, %v3055_v4  ;;  %v7025_v44 = vld [vmem:[%s9136_s12 + $0xb8] sm:$0xff]  }
 0x3e1   : > { %2783 = vmatpush1.bf16.msra.mxu0 %v6968_v22  ;;  %2634 = vmatmul.mubr.bf16.gmra.mxu1 %v2504_v53  ;;  %v7027_v22 = vld [vmem:[%s9136_s12 + $0xf0] sm:$0xff]  }
 0x3e2   : > { %2965 = vmatpush1.bf16.msra.mxu1 %v6971_v63  ;;  %2784 = vmatprep.subr.bf16.mxu0 %v6976_v29  ;;  %v7028_v63 = vld [vmem:[%s9136_s12 + $0x30] sm:$0xff]   ;;  %v7030_v29 = vld [vmem:[%s9136_s12 + $0x68] sm:$0xff]  }
 0x3e3   : > { %2966 = vmatprep.subr.bf16.mxu1 %v6979_v43  ;;  %2643 = vmatprep.mubr.bf16.mxu1 %v9193_v12  ;;  %v7029_v53 = vld [vmem:[%s9136_s12 + $0xb0] sm:$0xff]   ;;  %v7031_v43 = vld [vmem:[%s9136_s12 + $0xe8] sm:$0xff]  }
 0x3e4   : > { %2806 = vmatprep.mubr.bf16.mxu0 %v9193_v12 }
 0x3e5   : > { %2785 = vmatpush1.bf16.msra.mxu0 %v6974_v32  ;;  %v7032_v32 = vld [vmem:[%s9136_s12 + $0x28] sm:$0xff]  }
 0x3e6   : > { %2967 = vmatpush1.bf16.msra.mxu1 %v6977_v50  ;;  %2786 = vmatprep.subr.bf16.mxu0 %v6982_v17  ;;  %v7033_v50 = vld [vmem:[%s9136_s12 + $0xa8] sm:$0xff]   ;;  %v7034_v17 = vld [vmem:[%s9136_s12 + $0x60] sm:$0xff]  }
 0x3e7   : > { %2968 = vmatprep.subr.bf16.mxu1 %v6985_v51  ;;  %v7035_v51 = vld [vmem:[%s9136_s12 + $0xe0] sm:$0xff]  }
 0x3e9   : > { %2787 = vmatpush1.bf16.msra.mxu0 %v6980_v49  ;;  %2644 = vmatmul.mubr.bf16.gmra.mxu1 %v2507_v58  ;;  %v7037_v49 = vld [vmem:[%s9136_s12 + $0xa0] sm:$0xff]   ;;  %v7038_v58 = vld [vmem:[%s9136_s12 + $0x58] sm:$0xff]  }
 0x3ea   : > { %2969 = vmatpush1.bf16.msra.mxu1 %v6983_v1  ;;  %2788 = vmatprep.subr.bf16.mxu0 %v6988_v8  ;;  %v7039_v1 = vld [vmem:[%s9136_s12 + $0xd8] sm:$0xff]  }
 0x3eb   : > { %2970 = vmatprep.subr.bf16.mxu1 %v6991_v20  ;;  %2992 = vmatprep.mubr.bf16.mxu1 %v9193_v12  ;;  %v7040_v8 = vld [vmem:[%s9136_s12 + $0x18] sm:$0xff]  }
 0x3ec   : > { %v7041_v20 = vld [vmem:[%s9136_s12 + $0x98] sm:$0xff]  }
 0x3ed   : > { %2789 = vmatpush1.bf16.msra.mxu0 %v6986_v21  ;;  %v7042_v21 = vld [vmem:[%s9136_s12 + $0x50] sm:$0xff]  }
 0x3ee   : > { %2971 = vmatpush1.bf16.msra.mxu1 %v6989_v45  ;;  %3140 = vmatprep.subr.bf16.mxu0 %v6994_v31  ;;  %v7043_v45 = vld [vmem:[%s9136_s12 + $0xd0] sm:$0xff]  }
 0x3ef   : > { %2972 = vmatprep.subr.bf16.mxu1 %v6997_v18  ;;  %v7044_v31 = vld [vmem:[%s9136_s12 + $0x10] sm:$0xff]   ;;  %v7046_v18 = vld [vmem:[%s9136_s12 + $0x48] sm:$0xff]  }
 0x3f0   : > { %2807 = vmatmul.mubr.bf16.vlgmr.msra.gmra.mxu0 %v2688_v3  ;;  %v7051_v3 = vld [vmem:[%s9136_s12 + $0xc0] sm:$0xff]  }
 0x3f1   : > { %3141 = vmatpush1.bf16.msra.mxu0 %v6992_v38  ;;  %2816 = vmatprep.mubr.bf16.mxu0 %v9193_v12  ;;  %v7048_v38 = vld [vmem:[%s9136_s12 + $0x8] sm:$0xff]  }
 0x3f2   : > { %2973 = vmatpush1.bf16.msra.mxu1 %v6995_v26  ;;  %3142 = vmatprep.subr.bf16.mxu0 %v7000_v15  ;;  %v7049_v26 = vld [vmem:[%s9136_s12 + $0x88] sm:$0xff]   ;;  %v7050_v15 = vld [vmem:[%s9136_s12 + $0x40] sm:$0xff]  }
 0x3f3   : > { %2974 = vmatprep.subr.bf16.mxu1 %v7003_v11  ;;  %v7052_v11 = vld [vmem:[%s9136_s12] sm:$0xff]  }
 0x3f5   : > { %3143 = vmatpush1.bf16.msra.mxu0 %v6998_v57 }
 0x3f6   : > { %2975 = vmatpush1.bf16.msra.mxu1 %v7001_v62  ;;  %3144 = vmatprep.subr.bf16.mxu0 %v7006_v13 }
 0x3f7   : > { %6528 = vmatprep.subr.bf16.mxu1 %v7022_v19 }
 0x3f8   : > { %2817 = vmatmul.mubr.bf16.gmra.mxu0 %v2690_v34 }
 0x3f9   : > { %2993 = vmatmul.mubr.bf16.vlgmr.msra.gmra.mxu1 %v2872_v35  ;;  %3145 = vmatpush1.bf16.msra.mxu0 %v7004_v30 }
 0x3fa   : > { %3146 = vmatprep.subr.bf16.mxu0 %v7009_v6  ;;  %2826 = vmatprep.mubr.bf16.mxu0 %v9193_v12 }
 0x3fb   : > { %3002 = vmatprep.mubr.bf16.mxu1 %v9193_v12  ;;  %6529 = vmatpush3.bf16.msra.mxu1 %v7024_v10 }
 0x3fc   : > { %6530 = vmatprep.subr.bf16.mxu1 %v7026_v14  ;;  %v2282_v14 = vld [vmem:[%s9129_s5] sm:$0x3] }
 0x3fd   : > { %3147 = vmatpush1.bf16.msra.mxu0 %v7007_v23 }
 0x3fe   : > { %3148 = vmatprep.subr.bf16.mxu0 %v7012_v56 }
 0x3ff   : > { %6531 = vmatpush3.bf16.msra.mxu1 %v7028_v63 }
 0x400   : > { %2827 = vmatmul.mubr.bf16.gmra.mxu0 %v2689_v42  ;;  %6532 = vmatprep.subr.bf16.mxu1 %v7030_v29 }
 0x401   : > { %3003 = vmatmul.mubr.bf16.gmra.mxu1 %v2876_v36  ;;  %3149 = vmatpush1.bf16.msra.mxu0 %v7010_v27 }
 0x402   : > { %3150 = vmatprep.subr.bf16.mxu0 %v7015_v39  ;;  %3012 = vmatprep.mubr.bf16.mxu1 %v9193_v12 }
 0x403   : > { %3172 = vmatprep.mubr.bf16.mxu0 %v9193_v12  ;;  %6533 = vmatpush3.bf16.msra.mxu1 %v7032_v32 }
 0x404   : > { %6534 = vmatprep.subr.bf16.mxu1 %v7034_v17 }
 0x405   : > { %3151 = vmatpush1.bf16.msra.mxu0 %v7013_v59 }
 0x406   : > { %3152 = vmatprep.subr.bf16.mxu0 %v7018_v60 }
 0x407   : > { %6535 = vmatpush3.bf16.msra.mxu1 %v7036_v54 }
 0x408   : > { %6536 = vmatprep.subr.bf16.mxu1 %v7038_v58 }
 0x409   : > { %3013 = vmatmul.mubr.bf16.gmra.mxu1 %v2875_v47  ;;  %3153 = vmatpush1.bf16.msra.mxu0 %v7016_v46 }
 0x40a   : > { %3154 = vmatprep.subr.bf16.mxu0 %v7021_v61 }
 0x40b   : > { %6537 = vmatpush3.bf16.msra.mxu1 %v7040_v8 }
 0x40c   : > { %6538 = vmatprep.subr.bf16.mxu1 %v7042_v21 }
 0x40d   : > { %3155 = vmatpush1.bf16.msra.mxu0 %v7019_v9 }
 0x40e   : > { %6562 = vmatprep.subr.bf16.mxu0 %v7023_v5 }
 0x40f   : > { %6539 = vmatpush3.bf16.msra.mxu1 %v7044_v31 }
 0x410   : > { %3173 = vmatmul.mubr.bf16.vlgmr.msra.gmra.mxu0 %v3054_v41  ;;  %6540 = vmatprep.subr.bf16.mxu1 %v7046_v18 }
 0x411   : > { %3182 = vmatprep.mubr.bf16.mxu0 %v9193_v12  ;;  %6563 = vmatpush3.bf16.msra.mxu0 %v7025_v44 }
 0x412   : > { %6564 = vmatprep.subr.bf16.mxu0 %v7027_v22 }
 0x413   : > { %6541 = vmatpush3.bf16.msra.mxu1 %v7048_v38 }
 0x414   : > { %6542 = vmatprep.subr.bf16.mxu1 %v7050_v15 }
 0x415   : > { %6565 = vmatpush3.bf16.msra.mxu0 %v7029_v53  ;;  %v9194_v53 = vld [vmem:[#allocation13_spill] sm:$0xff] }
 0x416   : > { %6566 = vmatprep.subr.bf16.mxu0 %v7031_v43  ;;  %v2287_v29 = vrot.slane %v2282_v14, %v9194_v53 }
 0x417   : > { %6543 = vmatpush3.bf16.msra.mxu1 %v7052_v11 }
 0x418   : > { %3183 = vmatmul.mubr.bf16.gmra.mxu0 %v3056_v48 }
 0x419   : > { %3192 = vmatprep.mubr.bf16.mxu0 %v9193_v12  ;;  %6567 = vmatpush3.bf16.msra.mxu0 %v7033_v50  ;;  %v9195_v50 = vld [vmem:[#allocation15_spill] sm:$0xff] }
 0x41a   : > { %6568 = vmatprep.subr.bf16.mxu0 %v7035_v51  ;;  %v8492_v17 = vrot.slane %v2282_v14, %v9195_v50 }
 0x41d   : > { %6569 = vmatpush3.bf16.msra.mxu0 %v7037_v49 }
 0x41e   : > { %6570 = vmatprep.subr.bf16.mxu0 %v7039_v1 }
 0x420   : > { %3193 = vmatmul.mubr.bf16.gmra.mxu0 %v3055_v4 }
 0x421   : > { %6571 = vmatpush3.bf16.msra.mxu0 %v7041_v20 }
 0x422   : > { %6572 = vmatprep.subr.bf16.mxu0 %v7043_v45 }
 0x425   : > { %6573 = vmatpush3.bf16.msra.mxu0 %v7045_v52 }
 0x426   : > { %6574 = vmatprep.subr.bf16.mxu0 %v7047_v24 }
 0x429   : > { %6575 = vmatpush3.bf16.msra.mxu0 %v7049_v26 }
 0x42a   : > { %6576 = vmatprep.subr.bf16.mxu0 %v7051_v3 }
 0x42d   : > { %6577 = vmatpush3.bf16.msra.mxu0 %v7053_v28 }
 0x490   : > { %v2427_v40 = vpop.f32.mrf.mxu0 }
 0x491   : > { %v2456_v51 = vadd.f32 %v2427_v40, %v2287_v29 }
 0x492   : > { %v2429_v57 = vpop.f32.mrf.mxu0 }
 0x493   : > { %v2457_v58 = vadd.f32 %v2429_v57, %v8492_v17 }
 0x494   : > { %v2431_v62 = vpop.f32.mrf.mxu0 }
 0x495   : > { %v2458_v8 = vadd.f32 %v2431_v62, %v2287_v29 }
 0x496   : > { %v2433_v13 = vpop.f32.mrf.mxu0 }
 0x497   : > { %v2459_v52 = vadd.f32 %v2433_v13, %v8492_v17 }
 0x498   : > { %v8445_v0 = vpop.f32.mrf.mxu0 }
 0x499   : > { %v2625_v33 = vpop.f32.mrf.mxu1 }
 0x49a   : > { %v8447_v42 = vpop.f32.mrf.mxu0  ;;  %v2654_v1 = vadd.f32 %v2625_v33, %v2456_v51 }
 0x49b   : > { %v2627_v7 = vpop.f32.mrf.mxu1 }
 0x49c   : > { %v8449_v30 = vpop.f32.mrf.mxu0  ;;  %v2655_v20 = vadd.f32 %v2627_v7, %v2457_v58 }
 0x49d   : > { %v2629_v25 = vpop.f32.mrf.mxu1 }
 0x49e   : > { %v8451_v6 = vpop.f32.mrf.mxu0  ;;  %v2656_v18 = vadd.f32 %v2629_v25, %v2458_v8  ;;  %v2460_v25 = vadd.f32 %v8445_v0, %v2287_v29 }
 0x49f   : > { %v2631_v34 = vpop.f32.mrf.mxu1 }
 0x4a0   : > { %v8455_v35 = vpop.f32.mrf.mxu0  ;;  %v2657_v15 = vadd.f32 %v2631_v34, %v2459_v52  ;;  %v2461_v34 = vadd.f32 %v8447_v42, %v8492_v17 }
 0x4a1   : > { %v8453_v55 = vpop.f32.mrf.mxu1 }
 0x4a2   : > { %v8461_v56 = vpop.f32.mrf.mxu0 }
 0x4a3   : > { %v8457_v16 = vpop.f32.mrf.mxu1 }
 0x4a4   : > { %v8465_v27 = vpop.f32.mrf.mxu0  ;;  %v2659_v0 = vadd.f32 %v8457_v16, %v2461_v34 }
 0x4a5   : > { %v8459_v23 = vpop.f32.mrf.mxu1  ;;  %v2466_v16 = vadd.f32 %v8465_v27, %v2287_v29 }
 0x4a6   : > { %v8469_v36 = vpop.f32.mrf.mxu0 }
 0x4a7   : > { %v8463_v47 = vpop.f32.mrf.mxu1 }
 0x4a9   : > { %v8467_v39 = vpop.f32.mrf.mxu1 }
 0x4ab   : > { %v8471_v59 = vpop.f32.mrf.mxu1 }
 0x4ad   : > { %v8473_v61 = vpop.f32.mrf.mxu1 }
 0x4af   : > { %v8475_v2 = vpop.f32.mrf.mxu1 }
 0x4b0   : > { %v2808_v60 = vpop.f32.mrf.mxu0 }
 0x4b1   : > { %v2837_v21 = vadd.f32 %v2808_v60, %v2654_v1 }
 0x4b2   : > { %v2810_v46 = vpop.f32.mrf.mxu0 }
 0x4b3   : > { %v2838_v24 = vadd.f32 %v2810_v46, %v2655_v20  ;;  %v2462_v46 = vadd.f32 %v8449_v30, %v2287_v29  ;;  %v2658_v30 = vadd.f32 %v8453_v55, %v2460_v25 }
 0x4b4   : > { %v2812_v9 = vpop.f32.mrf.mxu0 }
 0x4b5   : > { %v2839_v3 = vadd.f32 %v2812_v9, %v2656_v18  ;;  %v2660_v58 = vadd.f32 %v8459_v23, %v2462_v46 }
 0x4b6   : > { %v2814_v37 = vpop.f32.mrf.mxu0 }
 0x4b7   : > { %v2840_v62 = vadd.f32 %v2814_v37, %v2657_v15  ;;  %v2463_v37 = vadd.f32 %v8451_v6, %v8492_v17 }
 0x4b8   : > { %v8477_v41 = vpop.f32.mrf.mxu0 }
 0x4b9   : > { %v2994_v4 = vpop.f32.mrf.mxu1  ;;  %v2661_v8 = vadd.f32 %v8463_v47, %v2463_v37  ;;  %v2841_v52 = vadd.f32 %v8477_v41, %v2658_v30  ;;  %v2467_v41 = vadd.f32 %v8469_v36, %v8492_v17  ;;  %v7056_v30 = vld [vmem:[%s9127_s3 + $0x74] ss:$8 sps:$4 sm:$0xff]  }
 0x4ba   : > { %v2820_v48 = vpop.f32.mrf.mxu0  ;;  %v3023_v38 = vadd.f32 %v2994_v4, %v2837_v21  ;;  %3940 = vmatprep.subr.bf16.mxu0 %v7056_v30  ;;  %v7069_v30 = vld [vmem:[%s9127_s3 + $0xe0] ss:$8 sps:$4 sm:$0xff]  }
 0x4bb   : > { %v2996_v19 = vpop.f32.mrf.mxu1  ;;  %v2842_v20 = vadd.f32 %v2820_v48, %v2659_v0 }
 0x4bc   : > { %v2822_v5 = vpop.f32.mrf.mxu0  ;;  %v3024_v11 = vadd.f32 %v2996_v19, %v2838_v24 }
 0x4bd   : > { %v2998_v10 = vpop.f32.mrf.mxu1  ;;  %v2843_v21 = vadd.f32 %v2822_v5, %v2660_v58 }
 0x4be   : > { %v8479_v44 = vpop.f32.mrf.mxu0  ;;  %v3025_v33 = vadd.f32 %v2998_v10, %v2839_v3  ;;  %v2464_v10 = vadd.f32 %v8455_v35, %v2287_v29  ;;  %v2465_v35 = vadd.f32 %v8461_v56, %v8492_v17 }
 0x4bf   : > { %v3000_v22 = vpop.f32.mrf.mxu1  ;;  %v2844_v55 = vadd.f32 %v8479_v44, %v2661_v8  ;;  %v2664_v44 = vadd.f32 %v8473_v61, %v2466_v16  ;;  %v7057_v8 = vld [vmem:[%s9127_s3 + $0x60] ss:$8 sps:$4 sm:$0xff]   ;;  %v7074_v16 = vld [vmem:[%s9127_s3 + $0x34] ss:$8 sps:$4 sm:$0xff]  }
 0x4c0   : > { %v8484_v63 = vpop.f32.mrf.mxu0  ;;  %v3026_v9 = vadd.f32 %v3000_v22, %v2840_v62  ;;  %v2662_v23 = vadd.f32 %v8467_v39, %v2464_v10  ;;  %v2663_v48 = vadd.f32 %v8471_v59, %v2465_v35  ;;  %v7066_v35 = vld [vmem:[%s9127_s3 + $0x40] ss:$8 sps:$4 sm:$0xff]  }
 0x4c1   : > { %v8487_v43 = vpop.f32.mrf.mxu1 }
 0x4c2   : > { %v8489_v32 = vpop.f32.mrf.mxu0  ;;  %v2845_v5 = vadd.f32 %v8484_v63, %v2662_v23  ;;  %v3027_v56 = vadd.f32 %v8487_v43, %v2841_v52  ;;  %v7072_v23 = vld [vmem:[%s9127_s3 + $0x30] ss:$8 sps:$4 sm:$0xff]  }
 0x4c3   : > { %v3006_v54 = vpop.f32.mrf.mxu1  ;;  %v2846_v63 = vadd.f32 %v8489_v32, %v2663_v48 }
 0x4c4   : > { %v8494_v49 = vpop.f32.mrf.mxu0 }
 0x4c5   : > { %v3008_v45 = vpop.f32.mrf.mxu1 }
 0x4c6   : > { %v8497_v31 = vpop.f32.mrf.mxu0 }
 0x4c7   : > { %v3010_v40 = vpop.f32.mrf.mxu1 }
 0x4c8   : > { %v3030_v29 = vadd.f32 %v3010_v40, %v2844_v55  ;;  %v2665_v40 = vadd.f32 %v8475_v2, %v2467_v41 }
 0x4c9   : > { %v3014_v14 = vpop.f32.mrf.mxu1 }
 0x4ca   : > { %v3031_v43 = vadd.f32 %v3014_v14, %v2845_v5 }
 0x4cb   : > { %v3016_v18 = vpop.f32.mrf.mxu1 }
 0x4cc   : > { %v3032_v36 = vadd.f32 %v3016_v18, %v2846_v63 }
 0x4d0   : > { %v3174_v26 = vpop.f32.mrf.mxu0 }
 0x4d1   : > { %v3203_v28 = vadd.f32 %v3174_v26, %v3023_v38  ;;  %v3028_v38 = vadd.f32 %v3006_v54, %v2842_v20  ;;  %v3029_v26 = vadd.f32 %v3008_v45, %v2843_v21  ;;  %v3018_v54 = vpop.f32.mrf.mxu1  ;;  %v7062_v20 = vld [vmem:[%s9127_s3 + $0x54] ss:$8 sps:$4 sm:$0xff]   ;;  %v7060_v21 = vld [vmem:[%s9127_s3 + $0x50] ss:$8 sps:$4 sm:$0xff]  }
 0x4d2   : > { %v3176_v57 = vpop.f32.mrf.mxu0 }
 0x4d3   : > { %v3215_v13 = vmax.f32 %v3203_v28, 0.0  ;;  %v3204_v7 = vadd.f32 %v3176_v57, %v3024_v11  ;;  %v2847_v57 = vadd.f32 %v8494_v49, %v2664_v44 }
 0x4d4   : > { %v3178_v60 = vpop.f32.mrf.mxu0 }
 0x4d5   : > { %3227 = vst [vmem:[%s8504_s18] sm:$0xff] %v3215_v13  ;;  %v3216_v4 = vmax.f32 %v3204_v7, 0.0  ;;  %v3205_v19 = vadd.f32 %v3178_v60, %v3025_v33  ;;  %v3020_v7 = vpop.f32.mrf.mxu1  ;;  %v3033_v34 = vadd.f32 %v3018_v54, %v2847_v57 }
 0x4d6   : > { %v3180_v51 = vpop.f32.mrf.mxu0 }
 0x4d7   : > { %3228 = vst [vmem:[%s8504_s18 + $0x8] sm:$0xff] %v3216_v4  ;;  %v3217_v42 = vmax.f32 %v3205_v19, 0.0  ;;  %v3206_v1 = vadd.f32 %v3180_v51, %v3026_v9 }
 0x4d8   : > { %v3184_v22 = vpop.f32.mrf.mxu0 }
 0x4d9   : > { %3229 = vst [vmem:[%s8504_s18 + $0x10] sm:$0xff] %v3217_v42  ;;  %v3218_v6 = vmax.f32 %v3206_v1, 0.0  ;;  %v3236_v15 = vpack.c.bf16 %v3217_v42, %v3215_v13  ;;  %v3207_v45 = vadd.f32 %v3184_v22, %v3027_v56  ;;  %v2848_v13 = vadd.f32 %v8497_v31, %v2665_v40  ;;  %v3619_v42 = vld [vmem:[%s9133_s9] sm:$0xff]  ;;  %v7054_v1 = vld [vmem:[%s9127_s3 + $0x70] ss:$8 sps:$4 sm:$0xff]  }
 0x4da   : > { %v3186_v24 = vpop.f32.mrf.mxu0  ;;  %v7059_v22 = vld [vmem:[%s9127_s3 + $0x64] ss:$8 sps:$4 sm:$0xff]  }
 0x4db   : > { %3230 = vst [vmem:[%s8504_s18 + $0x18] sm:$0xff] %v3218_v6  ;;  %v3237_v47 = vpack.c.bf16 %v3218_v6, %v3216_v4  ;;  %v3208_v39 = vadd.f32 %v3186_v24, %v3028_v38  ;;  %v3219_v25 = vmax.f32 %v3207_v45, 0.0  ;;  %v3034_v4 = vadd.f32 %v3020_v7, %v2848_v13  ;;  %v7068_v6 = vld [vmem:[%s9127_s3 + $0x44] ss:$8 sps:$4 sm:$0xff]  }
 0x4dc   : > { %v3188_v27 = vpop.f32.mrf.mxu0 }
 0x4dd   : > { %v3209_v3 = vadd.f32 %v3188_v27, %v3029_v26  ;;  %3402 = vmatprep.mubr.bf16.mxu1 %v3237_v47  ;;  %3588 = vmatprep.mubr.bf16.mxu0 %v3237_v47  ;;  %v3220_v17 = vmax.f32 %v3208_v39, 0.0 }
 0x4de   : > { %v3190_v59 = vpop.f32.mrf.mxu0  ;;  %3403 = vmatmul.mubr.bf16.vlgmr.msra.gmra.mxu1 %v3236_v15  ;;  %3589 = vmatmul.mubr.bf16.vlgmr.msra.gmra.mxu0 %v3236_v15 }
 0x4df   : > { %v3221_v11 = vmax.f32 %v3209_v3, 0.0  ;;  %v3210_v28 = vadd.f32 %v3190_v59, %v3030_v29  ;;  %3941 = vmatpush1.bf16.msra.mxu0 %v7054_v1  ;;  %v6096_v1 = vld [vmem:[%s9133_s9 + $0x38] sm:$0xff] }
 0x4e0   : > { %v3194_v62 = vpop.f32.mrf.mxu0  ;;  %3942 = vmatprep.subr.bf16.mxu0 %v7059_v22  ;;  %v7077_v22 = vld [vmem:[%s9127_s3 + $0xd4] ss:$8 sps:$4 sm:$0xff]  }
 0x4e1   : > { %6020 = vst [vmem:[%s8504_s18 + $0x20] sm:$0xff] %v3221_v11  ;;  %v3222_v61 = vmax.f32 %v3210_v28, 0.0  ;;  %v3211_v33 = vadd.f32 %v3194_v62, %v3031_v43  ;;  %v3238_v9 = vpack.c.bf16 %v3221_v11, %v3219_v25 }
 0x4e2   : > { %v3196_v32 = vpop.f32.mrf.mxu0 }
 0x4e3   : > { %6021 = vst [vmem:[%s8504_s18 + $0x28] sm:$0xff] %v3222_v61  ;;  %v3239_v60 = vpack.c.bf16 %v3222_v61, %v3220_v17  ;;  %v3223_v46 = vmax.f32 %v3211_v33, 0.0  ;;  %v3212_v2 = vadd.f32 %v3196_v32, %v3032_v36  ;;  %3943 = vmatpush1.bf16.msra.mxu0 %v7057_v8  ;;  %v7075_v8 = vld [vmem:[%s9127_s3 + $0xd0] ss:$8 sps:$4 sm:$0xff]  }
 0x4e4   : > { %v3198_v49 = vpop.f32.mrf.mxu0  ;;  %3944 = vmatprep.subr.bf16.mxu0 %v7062_v20  ;;  %v7078_v20 = vld [vmem:[%s9127_s3 + $0x20] ss:$8 sps:$4 sm:$0xff]  }
 0x4e5   : > { %6022 = vst [vmem:[%s8504_s18 + $0x30] sm:$0xff] %v3223_v46  ;;  %v3224_v19 = vmax.f32 %v3212_v2, 0.0  ;;  %v3213_v37 = vadd.f32 %v3198_v49, %v3033_v34  ;;  %3410 = vmatprep.mubr.bf16.mxu1 %v3239_v60  ;;  %3596 = vmatprep.mubr.bf16.mxu0 %v3239_v60 }
 0x4e6   : > { %v3200_v10 = vpop.f32.mrf.mxu0  ;;  %3411 = vmatmul.mubr.bf16.gmra.mxu1 %v3238_v9  ;;  %3597 = vmatmul.mubr.bf16.gmra.mxu0 %v3238_v9 }
 0x4e7   : > { %6023 = vst [vmem:[%s8504_s18 + $0x38] sm:$0xff] %v3224_v19  ;;  %v3214_v31 = vadd.f32 %v3200_v10, %v3034_v4  ;;  %v3225_v14 = vmax.f32 %v3213_v37, 0.0  ;;  %3945 = vmatpush1.bf16.msra.mxu0 %v7060_v21  ;;  %v3621_v37 = vld [vmem:[%s9133_s9 + $0x10] sm:$0xff]  ;;  %v3622_v10 = vld [vmem:[%s9133_s9 + $0x18] sm:$0xff]  ;;  %v7080_v21 = vld [vmem:[%s9127_s3 + $0x24] ss:$8 sps:$4 sm:$0xff]  }
 0x4e8   : > { %3946 = vmatprep.subr.bf16.mxu0 %v7068_v6  ;;  %v7081_v6 = vld [vmem:[%s9127_s3 + $0xc0] ss:$8 sps:$4 sm:$0xff]  }
 0x4e9   : > { %v3226_v51 = vmax.f32 %v3214_v31, 0.0  ;;  %v3240_v58 = vpack.c.bf16 %v3225_v14, %v3223_v46  ;;  %v6093_v31 = vld [vmem:[%s9133_s9 + $0x20] sm:$0xff]  ;;  %v7065_v14 = vld [vmem:[%s9127_s3 + $0xf4] ss:$8 sps:$4 sm:$0xff]  }
 0x4eb   : > { %v3241_v0 = vpack.c.bf16 %v3226_v51, %v3224_v19  ;;  %3947 = vmatpush1.bf16.msra.mxu0 %v7066_v35  ;;  %v3620_v19 = vld [vmem:[%s9133_s9 + $0x8] sm:$0xff] }
 0x4ec   : > { %3948 = vmatprep.subr.bf16.mxu0 %v7074_v16  ;;  %v6094_v51 = vld [vmem:[%s9133_s9 + $0x28] sm:$0xff]  ;;  %v7084_v16 = vld [vmem:[%s9127_s3 + $0x10] ss:$8 sps:$4 sm:$0xff]  }
 0x4ed   : > { %3418 = vmatprep.mubr.bf16.mxu1 %v3241_v0  ;;  %3604 = vmatprep.mubr.bf16.mxu0 %v3241_v0  ;;  %v7063_v0 = vld [vmem:[%s9127_s3 + $0xf0] ss:$8 sps:$4 sm:$0xff]   ;;  %v7083_v35 = vld [vmem:[%s9127_s3 + $0xc4] ss:$8 sps:$4 sm:$0xff]  }
 0x4ee   : > { %3419 = vmatmul.mubr.bf16.gmra.mxu1 %v3240_v58  ;;  %3605 = vmatmul.mubr.bf16.gmra.mxu0 %v3240_v58  ;;  %v6095_v58 = vld [vmem:[%s9133_s9 + $0x30] sm:$0xff] }
 0x4ef   : > { %3972 = vmatprep.mubr.bf16.mxu0 %v9193_v12  ;;  %6783 = vmatprep.mubr.msk.f32.mxu1 %vm3623_vm8, %v3619_v42  ;;  %v7071_v42 = vld [vmem:[%s9127_s3 + $0xe4] ss:$8 sps:$4 sm:$0xff]  }
 0x4f0   : > { %3949 = vmatpush1.bf16.msra.mxu0 %v7072_v23  ;;  %v7086_v23 = vld [vmem:[%s9127_s3 + $0x14] ss:$8 sps:$4 sm:$0xff]  }
 0x4f1   : > { %3950 = vmatprep.subr.bf16.mxu0 %v7080_v21  ;;  %v7134_v21 = vld [vmem:[%s9127_s3 + $0x114] ss:$8 sps:$4 sm:$0xff]  }
 0x4f4   : > { %3951 = vmatpush1.bf16.msra.mxu0 %v7078_v20  ;;  %v7129_v20 = vld [vmem:[%s9127_s3 + $0x1c0] ss:$8 sps:$4 sm:$0xff]  }
 0x4f5   : > { %3952 = vmatprep.subr.bf16.mxu0 %v7086_v23  ;;  %v7140_v23 = vld [vmem:[%s9127_s3 + $0x104] ss:$8 sps:$4 sm:$0xff]  }
 0x4f8   : > { %3953 = vmatpush1.bf16.msra.mxu0 %v7084_v16  ;;  %v7135_v16 = vld [vmem:[%s9127_s3 + $0x1b0] ss:$8 sps:$4 sm:$0xff]  }
 0x59e   : > { %v6544_v52 = vpop.f32.mrf.mxu1  ;;  %v6578_v18 = vpop.f32.mrf.mxu0 }
 0x5a0   : > { %v6545_v24 = vpop.f32.mrf.mxu1  ;;  %v6579_v55 = vpop.f32.mrf.mxu0 }
 0x5a1   : > { %v6546_v46 = vadd.f32 %v6545_v24, %v6544_v52  ;;  %v6580_v2 = vadd.f32 %v6579_v55, %v6578_v18  ;;  %v7087_v52 = vld [vmem:[%s9127_s3 + $0xb0] ss:$8 sps:$4 sm:$0xff]   ;;  %v7089_v18 = vld [vmem:[%s9127_s3 + $0xb4] ss:$8 sps:$4 sm:$0xff]   ;;  %v7092_v24 = vld [vmem:[%s9127_s3 + $0x4] ss:$8 sps:$4 sm:$0xff]  }
 0x5a2   : > { %v6547_v38 = vpop.f32.mrf.mxu1  ;;  %v6581_v26 = vpop.f32.mrf.mxu0  ;;  %v7090_v55 = vld [vmem:[%s9127_s3] ss:$8 sps:$4 sm:$0xff]   ;;  %3954 = vmatprep.subr.bf16.mxu0 %v7092_v24 }
 0x5a3   : > { %v3613_v4 = vmax.f32 %v6546_v46, %v6580_v2  ;;  %3955 = vmatpush1.bf16.msra.mxu0 %v7090_v55  ;;  %v7111_v46 = vld [vmem:[%s9127_s3 + $0x1f0] ss:$8 sps:$4 sm:$0xff]   ;;  %v7141_v24 = vld [vmem:[%s9127_s3 + $0x1a0] ss:$8 sps:$4 sm:$0xff]   ;;  %v7146_v55 = vld [vmem:[%s9127_s3 + $0x274] ss:$8 sps:$4 sm:$0xff]  }
 0x5a4   : > { %v6548_v47 = vpop.f32.mrf.mxu1  ;;  %v6582_v48 = vpop.f32.mrf.mxu0 }
 0x5a5   : > { %v6549_v32 = vadd.f32 %v6548_v47, %v6547_v38  ;;  %v6583_v34 = vadd.f32 %v6582_v48, %v6581_v26  ;;  %v7095_v38 = vld [vmem:[%s9127_s3 + $0xa4] ss:$8 sps:$4 sm:$0xff]   ;;  %v7093_v26 = vld [vmem:[%s9127_s3 + $0xa0] ss:$8 sps:$4 sm:$0xff]   ;;  %v7098_v47 = vld [vmem:[%s9127_s3 + $0x174] ss:$8 sps:$4 sm:$0xff]  }
 0x5a6   : > { %v6550_v5 = vpop.f32.mrf.mxu1  ;;  %v6584_v56 = vpop.f32.mrf.mxu0  ;;  %v7101_v48 = vld [vmem:[%s9127_s3 + $0x94] ss:$8 sps:$4 sm:$0xff]   ;;  %4280 = vmatprep.subr.bf16.mxu0 %v7098_v47 }
 0x5a7   : > { %v3614_v49 = vmax.f32 %v6549_v32, %v6583_v34  ;;  %v7108_v32 = vld [vmem:[%s9127_s3 + $0x150] ss:$8 sps:$4 sm:$0xff]  }
 0x5a8   : > { %v6551_v15 = vpop.f32.mrf.mxu1  ;;  %v6585_v27 = vpop.f32.mrf.mxu0 }
 0x5a9   : > { %v6552_v13 = vadd.f32 %v6551_v15, %v6550_v5  ;;  %v6586_v7 = vadd.f32 %v6585_v27, %v6584_v56  ;;  %v7099_v5 = vld [vmem:[%s9127_s3 + $0x90] ss:$8 sps:$4 sm:$0xff]   ;;  %v7105_v56 = vld [vmem:[%s9127_s3 + $0x80] ss:$8 sps:$4 sm:$0xff]   ;;  %v7107_v15 = vld [vmem:[%s9127_s3 + $0x84] ss:$8 sps:$4 sm:$0xff]  }
 0x5aa   : > { %v6553_v29 = vpop.f32.mrf.mxu1  ;;  %v6587_v39 = vpop.f32.mrf.mxu0  ;;  %v7113_v27 = vld [vmem:[%s9127_s3 + $0x1f4] ss:$8 sps:$4 sm:$0xff]  }
 0x5ab   : > { %v3615_v9 = vmax.f32 %v6552_v13, %v6586_v7 }
 0x5ac   : > { %v6554_v3 = vpop.f32.mrf.mxu1  ;;  %v6588_v41 = vpop.f32.mrf.mxu0 }
 0x5ad   : > { %v6555_v17 = vadd.f32 %v6554_v3, %v6553_v29  ;;  %v6589_v61 = vadd.f32 %v6588_v41, %v6587_v39 }
 0x5ae   : > { %v6556_v44 = vpop.f32.mrf.mxu1  ;;  %v6590_v54 = vpop.f32.mrf.mxu0 }
 0x5af   : > { %v3616_v60 = vmax.f32 %v6555_v17, %v6589_v61  ;;  %v7102_v17 = vld [vmem:[%s9127_s3 + $0x160] ss:$8 sps:$4 sm:$0xff]  }
 0x5b0   : > { %v6557_v45 = vpop.f32.mrf.mxu1  ;;  %v6591_v59 = vpop.f32.mrf.mxu0 }
 0x5b1   : > { %v6558_v40 = vadd.f32 %v6557_v45, %v6556_v44  ;;  %v6592_v57 = vadd.f32 %v6591_v59, %v6590_v54 }
 0x5b2   : > { %v6559_v63 = vpop.f32.mrf.mxu1  ;;  %v6593_v43 = vpop.f32.mrf.mxu0 }
 0x5b3   : > { %v3617_v25 = vmax.f32 %v6558_v40, %v6592_v57 }
 0x5b4   : > { %v6560_v11 = vpop.f32.mrf.mxu1  ;;  %v6594_v28 = vpop.f32.mrf.mxu0 }
 0x5b5   : > { %v6561_v62 = vadd.f32 %v6560_v11, %v6559_v63  ;;  %v6595_v36 = vadd.f32 %v6594_v28, %v6593_v43  ;;  %v7096_v43 = vld [vmem:[%s9127_s3 + $0x170] ss:$8 sps:$4 sm:$0xff]   ;;  %v7104_v28 = vld [vmem:[%s9127_s3 + $0x164] ss:$8 sps:$4 sm:$0xff]  }
 0x5b7   : > { %v3618_v33 = vmax.f32 %v6561_v62, %v6595_v36 }
 0x5b9   : > { %6771 = vmatprep.subr.msk.mxu1 %vm2057_vm7, %v3618_v33 }
 0x5ba   : > { %6772 = vmatpush3.msk.msra.mxu1 %vm2057_vm7, %v3618_v33 }
 0x5bb   : > { %6773 = vmatprep.subr.mxu1 %v3617_v25 }
 0x5bc   : > { %6774 = vmatpush3.msra.mxu1 %v3617_v25 }
 0x5bd   : > { %6775 = vmatprep.subr.mxu1 %v3616_v60 }
 0x5be   : > { %6776 = vmatpush3.msra.mxu1 %v3616_v60 }
 0x5bf   : > { %6777 = vmatprep.subr.mxu1 %v3615_v9 }
 0x5c0   : > { %6778 = vmatpush3.msra.mxu1 %v3615_v9 }
 0x5c1   : > { %6779 = vmatprep.subr.mxu1 %v3614_v49 }
 0x5c2   : > { %6780 = vmatpush3.msra.mxu1 %v3614_v49 }
 0x5c3   : > { %6781 = vmatprep.subr.mxu1 %v3613_v4 }
 0x5c4   : > { %6782 = vmatpush3.msra.mxu1 %v3613_v4 }
 0x5c5   : > { %6789 = vmatprep.subr.msk.mxu1 %vm2057_vm7, %v3618_v33  ;;  %6784 = vmatmul.mubr.msk.f32.vlgmr.msra.gmra.mxu1 %vm3623_vm8, %v3620_v19 }
 0x5c6   : > { %6790 = vmatpush3.msk.msra.mxu1 %vm2057_vm7, %v3618_v33  ;;  %6786 = vmatprep.mubr.msk.f32.mxu1 %vm3623_vm8, %v3621_v37  ;;  %v7110_v33 = vld [vmem:[%s9127_s3 + $0x154] ss:$8 sps:$4 sm:$0xff]  }
 0x5c7   : > { %6791 = vmatprep.subr.mxu1 %v3617_v25 }
 0x5c8   : > { %6792 = vmatpush3.msra.mxu1 %v3617_v25 }
 0x5c9   : > { %6793 = vmatprep.subr.mxu1 %v3616_v60  ;;  %6787 = vmatmul.mubr.msk.f32.gmra.mxu1 %vm3623_vm8, %v3622_v10  ;;  %v7114_v10 = vld [vmem:[%s9127_s3 + $0x140] ss:$8 sps:$4 sm:$0xff]  }
 0x5ca   : > { %6794 = vmatpush3.msra.mxu1 %v3616_v60  ;;  %6801 = vmatprep.mubr.msk.f32.mxu1 %vm3623_vm8, %v6093_v31  ;;  %v7117_v31 = vld [vmem:[%s9127_s3 + $0x1e0] ss:$8 sps:$4 sm:$0xff]  }
 0x5cb   : > { %6795 = vmatprep.subr.mxu1 %v3615_v9 }
 0x5cc   : > { %6796 = vmatpush3.msra.mxu1 %v3615_v9 }
 0x5cd   : > { %6797 = vmatprep.subr.mxu1 %v3614_v49 }
 0x5ce   : > { %6798 = vmatpush3.msra.mxu1 %v3614_v49  ;;  %v7116_v49 = vld [vmem:[%s9127_s3 + $0x144] ss:$8 sps:$4 sm:$0xff]  }
 0x5cf   : > { %6799 = vmatprep.subr.mxu1 %v3613_v4 }
 0x5d0   : > { %6800 = vmatpush3.msra.mxu1 %v3613_v4  ;;  %v7119_v4 = vld [vmem:[%s9127_s3 + $0x1e4] ss:$8 sps:$4 sm:$0xff]  }
 0x5d1   : > { %6802 = vmatmul.mubr.msk.f32.vlgmr.msra.gmra.mxu1 %vm3623_vm8, %v6094_v51  ;;  %4115 = vmatprep.subr.bf16.mxu1 %v7065_v14  ;;  %v7122_v14 = vld [vmem:[%s9127_s3 + $0x134] ss:$8 sps:$4 sm:$0xff]  }
 0x5d2   : > { %6804 = vmatprep.mubr.msk.f32.mxu1 %vm3623_vm8, %v6095_v58  ;;  %4116 = vmatpush1.bf16.msra.mxu1 %v7063_v0  ;;  %v7125_v51 = vld [vmem:[%s9127_s3 + $0x1d4] ss:$8 sps:$4 sm:$0xff]   ;;  %v7120_v0 = vld [vmem:[%s9127_s3 + $0x130] ss:$8 sps:$4 sm:$0xff]  }
 0x5d3   : > { %4117 = vmatprep.subr.bf16.mxu1 %v7071_v42  ;;  %v7123_v42 = vld [vmem:[%s9127_s3 + $0x1d0] ss:$8 sps:$4 sm:$0xff]  }
 0x5d5   : > { %6805 = vmatmul.mubr.msk.f32.gmra.mxu1 %vm3623_vm8, %v6096_v1  ;;  %v7128_v1 = vld [vmem:[%s9127_s3 + $0x124] ss:$8 sps:$4 sm:$0xff]  }
 0x5d6   : > { %4118 = vmatpush1.bf16.msra.mxu1 %v7069_v30  ;;  %4147 = vmatprep.mubr.bf16.mxu1 %v9193_v12 }
 0x5d7   : > { %4119 = vmatprep.subr.bf16.mxu1 %v7077_v22  ;;  %v7131_v22 = vld [vmem:[%s9127_s3 + $0x1c4] ss:$8 sps:$4 sm:$0xff]  }
 0x5da   : > { %4120 = vmatpush1.bf16.msra.mxu1 %v7075_v8  ;;  %v7126_v8 = vld [vmem:[%s9127_s3 + $0x120] ss:$8 sps:$4 sm:$0xff]  }
 0x5db   : > { %4121 = vmatprep.subr.bf16.mxu1 %v7083_v35  ;;  %v7132_v35 = vld [vmem:[%s9127_s3 + $0x110] ss:$8 sps:$4 sm:$0xff]  }
 0x5de   : > { %4122 = vmatpush1.bf16.msra.mxu1 %v7081_v6  ;;  %v7137_v6 = vld [vmem:[%s9127_s3 + $0x1b4] ss:$8 sps:$4 sm:$0xff]  }
 0x5df   : > { %4123 = vmatprep.subr.bf16.mxu1 %v7089_v18  ;;  %v7138_v18 = vld [vmem:[%s9127_s3 + $0x100] ss:$8 sps:$4 sm:$0xff]  }
 0x5e2   : > { %4124 = vmatpush1.bf16.msra.mxu1 %v7087_v52  ;;  %v7143_v52 = vld [vmem:[%s9127_s3 + $0x1a4] ss:$8 sps:$4 sm:$0xff]  }
 0x5e3   : > { %4125 = vmatprep.subr.bf16.mxu1 %v7095_v38 }
 0x5e6   : > { %4126 = vmatpush1.bf16.msra.mxu1 %v7093_v26  ;;  %v7149_v26 = vld [vmem:[%s9127_s3 + $0x194] ss:$8 sps:$4 sm:$0xff]  }
 0x5e7   : > { %4127 = vmatprep.subr.bf16.mxu1 %v7101_v48  ;;  %v7144_v48 = vld [vmem:[%s9127_s3 + $0x270] ss:$8 sps:$4 sm:$0xff]  }
 0x5ea   : > { %4128 = vmatpush1.bf16.msra.mxu1 %v7099_v5  ;;  %v7147_v5 = vld [vmem:[%s9127_s3 + $0x190] ss:$8 sps:$4 sm:$0xff]  }
 0x5eb   : > { %4129 = vmatprep.subr.bf16.mxu1 %v7107_v15 }
 0x5ee   : > { %4130 = vmatpush1.bf16.msra.mxu1 %v7105_v56  ;;  %v7152_v56 = vld [vmem:[%s9127_s3 + $0x264] ss:$8 sps:$4 sm:$0xff]  }
 0x5ef   : > { %4447 = vmatprep.subr.bf16.mxu1 %v7113_v27  ;;  %v7155_v27 = vld [vmem:[%s9127_s3 + $0x184] ss:$8 sps:$4 sm:$0xff]  }
 0x685   : > { %v6785_v29 = vpop.f32.mrf.mxu1 }
 0x687   : > { %v3705_v39 = vpop.f32.mrf.mxu1 }
 0x689   : > { %v6788_v3 = vpop.f32.mrf.mxu1 }
 0x68b   : > { %v3715_v41 = vpop.f32.mrf.mxu1 }
 0x691   : > { %v6803_v44 = vpop.f32.mrf.mxu1 }
 0x692   : > { %v3827_v45 = vmax.f32 %v6785_v29, %v6803_v44  ;;  %v7158_v44 = vld [vmem:[%s9127_s3 + $0x254] ss:$8 sps:$4 sm:$0xff]  }
 0x693   : > { %v3807_v54 = vpop.f32.mrf.mxu1 }
 0x694   : > { %v3826_v59 = vmax.f32 %v3705_v39, %v3807_v54 }
 0x695   : > { %v6806_v63 = vpop.f32.mrf.mxu1 }
 0x696   : > { %v8684_v11 = vpack.c.bf16 %v3827_v45, %v3826_v59  ;;  %v3829_v57 = vmax.f32 %v6788_v3, %v6806_v63  ;;  %v7150_v3 = vld [vmem:[%s9127_s3 + $0x260] ss:$8 sps:$4 sm:$0xff]   ;;  %v7161_v59 = vld [vmem:[%s9127_s3 + $0x2f4] ss:$8 sps:$4 sm:$0xff]  }
 0x697   : > { %v3817_v40 = vpop.f32.mrf.mxu1 }
 0x698   : > { %v3828_v62 = vmax.f32 %v3715_v41, %v3817_v40  ;;  %3973 = vmatmul.mubr.bf16.vlgmr.msra.gmra.mxu0 %v8684_v11  ;;  %v8691_v36 = vshll.u32 %v8684_v11, 16  ;;  %v8704_v7 = vshrl.u32 %v8684_v11, 16  ;;  %v4857_v34 = vrot.slane %v8684_v11, 3  ;;  %v7153_v41 = vld [vmem:[%s9127_s3 + $0x180] ss:$8 sps:$4 sm:$0xff]  }
 0x699   : > { %4281 = vmatpush1.bf16.msra.mxu0 %v7096_v43  ;;  %3982 = vmatprep.mubr.bf16.mxu0 %v9193_v12  ;;  %v4195_v47 = vrot.slane %v8684_v11, 1  ;;  %v7156_v43 = vld [vmem:[%s9127_s3 + $0x250] ss:$8 sps:$4 sm:$0xff]  }
 0x69a   : > { %v8697_v61 = vpack.c.bf16 %v3829_v57, %v3828_v62  ;;  %4282 = vmatprep.subr.bf16.mxu0 %v7104_v28  ;;  %v4023_v13 = vrot.slane %v8691_v36, 1  ;;  %v4358_v54 = vrot.slane %v8704_v7, 1  ;;  %v4359_v45 = vrot.slane %v8691_v36, 2  ;;  %v7159_v40 = vld [vmem:[%s9127_s3 + $0x2f0] ss:$8 sps:$4 sm:$0xff]  }
 0x69b   : > { %v7164_v57 = vld [vmem:[%s9127_s3 + $0x244] ss:$8 sps:$4 sm:$0xff]  }
 0x69c   : > { %v8707_v25 = vshll.u32 %v8697_v61, 16  ;;  %v4858_v60 = vrot.slane %v8697_v61, 3  ;;  %v4024_v2 = vor.u32 %v4023_v13, %v8704_v7  ;;  %v8749_v58 = vshrl.u32 %v8697_v61, 16  ;;  %v7167_v62 = vld [vmem:[%s9127_s3 + $0x2e4] ss:$8 sps:$4 sm:$0xff]  }
 0x69d   : > { %4283 = vmatpush1.bf16.msra.mxu0 %v7102_v17  ;;  %v4196_v38 = vrot.slane %v8697_v61, 1  ;;  %v4360_v28 = vor.u32 %v4359_v45, %v4358_v54  ;;  %v7165_v13 = vld [vmem:[%s9127_s3 + $0x2e0] ss:$8 sps:$4 sm:$0xff]   ;;  %v7222_v54 = vld [vmem:[%s9137_s13 + $0x78] sm:$0xff]  }
 0x69e   : > { %4284 = vmatprep.subr.bf16.mxu0 %v7110_v33  ;;  %v4028_v9 = vrot.slane %v8707_v25, 1  ;;  %v8727_v19 = vsel %vm4856_vm9, %v4857_v34, %v4858_v60  ;;  %v4361_v29 = vrot.slane %v8749_v58, 1  ;;  %v4362_v39 = vrot.slane %v8707_v25, 2  ;;  %v7162_v33 = vld [vmem:[%s9127_s3 + $0x240] ss:$8 sps:$4 sm:$0xff]   ;;  %v7223_v45 = vld [vmem:[%s9137_s13 + $0xf8] sm:$0xff]  }
 0x69f   : > { %v4197_v15 = vsel %vm1108_vm4, %v4195_v47, %v4196_v38  ;;  %v7173_v34 = vld [vmem:[%s9127_s3 + $0x2d4] ss:$8 sps:$4 sm:$0xff]   ;;  %v7204_v47 = vld [vmem:[%s9127_s3 + $0x350] ss:$8 sps:$4 sm:$0xff]  }
 0x6a0   : > { %3983 = vmatmul.mubr.bf16.gmra.mxu0 %v8697_v61  ;;  %v4029_v37 = vsel %vm925_vm3, %v4024_v2, %v4028_v9  ;;  %v4032_v30 = vor.u32 %v8749_v58, %v4028_v9  ;;  %v4363_v63 = vor.u32 %v4362_v39, %v4361_v29  ;;  %v7171_v2 = vld [vmem:[%s9127_s3 + $0x2d0] ss:$8 sps:$4 sm:$0xff]   ;;  %v7176_v9 = vld [vmem:[%s9127_s3 + $0x224] ss:$8 sps:$4 sm:$0xff]   ;;  %v7213_v29 = vld [vmem:[%s9127_s3 + $0x320] ss:$8 sps:$4 sm:$0xff]  }
 0x6a1   : > { %4285 = vmatpush1.bf16.msra.mxu0 %v7108_v32  ;;  %4148 = vmatmul.mubr.bf16.vlgmr.msra.gmra.mxu1 %v4029_v37  ;;  %v7170_v32 = vld [vmem:[%s9127_s3 + $0x234] ss:$8 sps:$4 sm:$0xff]   ;;  %v7177_v37 = vld [vmem:[%s9127_s3 + $0x2c0] ss:$8 sps:$4 sm:$0xff]  }
 0x6a2   : > { %4448 = vmatpush1.bf16.msra.mxu1 %v7111_v46  ;;  %4286 = vmatprep.subr.bf16.mxu0 %v7116_v49  ;;  %v4364_v17 = vsel %vm1261_vm5, %v4360_v28, %v4363_v63  ;;  %v7168_v46 = vld [vmem:[%s9127_s3 + $0x230] ss:$8 sps:$4 sm:$0xff]   ;;  %v7179_v49 = vld [vmem:[%s9127_s3 + $0x2c4] ss:$8 sps:$4 sm:$0xff]   ;;  %v7218_v39 = vld [vmem:[%s9127_s3 + $0x314] ss:$8 sps:$4 sm:$0xff]  }
 0x6a3   : > { %4449 = vmatprep.subr.bf16.mxu1 %v7119_v4  ;;  %4157 = vmatprep.mubr.bf16.mxu1 %v9193_v12  ;;  %v7174_v4 = vld [vmem:[%s9127_s3 + $0x220] ss:$8 sps:$4 sm:$0xff]  }
 0x6a4   : > { %4312 = vmatprep.mubr.bf16.mxu0 %v9193_v12  ;;  %v7231_v28 = vld [vmem:[%s9137_s13 + $0xe8] sm:$0xff]  }
 0x6a5   : > { %4287 = vmatpush1.bf16.msra.mxu0 %v7114_v10  ;;  %v7182_v10 = vld [vmem:[%s9127_s3 + $0x214] ss:$8 sps:$4 sm:$0xff]  }
 0x6a6   : > { %4450 = vmatpush1.bf16.msra.mxu1 %v7117_v31  ;;  %4288 = vmatprep.subr.bf16.mxu0 %v7122_v14  ;;  %v7185_v31 = vld [vmem:[%s9127_s3 + $0x2b4] ss:$8 sps:$4 sm:$0xff]   ;;  %v7180_v14 = vld [vmem:[%s9127_s3 + $0x210] ss:$8 sps:$4 sm:$0xff]  }
 0x6a7   : > { %4451 = vmatprep.subr.bf16.mxu1 %v7125_v51  ;;  %v7183_v51 = vld [vmem:[%s9127_s3 + $0x2b0] ss:$8 sps:$4 sm:$0xff]  }
 0x6a9   : > { %4289 = vmatpush1.bf16.msra.mxu0 %v7120_v0  ;;  %4158 = vmatmul.mubr.bf16.gmra.mxu1 %v4032_v30  ;;  %v7188_v0 = vld [vmem:[%s9127_s3 + $0x204] ss:$8 sps:$4 sm:$0xff]   ;;  %v7189_v30 = vld [vmem:[%s9127_s3 + $0x2a0] ss:$8 sps:$4 sm:$0xff]  }
 0x6aa   : > { %4452 = vmatpush1.bf16.msra.mxu1 %v7123_v42  ;;  %4290 = vmatprep.subr.bf16.mxu0 %v7128_v1  ;;  %v7191_v42 = vld [vmem:[%s9127_s3 + $0x2a4] ss:$8 sps:$4 sm:$0xff]   ;;  %v7186_v1 = vld [vmem:[%s9127_s3 + $0x200] ss:$8 sps:$4 sm:$0xff]  }
 0x6ab   : > { %4453 = vmatprep.subr.bf16.mxu1 %v7131_v22  ;;  %4479 = vmatprep.mubr.bf16.mxu1 %v9193_v12  ;;  %v7194_v22 = vld [vmem:[%s9127_s3 + $0x374] ss:$8 sps:$4 sm:$0xff]  }
 0x6ad   : > { %4291 = vmatpush1.bf16.msra.mxu0 %v7126_v8  ;;  %v4526_v8 = vrot.slane %v8697_v61, 2  ;;  %v7227_v61 = vld [vmem:[%s9137_s13 + $0xf0] sm:$0xff]  }
 0x6ae   : > { %4454 = vmatpush1.bf16.msra.mxu1 %v7129_v20  ;;  %4292 = vmatprep.subr.bf16.mxu0 %v7134_v21  ;;  %v7197_v20 = vld [vmem:[%s9127_s3 + $0x294] ss:$8 sps:$4 sm:$0xff]   ;;  %v4525_v21 = vrot.slane %v8684_v11, 2  ;;  %v7203_v11 = vld [vmem:[%s9127_s3 + $0x284] ss:$8 sps:$4 sm:$0xff]  }
 0x6af   : > { %4455 = vmatprep.subr.bf16.mxu1 %v7137_v6  ;;  %v7192_v6 = vld [vmem:[%s9127_s3 + $0x370] ss:$8 sps:$4 sm:$0xff]  }
 0x6b1   : > { %4293 = vmatpush1.bf16.msra.mxu0 %v7132_v35  ;;  %v7195_v35 = vld [vmem:[%s9127_s3 + $0x290] ss:$8 sps:$4 sm:$0xff]  }
 0x6b2   : > { %4456 = vmatpush1.bf16.msra.mxu1 %v7135_v16  ;;  %4294 = vmatprep.subr.bf16.mxu0 %v7140_v23  ;;  %v7200_v16 = vld [vmem:[%s9127_s3 + $0x364] ss:$8 sps:$4 sm:$0xff]   ;;  %v4527_v23 = vsel %vm1424_vm2, %v4525_v21, %v4526_v8 }
 0x6b3   : > { %4457 = vmatprep.subr.bf16.mxu1 %v7143_v52  ;;  %v4692_v52 = vrot.slane %v8749_v58, 2  ;;  %v4689_v58 = vrot.slane %v8704_v7, 2  ;;  %v7212_v7 = vld [vmem:[%s9127_s3 + $0x334] ss:$8 sps:$4 sm:$0xff]  }
 0x6b5   : > { %4295 = vmatpush1.bf16.msra.mxu0 %v7138_v18  ;;  %v4693_v18 = vrot.slane %v8707_v25, 3  ;;  %v4690_v25 = vrot.slane %v8691_v36, 3  ;;  %v7207_v36 = vld [vmem:[%s9127_s3 + $0x340] ss:$8 sps:$4 sm:$0xff]  }
 0x6b6   : > { %4458 = vmatpush1.bf16.msra.mxu1 %v7141_v24  ;;  %4610 = vmatprep.subr.bf16.mxu0 %v7146_v55  ;;  %v7198_v24 = vld [vmem:[%s9127_s3 + $0x360] ss:$8 sps:$4 sm:$0xff]  }
 0x6b7   : > { %4459 = vmatprep.subr.bf16.mxu1 %v7149_v26  ;;  %v7201_v55 = vld [vmem:[%s9127_s3 + $0x280] ss:$8 sps:$4 sm:$0xff]   ;;  %v4694_v26 = vor.u32 %v4693_v18, %v4692_v52 }
 0x6b8   : > { %4313 = vmatmul.mubr.bf16.vlgmr.msra.gmra.mxu0 %v4197_v15  ;;  %v7210_v15 = vld [vmem:[%s9127_s3 + $0x330] ss:$8 sps:$4 sm:$0xff]  }
 0x6b9   : > { %4611 = vmatpush1.bf16.msra.mxu0 %v7144_v48  ;;  %4322 = vmatprep.mubr.bf16.mxu0 %v9193_v12  ;;  %v4691_v48 = vor.u32 %v4690_v25, %v4689_v58 }
 0x6ba   : > { %4460 = vmatpush1.bf16.msra.mxu1 %v7147_v5  ;;  %4612 = vmatprep.subr.bf16.mxu0 %v7152_v56  ;;  %v7209_v5 = vld [vmem:[%s9127_s3 + $0x344] ss:$8 sps:$4 sm:$0xff]  }
 0x6bb   : > { %4461 = vmatprep.subr.bf16.mxu1 %v7155_v27  ;;  %v4695_v56 = vsel %vm4688_vm10, %v4691_v48, %v4694_v26  ;;  %v7215_v27 = vld [vmem:[%s9127_s3 + $0x324] ss:$8 sps:$4 sm:$0xff]  }
 0x6bd   : > { %4613 = vmatpush1.bf16.msra.mxu0 %v7150_v3  ;;  %v7216_v3 = vld [vmem:[%s9127_s3 + $0x310] ss:$8 sps:$4 sm:$0xff]  }
 0x6be   : > { %4462 = vmatpush1.bf16.msra.mxu1 %v7153_v41  ;;  %4614 = vmatprep.subr.bf16.mxu0 %v7158_v44  ;;  %v7221_v41 = vld [vmem:[%s9127_s3 + $0x304] ss:$8 sps:$4 sm:$0xff]   ;;  %v7219_v44 = vld [vmem:[%s9127_s3 + $0x300] ss:$8 sps:$4 sm:$0xff]  }
 0x6bf   : > { %4778 = vmatprep.subr.bf16.mxu1 %v7161_v59  ;;  %v7224_v59 = vld [vmem:[%s9137_s13 + $0x38] sm:$0xff]  }
 0x6c0   : > { %4323 = vmatmul.mubr.bf16.gmra.mxu0 %v4196_v38  ;;  %v7206_v38 = vld [vmem:[%s9127_s3 + $0x354] ss:$8 sps:$4 sm:$0xff]  }
 0x6c1   : > { %4480 = vmatmul.mubr.bf16.vlgmr.msra.gmra.mxu1 %v4364_v17  ;;  %4615 = vmatpush1.bf16.msra.mxu0 %v7156_v43  ;;  %v7230_v43 = vld [vmem:[%s9137_s13 + $0x68] sm:$0xff]   ;;  %v7235_v17 = vld [vmem:[%s9137_s13 + $0xe0] sm:$0xff]  }
 0x6c2   : > { %4779 = vmatpush1.bf16.msra.mxu1 %v7159_v40  ;;  %4616 = vmatprep.subr.bf16.mxu0 %v7164_v57  ;;  %v7232_v40 = vld [vmem:[%s9137_s13 + $0x28] sm:$0xff]  }
 0x6c3   : > { %4780 = vmatprep.subr.bf16.mxu1 %v7167_v62  ;;  %4489 = vmatprep.mubr.bf16.mxu1 %v9193_v12  ;;  %v7233_v57 = vld [vmem:[%s9137_s13 + $0xa8] sm:$0xff]   ;;  %v7234_v62 = vld [vmem:[%s9137_s13 + $0x60] sm:$0xff]  }
 0x6c4   : > { %4642 = vmatprep.mubr.bf16.mxu0 %v9193_v12 }
 0x6c5   : > { %4617 = vmatpush1.bf16.msra.mxu0 %v7162_v33  ;;  %v7236_v33 = vld [vmem:[%s9137_s13 + $0x20] sm:$0xff]  }
 0x6c6   : > { %4781 = vmatpush1.bf16.msra.mxu1 %v7165_v13  ;;  %4618 = vmatprep.subr.bf16.mxu0 %v7170_v32  ;;  %v7237_v13 = vld [vmem:[%s9137_s13 + $0xa0] sm:$0xff]   ;;  %v7238_v32 = vld [vmem:[%s9137_s13 + $0x58] sm:$0xff]  }
 0x6c7   : > { %4782 = vmatprep.subr.bf16.mxu1 %v7173_v34  ;;  %v7239_v34 = vld [vmem:[%s9137_s13 + $0xd8] sm:$0xff]  }
 0x6c9   : > { %4490 = vmatmul.mubr.bf16.gmra.mxu1 %v4363_v63  ;;  %4619 = vmatpush1.bf16.msra.mxu0 %v7168_v46  ;;  %v7229_v63 = vld [vmem:[%s9137_s13 + $0xb0] sm:$0xff]   ;;  %v7240_v46 = vld [vmem:[%s9137_s13 + $0x18] sm:$0xff]  }
 0x6ca   : > { %4783 = vmatpush1.bf16.msra.mxu1 %v7171_v2  ;;  %4620 = vmatprep.subr.bf16.mxu0 %v7176_v9  ;;  %v7241_v2 = vld [vmem:[%s9137_s13 + $0x98] sm:$0xff]   ;;  %v7242_v9 = vld [vmem:[%s9137_s13 + $0x50] sm:$0xff]  }
 0x6cb   : > { %4784 = vmatprep.subr.bf16.mxu1 %v7179_v49  ;;  %4810 = vmatprep.mubr.bf16.mxu1 %v9193_v12  ;;  %v7243_v49 = vld [vmem:[%s9137_s13 + $0xd0] sm:$0xff]  }
 0x6cd   : > { %4621 = vmatpush1.bf16.msra.mxu0 %v7174_v4  ;;  %v7244_v4 = vld [vmem:[%s9137_s13 + $0x10] sm:$0xff]  }
 0x6ce   : > { %4785 = vmatpush1.bf16.msra.mxu1 %v7177_v37  ;;  %4622 = vmatprep.subr.bf16.mxu0 %v7182_v10  ;;  %v7245_v37 = vld [vmem:[%s9137_s13 + $0x90] sm:$0xff]   ;;  %v7246_v10 = vld [vmem:[%s9137_s13 + $0x48] sm:$0xff]  }
 0x6cf   : > { %4786 = vmatprep.subr.bf16.mxu1 %v7185_v31  ;;  %v7247_v31 = vld [vmem:[%s9137_s13 + $0xc8] sm:$0xff]  }
 0x6d1   : > { %4623 = vmatpush1.bf16.msra.mxu0 %v7180_v14  ;;  %v7248_v14 = vld [vmem:[%s9137_s13 + $0x8] sm:$0xff]  }
 0x6d2   : > { %4787 = vmatpush1.bf16.msra.mxu1 %v7183_v51  ;;  %4624 = vmatprep.subr.bf16.mxu0 %v7188_v0  ;;  %v7249_v51 = vld [vmem:[%s9137_s13 + $0x88] sm:$0xff]   ;;  %v7250_v0 = vld [vmem:[%s9137_s13 + $0x40] sm:$0xff]  }
 0x6d3   : > { %4788 = vmatprep.subr.bf16.mxu1 %v7191_v42  ;;  %v7251_v42 = vld [vmem:[%s9137_s13 + $0xc0] sm:$0xff]  }
 0x6d5   : > { %4625 = vmatpush1.bf16.msra.mxu0 %v7186_v1  ;;  %v7252_v1 = vld [vmem:[%s9137_s13] sm:$0xff]  }
 0x6d6   : > { %4789 = vmatpush1.bf16.msra.mxu1 %v7189_v30  ;;  %4942 = vmatprep.subr.bf16.mxu0 %v7194_v22  ;;  %v7253_v30 = vld [vmem:[%s9137_s13 + $0x80] sm:$0xff]  }
 0x6d7   : > { %4790 = vmatprep.subr.bf16.mxu1 %v7197_v20 }
 0x6d8   : > { %4643 = vmatmul.mubr.bf16.vlgmr.msra.gmra.mxu0 %v4527_v23 }
 0x6d9   : > { %4943 = vmatpush1.bf16.msra.mxu0 %v7192_v6  ;;  %4652 = vmatprep.mubr.bf16.mxu0 %v9193_v12 }
 0x6da   : > { %4791 = vmatpush1.bf16.msra.mxu1 %v7195_v35  ;;  %4944 = vmatprep.subr.bf16.mxu0 %v7200_v16 }
 0x6db   : > { %4792 = vmatprep.subr.bf16.mxu1 %v7203_v11 }
 0x6dd   : > { %4945 = vmatpush1.bf16.msra.mxu0 %v7198_v24 }
 0x6de   : > { %4793 = vmatpush1.bf16.msra.mxu1 %v7201_v55  ;;  %4946 = vmatprep.subr.bf16.mxu0 %v7206_v38 }
 0x6df   : > { %6616 = vmatprep.subr.bf16.mxu1 %v7222_v54 }
 0x6e0   : > { %4653 = vmatmul.mubr.bf16.gmra.mxu0 %v4526_v8 }
 0x6e1   : > { %4811 = vmatmul.mubr.bf16.vlgmr.msra.gmra.mxu1 %v4695_v56  ;;  %4947 = vmatpush1.bf16.msra.mxu0 %v7204_v47 }
 0x6e2   : > { %4948 = vmatprep.subr.bf16.mxu0 %v7209_v5  ;;  %4820 = vmatprep.mubr.bf16.mxu1 %v9193_v12 }
 0x6e3   : > { %4974 = vmatprep.mubr.bf16.mxu0 %v9193_v12  ;;  %6617 = vmatpush3.bf16.msra.mxu1 %v7224_v59 }
 0x6e5   : > { %4949 = vmatpush1.bf16.msra.mxu0 %v7207_v36 }
 0x6e6   : > { %4950 = vmatprep.subr.bf16.mxu0 %v7212_v7 }
 0x6e9   : > { %4821 = vmatmul.mubr.bf16.gmra.mxu1 %v4694_v26  ;;  %4951 = vmatpush1.bf16.msra.mxu0 %v7210_v15 }
 0x6ea   : > { %4952 = vmatprep.subr.bf16.mxu0 %v7215_v27 }
 0x6ed   : > { %4953 = vmatpush1.bf16.msra.mxu0 %v7213_v29 }
 0x6ee   : > { %4954 = vmatprep.subr.bf16.mxu0 %v7218_v39 }
 0x6f1   : > { %4955 = vmatpush1.bf16.msra.mxu0 %v7216_v3 }
 0x6f2   : > { %4956 = vmatprep.subr.bf16.mxu0 %v7221_v41 }
 0x6f5   : > { %4957 = vmatpush1.bf16.msra.mxu0 %v7219_v44 }
 0x6f6   : > { %6644 = vmatprep.subr.bf16.mxu0 %v7223_v45 }
 0x6f8   : > { %4975 = vmatmul.mubr.bf16.vlgmr.msra.gmra.mxu0 %v8727_v19  ;;  %v7225_v19 = vld [vmem:[%s9137_s13 + $0xb8] sm:$0xff]  }
 0x6f9   : > { %4984 = vmatprep.mubr.bf16.mxu0 %v9193_v12  ;;  %6645 = vmatpush3.bf16.msra.mxu0 %v7225_v19  ;;  %v7226_v12 = vld [vmem:[%s9137_s13 + $0x70] sm:$0xff]  }
 0x6fa   : > { %6618 = vmatprep.subr.bf16.mxu1 %v7226_v12  ;;  %6646 = vmatprep.subr.bf16.mxu0 %v7227_v61  ;;  %v3830_v61 = vld [vmem:[%s9130_s6] sm:$0x3] }
 0x6fd   : > { %6647 = vmatpush3.bf16.msra.mxu0 %v7229_v63 }
 0x6fe   : > { %6648 = vmatprep.subr.bf16.mxu0 %v7231_v28 }
 0x700   : > { %4985 = vmatmul.mubr.bf16.gmra.mxu0 %v4858_v60  ;;  %v7228_v60 = vld [vmem:[%s9137_s13 + $0x30] sm:$0xff]  }
 0x701   : > { %6619 = vmatpush3.bf16.msra.mxu1 %v7228_v60  ;;  %6649 = vmatpush3.bf16.msra.mxu0 %v7233_v57  ;;  %v3839_v57 = vrot.slane %v3830_v61, %v9195_v50 }
 0x702   : > { %6620 = vmatprep.subr.bf16.mxu1 %v7230_v43  ;;  %6650 = vmatprep.subr.bf16.mxu0 %v7235_v17  ;;  %v3835_v43 = vrot.slane %v3830_v61, %v9194_v53 }
 0x705   : > { %6621 = vmatpush3.bf16.msra.mxu1 %v7232_v40  ;;  %6651 = vmatpush3.bf16.msra.mxu0 %v7237_v13 }
 0x706   : > { %6622 = vmatprep.subr.bf16.mxu1 %v7234_v62  ;;  %6652 = vmatprep.subr.bf16.mxu0 %v7239_v34 }
 0x709   : > { %6623 = vmatpush3.bf16.msra.mxu1 %v7236_v33  ;;  %6653 = vmatpush3.bf16.msra.mxu0 %v7241_v2 }
 0x70a   : > { %6624 = vmatprep.subr.bf16.mxu1 %v7238_v32  ;;  %6654 = vmatprep.subr.bf16.mxu0 %v7243_v49 }
 0x70d   : > { %6625 = vmatpush3.bf16.msra.mxu1 %v7240_v46  ;;  %6655 = vmatpush3.bf16.msra.mxu0 %v7245_v37 }
 0x70e   : > { %6626 = vmatprep.subr.bf16.mxu1 %v7242_v9  ;;  %6656 = vmatprep.subr.bf16.mxu0 %v7247_v31 }
 0x711   : > { %6627 = vmatpush3.bf16.msra.mxu1 %v7244_v4  ;;  %6657 = vmatpush3.bf16.msra.mxu0 %v7249_v51 }
 0x712   : > { %6628 = vmatprep.subr.bf16.mxu1 %v7246_v10  ;;  %6658 = vmatprep.subr.bf16.mxu0 %v7251_v42 }
 0x715   : > { %6629 = vmatpush3.bf16.msra.mxu1 %v7248_v14  ;;  %6659 = vmatpush3.bf16.msra.mxu0 %v7253_v30 }
 0x716   : > { %6630 = vmatprep.subr.bf16.mxu1 %v7250_v0 }
 0x719   : > { %6631 = vmatpush3.bf16.msra.mxu1 %v7252_v1 }
 0x758   : > { %v3974_v22 = vpop.f32.mrf.mxu0 }
 0x759   : > { %v3993_v62 = vadd.f32 %v3974_v22, %v3835_v43 }
 0x75a   : > { %v3976_v8 = vpop.f32.mrf.mxu0 }
 0x75b   : > { %v3994_v13 = vadd.f32 %v3976_v8, %v3839_v57 }
 0x75c   : > { %v3978_v20 = vpop.f32.mrf.mxu0 }
 0x75d   : > { %v3995_v34 = vadd.f32 %v3978_v20, %v3835_v43 }
 0x75e   : > { %v3980_v21 = vpop.f32.mrf.mxu0 }
 0x75f   : > { %v3996_v4 = vadd.f32 %v3980_v21, %v3839_v57 }
 0x760   : > { %v3984_v35 = vpop.f32.mrf.mxu0 }
 0x761   : > { %v4149_v6 = vpop.f32.mrf.mxu1  ;;  %v3997_v53 = vadd.f32 %v3984_v35, %v3835_v43 }
 0x762   : > { %v3986_v23 = vpop.f32.mrf.mxu0  ;;  %v4168_v32 = vadd.f32 %v4149_v6, %v3993_v62 }
 0x763   : > { %v4151_v16 = vpop.f32.mrf.mxu1  ;;  %v3998_v42 = vadd.f32 %v3986_v23, %v3839_v57 }
 0x764   : > { %v3988_v52 = vpop.f32.mrf.mxu0  ;;  %v4169_v46 = vadd.f32 %v4151_v16, %v3994_v13 }
 0x765   : > { %v4153_v11 = vpop.f32.mrf.mxu1 }
 0x766   : > { %v9070_v24 = vpop.f32.mrf.mxu0  ;;  %v4170_v37 = vadd.f32 %v4153_v11, %v3995_v34 }
 0x767   : > { %v4155_v18 = vpop.f32.mrf.mxu1 }
 0x768   : > { %v4171_v14 = vadd.f32 %v4155_v18, %v3996_v4 }
 0x769   : > { %v4159_v55 = vpop.f32.mrf.mxu1 }
 0x76a   : > { %v4172_v1 = vadd.f32 %v4159_v55, %v3997_v53 }
 0x76b   : > { %v4161_v58 = vpop.f32.mrf.mxu1 }
 0x76c   : > { %v4173_v21 = vadd.f32 %v4161_v58, %v3998_v42 }
 0x76d   : > { %v9072_v26 = vpop.f32.mrf.mxu1 }
 0x76f   : > { %v9074_v48 = vpop.f32.mrf.mxu1 }
 0x778   : > { %v4314_v38 = vpop.f32.mrf.mxu0 }
 0x779   : > { %v4333_v2 = vadd.f32 %v4314_v38, %v4168_v32  ;;  %v3999_v38 = vadd.f32 %v3988_v52, %v3835_v43 }
 0x77a   : > { %v4316_v25 = vpop.f32.mrf.mxu0 }
 0x77b   : > { %v4334_v10 = vadd.f32 %v4316_v25, %v4169_v46  ;;  %v4174_v23 = vadd.f32 %v9072_v26, %v3999_v38 }
 0x77c   : > { %v4318_v47 = vpop.f32.mrf.mxu0 }
 0x77d   : > { %v4335_v51 = vadd.f32 %v4318_v47, %v4170_v37  ;;  %v4000_v47 = vadd.f32 %v9070_v24, %v3839_v57 }
 0x77e   : > { %v4320_v5 = vpop.f32.mrf.mxu0 }
 0x77f   : > { %v4336_v8 = vadd.f32 %v4320_v5, %v4171_v14 }
 0x780   : > { %v4324_v36 = vpop.f32.mrf.mxu0 }
 0x781   : > { %v4481_v56 = vpop.f32.mrf.mxu1  ;;  %v4337_v11 = vadd.f32 %v4324_v36, %v4172_v1 }
 0x782   : > { %v4326_v15 = vpop.f32.mrf.mxu0  ;;  %v4500_v31 = vadd.f32 %v4481_v56, %v4333_v2 }
 0x783   : > { %v4483_v7 = vpop.f32.mrf.mxu1  ;;  %v4338_v55 = vadd.f32 %v4326_v15, %v4173_v21 }
 0x784   : > { %v9076_v29 = vpop.f32.mrf.mxu0  ;;  %v4501_v0 = vadd.f32 %v4483_v7, %v4334_v10 }
 0x785   : > { %v4485_v27 = vpop.f32.mrf.mxu1  ;;  %v4339_v24 = vadd.f32 %v9076_v29, %v4174_v23 }
 0x786   : > { %v9078_v3 = vpop.f32.mrf.mxu0  ;;  %v4502_v20 = vadd.f32 %v4485_v27, %v4335_v51 }
 0x787   : > { %v4487_v39 = vpop.f32.mrf.mxu1 }
 0x788   : > { %v4503_v25 = vadd.f32 %v4487_v39, %v4336_v8  ;;  %v4175_v39 = vadd.f32 %v9074_v48, %v4000_v47 }
 0x789   : > { %v4491_v41 = vpop.f32.mrf.mxu1 }
 0x78a   : > { %v4504_v7 = vadd.f32 %v4491_v41, %v4337_v11  ;;  %v4340_v43 = vadd.f32 %v9078_v3, %v4175_v39 }
 0x78b   : > { %v4493_v54 = vpop.f32.mrf.mxu1 }
 0x78c   : > { %v4505_v26 = vadd.f32 %v4493_v54, %v4338_v55 }
 0x78d   : > { %v9080_v59 = vpop.f32.mrf.mxu1 }
 0x78f   : > { %v9082_v12 = vpop.f32.mrf.mxu1 }
 0x790   : > { %v4507_v48 = vadd.f32 %v9082_v12, %v4340_v43 }
 0x798   : > { %v4644_v44 = vpop.f32.mrf.mxu0 }
 0x799   : > { %v4663_v50 = vadd.f32 %v4644_v44, %v4500_v31 }
 0x79a   : > { %v4646_v45 = vpop.f32.mrf.mxu0 }
 0x79b   : > { %v4664_v6 = vadd.f32 %v4646_v45, %v4501_v0 }
 0x79c   : > { %v4648_v19 = vpop.f32.mrf.mxu0 }
 0x79d   : > { %v4665_v56 = vadd.f32 %v4648_v19, %v4502_v20 }
 0x79e   : > { %v4650_v60 = vpop.f32.mrf.mxu0 }
 0x79f   : > { %v4666_v58 = vadd.f32 %v4650_v60, %v4503_v25  ;;  %v4506_v60 = vadd.f32 %v9080_v59, %v4339_v24 }
 0x7a0   : > { %v4654_v28 = vpop.f32.mrf.mxu0 }
 0x7a1   : > { %v4812_v63 = vpop.f32.mrf.mxu1  ;;  %v4667_v41 = vadd.f32 %v4654_v28, %v4504_v7 }
 0x7a2   : > { %v4656_v17 = vpop.f32.mrf.mxu0  ;;  %v4831_v16 = vadd.f32 %v4812_v63, %v4663_v50 }
 0x7a3   : > { %v4814_v40 = vpop.f32.mrf.mxu1  ;;  %v4668_v62 = vadd.f32 %v4656_v17, %v4505_v26 }
 0x7a4   : > { %v4658_v9 = vpop.f32.mrf.mxu0  ;;  %v4832_v35 = vadd.f32 %v4814_v40, %v4664_v6 }
 0x7a5   : > { %v4816_v33 = vpop.f32.mrf.mxu1  ;;  %v4669_v28 = vadd.f32 %v4658_v9, %v4506_v60 }
 0x7a6   : > { %v4660_v30 = vpop.f32.mrf.mxu0  ;;  %v4833_v5 = vadd.f32 %v4816_v33, %v4665_v56 }
 0x7a7   : > { %v4818_v49 = vpop.f32.mrf.mxu1  ;;  %v4670_v2 = vadd.f32 %v4660_v30, %v4507_v48  ;;  %v7263_v30 = vmov 0.0  }
 0x7a8   : > { %v4834_v45 = vadd.f32 %v4818_v49, %v4666_v58  ;;  %6807 = vmatprep.subr.mxu1 %v7263_v30 }
 0x7a9   : > { %v4822_v22 = vpop.f32.mrf.mxu1 }
 0x7aa   : > { %v4835_v33 = vadd.f32 %v4822_v22, %v4667_v41 }
 0x7ab   : > { %v4824_v44 = vpop.f32.mrf.mxu1 }
 0x7ac   : > { %v4836_v32 = vadd.f32 %v4824_v44, %v4668_v62 }
 0x7ad   : > { %v4826_v40 = vpop.f32.mrf.mxu1 }
 0x7ae   : > { %v4837_v4 = vadd.f32 %v4826_v40, %v4669_v28 }
 0x7af   : > { %v4828_v49 = vpop.f32.mrf.mxu1 }
 0x7b0   : > { %v4838_v53 = vadd.f32 %v4828_v49, %v4670_v2 }
 0x7b8   : > { %v4976_v61 = vpop.f32.mrf.mxu0 }
 0x7b9   : > { %v4995_v18 = vadd.f32 %v4976_v61, %v4831_v16 }
 0x7ba   : > { %v4978_v52 = vpop.f32.mrf.mxu0 }
 0x7bb   : > { %v5003_v36 = vmax.f32 %v4995_v18, 0.0  ;;  %v4996_v27 = vadd.f32 %v4978_v52, %v4832_v35 }
 0x7bc   : > { %v4980_v15 = vpop.f32.mrf.mxu0 }
 0x7bd   : > { %5011 = vst [vmem:[%s9095_s29] sm:$0xff] %v5003_v36  ;;  %v5004_v19 = vmax.f32 %v4996_v27, 0.0  ;;  %v4997_v63 = vadd.f32 %v4980_v15, %v4833_v5 }
 0x7be   : > { %v4982_v57 = vpop.f32.mrf.mxu0 }
 0x7bf   : > { %5012 = vst [vmem:[%s9095_s29 + $0x8] sm:$0xff] %v5004_v19  ;;  %v4998_v13 = vadd.f32 %v4982_v57, %v4834_v45  ;;  %v5005_v29 = vmax.f32 %v4997_v63, 0.0  ;;  %v5379_v45 = vld [vmem:[%s9134_s10] sm:$0xff] }
 0x7c0   : > { %v4986_v54 = vpop.f32.mrf.mxu0 }
 0x7c1   : > { %v5006_v34 = vmax.f32 %v4998_v13, 0.0  ;;  %v4999_v46 = vadd.f32 %v4986_v54, %v4835_v33  ;;  %v5016_v10 = vpack.c.bf16 %v5005_v29, %v5003_v36 }
 0x7c2   : > { %v4988_v3 = vpop.f32.mrf.mxu0 }
 0x7c3   : > { %v5017_v37 = vpack.c.bf16 %v5006_v34, %v5004_v19  ;;  %v5007_v59 = vmax.f32 %v4999_v46, 0.0  ;;  %v5000_v17 = vadd.f32 %v4988_v3, %v4836_v32  ;;  %v6378_v19 = vld [vmem:[%s9134_s10 + $0x8] sm:$0xff] }
 0x7c4   : > { %v4990_v31 = vpop.f32.mrf.mxu0 }
 0x7c5   : > { %6310 = vst [vmem:[%s9095_s29 + $0x10] sm:$0xff] %v5007_v59  ;;  %v5008_v12 = vmax.f32 %v5000_v17, 0.0  ;;  %v5001_v14 = vadd.f32 %v4990_v31, %v4837_v4  ;;  %5180 = vmatprep.mubr.bf16.mxu1 %v5017_v37  ;;  %5358 = vmatprep.mubr.bf16.mxu0 %v5017_v37 }
 0x7c6   : > { %v4992_v9 = vpop.f32.mrf.mxu0  ;;  %5181 = vmatmul.mubr.bf16.vlgmr.msra.gmra.mxu1 %v5016_v10  ;;  %5359 = vmatmul.mubr.bf16.vlgmr.msra.gmra.mxu0 %v5016_v10 }
 0x7c7   : > { %6311 = vst [vmem:[%s9095_s29 + $0x18] sm:$0xff] %v5008_v12  ;;  %v5002_v51 = vadd.f32 %v4992_v9, %v4838_v53  ;;  %v5009_v0 = vmax.f32 %v5001_v14, 0.0 }
 0x7c9   : > { %v5010_v50 = vmax.f32 %v5002_v51, 0.0  ;;  %v5018_v1 = vpack.c.bf16 %v5009_v0, %v5007_v59 }
 0x7cb   : > { %v5019_v42 = vpack.c.bf16 %v5010_v50, %v5008_v12 }
 0x7cd   : > { %5188 = vmatprep.mubr.bf16.mxu1 %v5019_v42  ;;  %5366 = vmatprep.mubr.bf16.mxu0 %v5019_v42 }
 0x7ce   : > { %5189 = vmatmul.mubr.bf16.gmra.mxu1 %v5018_v1  ;;  %5367 = vmatmul.mubr.bf16.gmra.mxu0 %v5018_v1 }
 0x7cf   : > { %6815 = vmatprep.mubr.msk.f32.mxu1 %vm7264_vm11, %v7263_v30 }
 0x886   : > { %v6632_v22 = vpop.f32.mrf.mxu1  ;;  %v6660_v8 = vpop.f32.mrf.mxu0 }
 0x888   : > { %v6633_v20 = vpop.f32.mrf.mxu1  ;;  %v6661_v6 = vpop.f32.mrf.mxu0 }
 0x889   : > { %v6634_v39 = vadd.f32 %v6633_v20, %v6632_v22  ;;  %v6662_v24 = vadd.f32 %v6661_v6, %v6660_v8 }
 0x88a   : > { %v6635_v16 = vpop.f32.mrf.mxu1  ;;  %v6663_v38 = vpop.f32.mrf.mxu0 }
 0x88b   : > { %v5375_v41 = vmax.f32 %v6634_v39, %v6662_v24 }
 0x88c   : > { %v6636_v21 = vpop.f32.mrf.mxu1  ;;  %v6664_v11 = vpop.f32.mrf.mxu0 }
 0x88d   : > { %v6637_v5 = vadd.f32 %v6636_v21, %v6635_v16  ;;  %v6665_v36 = vadd.f32 %v6664_v11, %v6663_v38 }
 0x88e   : > { %v6638_v61 = vpop.f32.mrf.mxu1  ;;  %v6666_v25 = vpop.f32.mrf.mxu0 }
 0x88f   : > { %v5376_v15 = vmax.f32 %v6637_v5, %v6665_v36 }
 0x890   : > { %v6639_v56 = vpop.f32.mrf.mxu1  ;;  %v6667_v35 = vpop.f32.mrf.mxu0 }
 0x891   : > { %v6640_v7 = vadd.f32 %v6639_v56, %v6638_v61  ;;  %v6668_v44 = vadd.f32 %v6667_v35, %v6666_v25 }
 0x892   : > { %v6641_v18 = vpop.f32.mrf.mxu1  ;;  %v6669_v47 = vpop.f32.mrf.mxu0 }
 0x893   : > { %v5377_v26 = vmax.f32 %v6640_v7, %v6668_v44 }
 0x894   : > { %v6642_v23 = vpop.f32.mrf.mxu1  ;;  %v6670_v55 = vpop.f32.mrf.mxu0 }
 0x895   : > { %v6643_v52 = vadd.f32 %v6642_v23, %v6641_v18  ;;  %v6671_v58 = vadd.f32 %v6670_v55, %v6669_v47 }
 0x897   : > { %v5378_v27 = vmax.f32 %v6643_v52, %v6671_v58 }
 0x899   : > { %6808 = vmatpush3.msk.msra.mxu1 %vm5384_vm12, %v5378_v27 }
 0x89a   : > { %6809 = vmatprep.subr.mxu1 %v7263_v30 }
 0x89b   : > { %6810 = vmatpush3.msra.mxu1 %v5377_v26 }
 0x89c   : > { %6811 = vmatprep.subr.mxu1 %v7263_v30 }
 0x89d   : > { %6812 = vmatpush3.msra.mxu1 %v5376_v15 }
 0x89e   : > { %6813 = vmatprep.subr.mxu1 %v7263_v30 }
 0x89f   : > { %6814 = vmatpush3.msra.mxu1 %v5375_v41 }
 0x8a0   : > { %6818 = vmatprep.subr.mxu1 %v7263_v30  ;;  %6816 = vmatmul.mubr.msk.f32.vlgmr.msra.gmra.mxu1 %vm5380_vm13, %v5379_v45 }
 0x8a1   : > { %6819 = vmatpush3.msk.msra.mxu1 %vm5384_vm12, %v5378_v27  ;;  %6826 = vmatprep.mubr.msk.f32.mxu1 %vm7264_vm11, %v7263_v30 }
 0x8a2   : > { %6820 = vmatprep.subr.mxu1 %v7263_v30 }
 0x8a3   : > { %6821 = vmatpush3.msra.mxu1 %v5377_v26 }
 0x8a4   : > { %6822 = vmatprep.subr.mxu1 %v7263_v30 }
 0x8a5   : > { %6823 = vmatpush3.msra.mxu1 %v5376_v15 }
 0x8a6   : > { %6824 = vmatprep.subr.mxu1 %v7263_v30 }
 0x8a7   : > { %6825 = vmatpush3.msra.mxu1 %v5375_v41 }
 0x8a8   : > { %6827 = vmatmul.mubr.msk.f32.vlgmr.msra.gmra.mxu1 %vm5380_vm13, %v6378_v19 }
 0x960   : > { %v5454_v63 = vpop.f32.mrf.mxu1 }
 0x962   : > { %v6817_v43 = vpop.f32.mrf.mxu1 }
 0x968   : > { %v5529_v40 = vpop.f32.mrf.mxu1 }
 0x969   : > { %v5533_v57 = vmax.f32 %v5454_v63, %v5529_v40 }
 0x96a   : > { %v6828_v60 = vpop.f32.mrf.mxu1 }
 0x96b   : > { %5534 = vst [vmem:[%s594_s22] sm:$0xff] %v5533_v57 }
 0x96c PF: > { %s28_s24 = sadd.s32 1, %s7260_s24  }
 0x96d   : > { %p25_p6 = scmp.ge.s32.totalorder %s28_s24, 4  }
 0x96f   :  { %27 = sbr.rel (!%p25_p6) target bundleno = 4 (0x4), region = 165 }

</bundles_post_ra>
